<compile_context>
chip_gen: v7x
topology: tpu7x:2x2x1
jax: 0.10.0
libtpu: 0.0.40
codegen_flags: <defaults>
</compile_context>

<pallas_src>
import functools

import jax
import jax.numpy as jnp
from jax.experimental import pallas as pl
from jax.experimental.pallas import tpu as pltpu


def _mlp_kernel(n_linear, negative_slope, *refs):
    """Fused MLP kernel for one batch tile.

    refs = (x_ref, w0, b0, ..., w_{n-1}, b_{n-1}, out_ref)
      x_ref       : (tb, emb)      compute dtype (bf16 by default)
      w_i, i<n-1  : (in_i, out_i)  compute dtype  -- MXU operand
      b_i, i<n-1  : (1, out_i)     f32
      w_{n-1}     : (1, in_last)   f32   (last weight, pre-transposed row)
      b_{n-1}     : (1, 1)         f32
      out_ref     : (1, 1, tb)     f32   (lane-dense per-tile scores)
    """
    x_ref = refs[0]
    out_ref = refs[-1]
    wb = refs[1:-1]

    h = x_ref[...]
    # Hidden layers: bf16 operands on the MXU, f32 accumulation.
    for i in range(n_linear - 1):
        w = wb[2 * i][...]                        # (in_i, out_i)
        b = wb[2 * i + 1][...]                    # (1, out_i) f32
        a = jnp.dot(h.astype(w.dtype), w,
                    preferred_element_type=jnp.float32) + b
        h = jnp.maximum(a, negative_slope * a)    # LeakyReLU(0.2)

    # Final Linear(in_last, 1): an N=1 matmul wastes the MXU, so do a VPU
    # multiply + cross-lane (XLU) reduction and write the tile's scores
    # lane-dense into the (1, 1, tb) output block.
    w_row = wb[2 * (n_linear - 1)][...]           # (1, in_last) f32
    b_last = wb[2 * (n_linear - 1) + 1][...]      # (1, 1) f32
    z = jnp.sum(h.astype(jnp.float32) * w_row, axis=-1) + b_last[0, 0]  # (tb,)

    # Sigmoid: exp on the EUP; divide via approximate reciprocal (also EUP).
    y = pl.reciprocal(1.0 + jnp.exp(-z), approx=True)
    out_ref[...] = y.reshape(out_ref.shape).astype(out_ref.dtype)


def discriminator_forward(x, weights, biases, *, batch_tile=None,
                          compute_dtype=jnp.bfloat16, negative_slope=0.2):
    """Run the fused discriminator MLP as a single Pallas kernel.

    x:       (B, emb_dim) float32
    weights: list of (in_i, out_i) float32 arrays   (== PyTorch W.T)
    biases:  list of (1, out_i)   float32 arrays
    returns: (B,) float32 in [0, 1]
    """
    B, emb_dim = x.shape
    n_linear = len(weights)
    assert len(biases) == n_linear and n_linear >= 1
    assert weights[0].shape[0] == emb_dim
    assert weights[-1].shape[1] == 1

    # ---- batch tiling ---------------------------------------------------
    # 512/256-row tiles: multiple of 128 (fills MXU M passes, incl. v5e's
    # 128-wide MXU), big enough to amortize per-grid-step overhead, small
    # enough to leave VMEM headroom on v7x and to give the parallel grid
    # axis >= 2 steps for megacore sharding.
    if batch_tile is None:
        tb = next((t for t in (512, 256, 128, 64, 32, 16, 8) if B % t == 0), B)
    else:
        tb = batch_tile
    assert B % tb == 0, "batch must be divisible by the batch tile"
    assert tb == B or tb % 16 == 0, "batch tile must be sublane aligned"
    num_tiles = B // tb

    # ---- parameters -----------------------------------------------------
    # Hidden weights -> compute dtype (bf16) for the MXU; biases stay f32.
    # The last layer (out_dim == 1) is computed on the VPU, so its weight is
    # passed pre-transposed as a (1, in_last) f32 row (no in-kernel transpose)
    # and its bias as (1, 1) f32.
    x_in = x.astype(compute_dtype if n_linear > 1 else jnp.float32)
    params = []
    param_specs = []
    for i, (w, b) in enumerate(zip(weights, biases)):
        if i < n_linear - 1:
            wp = w.astype(compute_dtype)
            bp = b.astype(jnp.float32)
        else:
            wp = w.T.astype(jnp.float32)              # (1, in_last)
            bp = b.reshape(1, 1).astype(jnp.float32)  # (1, 1)
        params += [wp, bp]
        for p in (wp, bp):
            # Grid-invariant blocks: single-buffer them (double-buffering a
            # block that is never refilled only wastes VMEM).
            param_specs.append(
                pl.BlockSpec(p.shape, lambda gi: (0, 0),
                             pipeline_mode=pl.Buffered(1)))

    x_spec = pl.BlockSpec((tb, emb_dim), lambda gi: (gi, 0))
    # Lane-dense output: one (1, 1, tb) row of scores per batch tile.
    out_spec = pl.BlockSpec((1, 1, tb), lambda gi: (gi, 0, 0))

    kernel = functools.partial(_mlp_kernel, n_linear, negative_slope)

    out = pl.pallas_call(
        kernel,
        out_shape=jax.ShapeDtypeStruct((num_tiles, 1, tb), jnp.float32),
        grid_spec=pltpu.PrefetchScalarGridSpec(
            num_scalar_prefetch=0,
            grid=(num_tiles,),
            in_specs=[x_spec] + param_specs,
            out_specs=out_spec,
        ),
        compiler_params=pltpu.CompilerParams(
            dimension_semantics=("parallel",),
            vmem_limit_bytes=64 * 1024 * 1024,
        ),
    )(x_in, *params)

    # (num_tiles, 1, tb) -> (B,)  ==  .view(-1) of the module's (B, 1) output.
    return out.reshape(-1)


def init_discriminator_params(key, emb_dim, dis_layers, dis_hid_dim):
    """Deterministic synthetic init matching the module's layer shapes."""
    weights, biases = [], []
    for i in range(dis_layers + 1):
        in_dim = emb_dim if i == 0 else dis_hid_dim
        out_dim = 1 if i == dis_layers else dis_hid_dim
        key, kw, kb = jax.random.split(key, 3)
        scale = 1.0 / jnp.sqrt(jnp.float32(in_dim))
        # stored as (in, out)  ==  PyTorch (out, in) transposed
        w = jax.random.uniform(kw, (in_dim, out_dim), jnp.float32,
                               minval=-scale, maxval=scale)
        b = jax.random.uniform(kb, (1, out_dim), jnp.float32,
                               minval=-scale, maxval=scale)
        weights.append(w)
        biases.append(b)
    return weights, biases


def _reference_forward(x, weights, biases, *, compute_dtype=jnp.float32,
                       negative_slope=0.2):
    """Pure-JAX reference.  compute_dtype=f32 == original module numerics;
    compute_dtype=bf16 mirrors the kernel's MXU operand precision."""
    n = len(weights)
    h = x.astype(jnp.float32)
    for i in range(n - 1):
        a = jnp.dot(h.astype(compute_dtype), weights[i].astype(compute_dtype),
                    preferred_element_type=jnp.float32) + biases[i]
        h = jnp.maximum(a, negative_slope * a)
    z = jnp.sum(h * weights[-1][:, 0][None, :], axis=-1) + biases[-1][0, 0]
    return jax.nn.sigmoid(z)


if __name__ == "__main__":
    # Small, module-consistent config (args.emb_dim, args.dis_layers, ...).
    emb_dim = 32
    dis_layers = 2
    dis_hid_dim = 32
    batch = 1024          # 2 batch tiles of 512 -> exercises pipelining / megacore

    key = jax.random.PRNGKey(0)
    key, kx = jax.random.split(key)
    x = jax.random.normal(kx, (batch, emb_dim), jnp.float32)

    weights, biases = init_discriminator_params(key, emb_dim, dis_layers,
                                                dis_hid_dim)

    out = discriminator_forward(x, weights, biases)
    out = jax.block_until_ready(out)
    assert out.shape == (batch,), out.shape

    # Reference with the same bf16-operand / f32-accumulate numerics.
    ref_bf16 = _reference_forward(x, weights, biases,
                                  compute_dtype=jnp.bfloat16)
    # Full-f32 reference == the original PyTorch module's numerics.
    ref_f32 = _reference_forward(x, weights, biases,
                                 compute_dtype=jnp.float32)

    assert jnp.allclose(out, ref_bf16, atol=5e-3, rtol=5e-3), \
        float(jnp.max(jnp.abs(out - ref_bf16)))
    assert jnp.allclose(out, ref_f32, atol=2e-2, rtol=2e-2), \
        float(jnp.max(jnp.abs(out - ref_f32)))

    print("KERNEL_OK")
</pallas_src>

<mosaic_0001>
module attributes {stable_mosaic.version = 11 : i64} {
  func.func @_mlp_kernel(%arg0: i32, %arg1: memref<512x32xbf16, #tpu.memory_space<vmem>>, %arg2: memref<32x32xbf16, #tpu.memory_space<vmem>>, %arg3: memref<1x32xf32, #tpu.memory_space<vmem>>, %arg4: memref<32x32xbf16, #tpu.memory_space<vmem>>, %arg5: memref<1x32xf32, #tpu.memory_space<vmem>>, %arg6: memref<1x32xf32, #tpu.memory_space<vmem>>, %arg7: memref<1x1xf32, #tpu.memory_space<vmem>>, %arg8: memref<1x1x512xf32, #tpu.memory_space<vmem>>) attributes {dimension_semantics = [#tpu.dimension_semantics<parallel>], iteration_bounds = array<i64: 2>, scalar_prefetch = 0 : i64, scratch_operands = 0 : i64, tpu.core_type = #tpu.core_type<tc>, window_params = [{transform_indices = @transform_0, window_bounds = array<i64: 512, 32>}, {pipeline_mode = #tpu.pipeline_mode<synchronous>, transform_indices = @transform_1, window_bounds = array<i64: 32, 32>}, {pipeline_mode = #tpu.pipeline_mode<synchronous>, transform_indices = @transform_2, window_bounds = array<i64: 1, 32>}, {pipeline_mode = #tpu.pipeline_mode<synchronous>, transform_indices = @transform_3, window_bounds = array<i64: 32, 32>}, {pipeline_mode = #tpu.pipeline_mode<synchronous>, transform_indices = @transform_4, window_bounds = array<i64: 1, 32>}, {pipeline_mode = #tpu.pipeline_mode<synchronous>, transform_indices = @transform_5, window_bounds = array<i64: 1, 32>}, {pipeline_mode = #tpu.pipeline_mode<synchronous>, transform_indices = @transform_6, window_bounds = array<i64: 1, 1>}, {transform_indices = @transform_7, window_bounds = array<i64: 1, 1, 512>}]} {
    %c0 = arith.constant 0 : index
    %c0_0 = arith.constant 0 : index
    %0 = vector.load %arg1[%c0, %c0_0] : memref<512x32xbf16, #tpu.memory_space<vmem>>, vector<512x32xbf16>
    %c0_1 = arith.constant 0 : index
    %c0_2 = arith.constant 0 : index
    %1 = vector.load %arg2[%c0_1, %c0_2] : memref<32x32xbf16, #tpu.memory_space<vmem>>, vector<32x32xbf16>
    %c0_3 = arith.constant 0 : index
    %c0_4 = arith.constant 0 : index
    %2 = vector.load %arg3[%c0_3, %c0_4] : memref<1x32xf32, #tpu.memory_space<vmem>>, vector<1x32xf32>
    %cst = arith.constant dense<0.000000e+00> : vector<512x32xf32>
    %3 = tpu.matmul %0, %1, %cst {dimension_numbers = #tpu.dot_dimension_numbers<[1], [0], [0], [1], [0, 0, 1, 1], [], []>} : vector<512x32xbf16>, vector<32x32xbf16>, vector<512x32xf32> -> vector<512x32xf32>
    %4 = vector.broadcast %2 : vector<1x32xf32> to vector<512x32xf32>
    %5 = arith.addf %3, %4 : vector<512x32xf32>
    %cst_5 = arith.constant 2.000000e-01 : f32
    %6 = vector.broadcast %cst_5 : f32 to vector<512x32xf32>
    %7 = arith.mulf %6, %5 : vector<512x32xf32>
    %8 = arith.maximumf %5, %7 : vector<512x32xf32>
    %c0_6 = arith.constant 0 : index
    %c0_7 = arith.constant 0 : index
    %9 = vector.load %arg4[%c0_6, %c0_7] : memref<32x32xbf16, #tpu.memory_space<vmem>>, vector<32x32xbf16>
    %c0_8 = arith.constant 0 : index
    %c0_9 = arith.constant 0 : index
    %10 = vector.load %arg5[%c0_8, %c0_9] : memref<1x32xf32, #tpu.memory_space<vmem>>, vector<1x32xf32>
    %11 = arith.truncf %8 : vector<512x32xf32> to vector<512x32xbf16>
    %cst_10 = arith.constant dense<0.000000e+00> : vector<512x32xf32>
    %12 = tpu.matmul %11, %9, %cst_10 {dimension_numbers = #tpu.dot_dimension_numbers<[1], [0], [0], [1], [0, 0, 1, 1], [], []>} : vector<512x32xbf16>, vector<32x32xbf16>, vector<512x32xf32> -> vector<512x32xf32>
    %13 = vector.broadcast %10 : vector<1x32xf32> to vector<512x32xf32>
    %14 = arith.addf %12, %13 : vector<512x32xf32>
    %cst_11 = arith.constant 2.000000e-01 : f32
    %15 = vector.broadcast %cst_11 : f32 to vector<512x32xf32>
    %16 = arith.mulf %15, %14 : vector<512x32xf32>
    %17 = arith.maximumf %14, %16 : vector<512x32xf32>
    %c0_12 = arith.constant 0 : index
    %c0_13 = arith.constant 0 : index
    %18 = vector.load %arg6[%c0_12, %c0_13] : memref<1x32xf32, #tpu.memory_space<vmem>>, vector<1x32xf32>
    %c0_14 = arith.constant 0 : index
    %c0_15 = arith.constant 0 : index
    %19 = vector.load %arg7[%c0_14, %c0_15] : memref<1x1xf32, #tpu.memory_space<vmem>>, vector<1x1xf32>
    %20 = vector.broadcast %18 : vector<1x32xf32> to vector<512x32xf32>
    %21 = arith.mulf %17, %20 : vector<512x32xf32>
    %cst_16 = arith.constant dense<0.000000e+00> : vector<512xf32>
    %22 = vector.multi_reduction <add>, %21, %cst_16 [1] : vector<512x32xf32> to vector<512xf32>
    %23 = vector.extract %19[0, 0] : f32 from vector<1x1xf32>
    %24 = vector.broadcast %23 : f32 to vector<512xf32>
    %25 = arith.addf %22, %24 : vector<512xf32>
    %cst_17 = arith.constant 0.000000e+00 : f32
    %26 = vector.broadcast %cst_17 : f32 to vector<512xf32>
    %27 = arith.subf %26, %25 : vector<512xf32>
    %28 = math.exp %27 : vector<512xf32>
    %cst_18 = arith.constant 1.000000e+00 : f32
    %29 = vector.broadcast %cst_18 : f32 to vector<512xf32>
    %30 = arith.addf %29, %28 : vector<512xf32>
    %31 = tpu.reciprocal %30 {approx = true} : vector<512xf32> -> vector<512xf32>
    %32 = vector.shape_cast %31 : vector<512xf32> to vector<1x1x512xf32>
    %c0_19 = arith.constant 0 : index
    %c0_20 = arith.constant 0 : index
    %c0_21 = arith.constant 0 : index
    %33 = vector.load %arg8[%c0_19, %c0_20, %c0_21] : memref<1x1x512xf32, #tpu.memory_space<vmem>>, vector<1x1x512xf32>
    tpu.vector_store %arg8[%c0_19, %c0_20, %c0_21], %32 {strides = array<i32>} : memref<1x1x512xf32, #tpu.memory_space<vmem>>, vector<1x1x512xf32>,
    return
  }
  func.func @transform_0(%arg0: i32) -> (i32, i32) {
    %c0_i32 = arith.constant 0 : i32
    %c0_i32_0 = arith.constant 0 : i32
    return %arg0, %c0_i32 : i32, i32
  }
  func.func @transform_1(%arg0: i32) -> (i32, i32) {
    %c0_i32 = arith.constant 0 : i32
    %c0_i32_0 = arith.constant 0 : i32
    %c0_i32_1 = arith.constant 0 : i32
    return %c0_i32, %c0_i32_0 : i32, i32
  }
  func.func @transform_2(%arg0: i32) -> (i32, i32) {
    %c0_i32 = arith.constant 0 : i32
    %c0_i32_0 = arith.constant 0 : i32
    %c0_i32_1 = arith.constant 0 : i32
    return %c0_i32, %c0_i32_0 : i32, i32
  }
  func.func @transform_3(%arg0: i32) -> (i32, i32) {
    %c0_i32 = arith.constant 0 : i32
    %c0_i32_0 = arith.constant 0 : i32
    %c0_i32_1 = arith.constant 0 : i32
    return %c0_i32, %c0_i32_0 : i32, i32
  }
  func.func @transform_4(%arg0: i32) -> (i32, i32) {
    %c0_i32 = arith.constant 0 : i32
    %c0_i32_0 = arith.constant 0 : i32
    %c0_i32_1 = arith.constant 0 : i32
    return %c0_i32, %c0_i32_0 : i32, i32
  }
  func.func @transform_5(%arg0: i32) -> (i32, i32) {
    %c0_i32 = arith.constant 0 : i32
    %c0_i32_0 = arith.constant 0 : i32
    %c0_i32_1 = arith.constant 0 : i32
    return %c0_i32, %c0_i32_0 : i32, i32
  }
  func.func @transform_6(%arg0: i32) -> (i32, i32) {
    %c0_i32 = arith.constant 0 : i32
    %c0_i32_0 = arith.constant 0 : i32
    %c0_i32_1 = arith.constant 0 : i32
    return %c0_i32, %c0_i32_0 : i32, i32
  }
  func.func @transform_7(%arg0: i32) -> (i32, i32, i32) {
    %c0_i32 = arith.constant 0 : i32
    %c0_i32_0 = arith.constant 0 : i32
    %c0_i32_1 = arith.constant 0 : i32
    return %arg0, %c0_i32, %c0_i32_0 : i32, i32, i32
  }
}

</mosaic_0001>

<bundles_post_ra>
// kernel: tpu_custom_call.1
= control target key start
LH: loop header
LB: loop body
LE: loop exit
PB: predicated region body
PF: predicated region fallthrough
CT: control target
= control target key end

     0   :  { %s11919_s0 = inlined_call_operand.hbm [shape: bf16[1024,32], index: 0, kind: input, shape index: {}]   ;;  %s11920_s1 = inlined_call_operand.hbm [shape: bf16[32,32], index: 1, kind: input, shape index: {}]   ;;  %s11921_s2 = inlined_call_operand.hbm [shape: f32[1,32], index: 2, kind: input, shape index: {}]   ;;  %s11922_s3 = inlined_call_operand.hbm [shape: bf16[32,32], index: 3, kind: input, shape index: {}]   ;;  %s11923_s4 = inlined_call_operand.hbm [shape: f32[1,32], index: 4, kind: input, shape index: {}]   ;;  %s11924_s5 = inlined_call_operand.hbm [shape: f32[1,32], index: 5, kind: input, shape index: {}]   ;;  %s11925_s6 = inlined_call_operand.<no memory space> [shape: f32[1,1], index: 6, kind: input, shape index: {}]   ;;  %s11926_s7 = inlined_call_operand.hbm [shape: f32[2,1,512], index: 7, kind: output, shape index: {}]  }
   0x1   :  { %v12_v0 = vstv %s11925_s6 }
   0x2   :  { %13 = vst [vmem:[#allocation2] sm:$0x1] %v12_v0 }
   0x3   :  { %14 = vsyncpa [#allocation4], 0 }
   0x4   :  { %16 = vsyncpa [#allocation4 + $0x1], 0 }
   0x5   :  { %17 = vsyncpa [#allocation7], 0 }
   0x6   :  { %18 = vsyncpa [#allocation10], 0 }
   0x7   :  { %19 = vsyncpa [#allocation13], 0 }
   0x8   :  { %20 = vsyncpa [#allocation5], 0 }
   0x9   :  { %22 = vsyncpa [#allocation5 + $0x1], 0  ;;  %s9332_s26 = smov 0   ;;  %s9334_s27 = smov 0  }
   0xa   :  { %s9336_s28 = smov 0   ;;  %s9338_s29 = smov 0  }
   0xb LB: > { %s9278_s6 = smov [#allocation6]   ;;  %s9353_s8 = sadd.s32 4294967295, %s9276_s29   ;;  %s9276_s29 = sphi %s9338_s29, %s11963_s29   ;;  %s9272_s28 = sphi %s9336_s28, %s11962_s28   ;;  %s9268_s27 = sphi %s9334_s27, %s11961_s27   ;;  %s9264_s26 = sphi %s9332_s26, %s11960_s26  }
   0xc   : > { %s223_s30 = sshll.u32 %s9278_s6, 4  ;;  %p8299_p0 = scmp.ge.s32.totalorder %s9276_s29, 1  ;;  %s9358_s30 = int_to_ptr.vmem [resolvable:$true] %s223_s30 }
   0xd   : > { %p11927_p1 = scmp.eq.s32.totalorder %s9353_s8, 0  ;;  %p211_p2 = scmp.lt.s32.totalorder %s9276_s29, 3 }
   0xe   : > { %s9279_s10 = smov [#allocation9]   ;;  %s9280_s13 = smov [#allocation8]  }
   0xf   : > { %p9360_p3 = pnand %p8299_p0, %p211_p2  ;;  %s247_s11 = sshll.u32 %s9279_s10, 4  ;;  %s9373_s11 = int_to_ptr.vmem [resolvable:$true] %s247_s11 }
  0x10   : > { %s237_s14 = sshll.u32 %s9280_s13, 4  ;;  %s9028_s17 = scalar_lea.hbm %s11920_s1, 256  ;;  %s9375_s14 = int_to_ptr.vmem [resolvable:$true] %s237_s14 }
  0x11   : > { %s11933_s9 = scalar_select %p9360_p3, 1, 0 }
  0x12   : > { %p8657_p5 = pneg %p9360_p3  ;;  %p9029_p7 = scmp.ne.s32.totalorder %s11920_s1, %s9028_s17 }
  0x13   : > { %p9035_p11 = scmp.lt.u32.totalorder %s9028_s17, %s11920_s1 }
  0x14   : > { %p9369_p6 = pnand %p8657_p5, %p11927_p1 }
  0x16   : > { %p9385_p8 = pneg %p9369_p6 }
  0x18   : > { %p9031_p9 = pnand %p9385_p8, %p9029_p7 }
  0x1a   : > { %p9032_p10 = pneg %p9031_p9 }
  0x1c   : > { %p9037_p12 = pnand %p9035_p11, %p9032_p10 }
  0x1e   : > { %9040 = shalt.err (!%p9037_p12)
}
  0x1f   : > { %s9041_s23 = scalar_lea.vmem %s9358_s30, 256  ;;  %p9049_p5 = scmp.lt.s32.totalorder %s9358_s30, %s9358_s30 }
  0x20   : > { %p9042_p13 = scmp.ne.s32.totalorder %s9358_s30, %s9041_s23  ;;  %p9050_p4 = scmp.lt.s32.totalorder %s9041_s23, %s9041_s23 }
  0x22   : > { %p9044_p0 = pnand %p9042_p13, %p9385_p8  ;;  %p9051_p7 = por %p9050_p4, %p9049_p5 }
  0x24   : > { %p9045_p2 = pneg %p9044_p0 }
  0x26   : > { %p9052_p9 = pnand %p9051_p7, %p9045_p2 }
  0x28   : > { %9055 = shalt.err (!%p9052_p9)
}
  0x29   : > { %s9281_s24 = smov 64   ;;  %s9282_s25 = smov 4  }
  0x2a   : > { %8660 = dma.hbm_to_vmem [thread:$0]  (!%p9369_p6), %s11920_s1, 256, %s9358_s30, [#allocation7], %s9281_s24, %s9281_s24, %s9282_s25  }
  0x2b   : > { %s9056_s16 = scalar_lea.hbm %s11922_s3, 256 }
  0x2c   : > { %p9057_p4 = scmp.ne.s32.totalorder %s11922_s3, %s9056_s16  ;;  %p9063_p12 = scmp.lt.u32.totalorder %s9056_s16, %s11922_s3 }
  0x2e   : > { %p9059_p10 = pnand %p9057_p4, %p9385_p8 }
  0x30   : > { %p9060_p11 = pneg %p9059_p10 }
  0x32   : > { %p9065_p13 = pnand %p9063_p12, %p9060_p11 }
  0x34   : > { %9068 = shalt.err (!%p9065_p13)
}
  0x35   : > { %s9069_s30 = scalar_lea.vmem %s9373_s11, 256  ;;  %p9077_p7 = scmp.lt.s32.totalorder %s9373_s11, %s9373_s11 }
  0x36   : > { %p9070_p0 = scmp.ne.s32.totalorder %s9373_s11, %s9069_s30  ;;  %p9078_p9 = scmp.lt.s32.totalorder %s9069_s30, %s9069_s30 }
  0x38   : > { %p9072_p2 = pnand %p9070_p0, %p9385_p8  ;;  %p9079_p4 = por %p9078_p9, %p9077_p7 }
  0x3a   : > { %p9073_p5 = pneg %p9072_p2 }
  0x3c   : > { %p9080_p10 = pnand %p9079_p4, %p9073_p5 }
  0x3e   : > { %9083 = shalt.err (!%p9080_p10)
}
  0x3f   : > { %8666 = dma.hbm_to_vmem [thread:$0]  (!%p9369_p6), %s11922_s3, 256, %s9373_s11, [#allocation10], %s9281_s24, %s9281_s24, %s9282_s25  }
  0x40   : > { %s9084_s13 = scalar_lea.hbm %s11921_s2, 16 }
  0x41   : > { %p9085_p11 = scmp.ne.s32.totalorder %s11921_s2, %s9084_s13  ;;  %p9091_p0 = scmp.lt.u32.totalorder %s9084_s13, %s11921_s2 }
  0x43   : > { %p9087_p12 = pnand %p9085_p11, %p9385_p8 }
  0x45   : > { %p9088_p13 = pneg %p9087_p12 }
  0x47   : > { %p9093_p2 = pnand %p9091_p0, %p9088_p13 }
  0x49   : > { %9096 = shalt.err (!%p9093_p2)
}
  0x4a   : > { %s9097_s11 = scalar_lea.vmem %s9375_s14, 16  ;;  %s9104_s19 = scalar_lea.vmem %s9375_s14, 32 }
  0x4b   : > { %p9098_p5 = scmp.ne.s32.totalorder %s9375_s14, %s9097_s11  ;;  %p9105_p4 = scmp.lt.s32.totalorder %s9375_s14, %s9375_s14 }
  0x4c   : > { %p9106_p10 = scmp.lt.s32.totalorder %s9104_s19, %s9097_s11 }
  0x4d   : > { %p9100_p7 = pnand %p9098_p5, %p9385_p8 }
  0x4e   : > { %p9107_p11 = por %p9106_p10, %p9105_p4 }
  0x4f   : > { %p9101_p9 = pneg %p9100_p7 }
  0x51   : > { %p9108_p12 = pnand %p9107_p11, %p9101_p9 }
  0x53   : > { %9111 = shalt.err (!%p9108_p12)
}
  0x54   : > { %8663 = dma.hbm_to_vmem [thread:$0]  (!%p9369_p6), %s11921_s2, 16, %s9375_s14, [#allocation7]  }
  0x55   : > { %s9283_s22 = smov [#allocation11]   ;;  %s9284_s6 = smov [#allocation12]  }
  0x56   : > { %s261_s23 = sshll.u32 %s9283_s22, 4  ;;  %s272_s10 = sshll.u32 %s9284_s6, 4  ;;  %s262_s23 = int_to_ptr.vmem [resolvable:$true] %s261_s23  ;;  %s273_s10 = int_to_ptr.vmem [resolvable:$true] %s272_s10 }
  0x57   : > { %s9112_s16 = scalar_lea.hbm %s11923_s4, 16 }
  0x58   : > { %p9113_p13 = scmp.ne.s32.totalorder %s11923_s4, %s9112_s16  ;;  %p9119_p5 = scmp.lt.u32.totalorder %s9112_s16, %s11923_s4 }
  0x5a   : > { %p9115_p0 = pnand %p9113_p13, %p9385_p8 }
  0x5c   : > { %p9116_p2 = pneg %p9115_p0 }
  0x5e   : > { %p9121_p7 = pnand %p9119_p5, %p9116_p2 }
  0x60   : > { %9124 = shalt.err (!%p9121_p7)
}
  0x61   : > { %s9125_s14 = scalar_lea.vmem %s262_s23, 16  ;;  %s9132_s21 = scalar_lea.vmem %s262_s23, 32 }
  0x62   : > { %p9126_p9 = scmp.ne.s32.totalorder %s262_s23, %s9125_s14  ;;  %p9133_p11 = scmp.lt.s32.totalorder %s262_s23, %s262_s23 }
  0x63   : > { %p9134_p12 = scmp.lt.s32.totalorder %s9132_s21, %s9125_s14 }
  0x64   : > { %p9128_p4 = pnand %p9126_p9, %p9385_p8 }
  0x65   : > { %p9135_p1 = por %p9134_p12, %p9133_p11 }
  0x66   : > { %p9129_p10 = pneg %p9128_p4 }
  0x68   : > { %p9136_p3 = pnand %p9135_p1, %p9129_p10 }
  0x6a   : > { %9139 = shalt.err (!%p9136_p3)
}
  0x6b   : > { %8669 = dma.hbm_to_vmem [thread:$0]  (!%p9369_p6), %s11923_s4, 16, %s262_s23, [#allocation10]  }
  0x6c   : > { %s9140_s15 = scalar_lea.hbm %s11924_s5, 16 }
  0x6d   : > { %p9141_p13 = scmp.ne.s32.totalorder %s11924_s5, %s9140_s15  ;;  %p9147_p3 = scmp.lt.u32.totalorder %s9140_s15, %s11924_s5 }
  0x6f   : > { %p9143_p0 = pnand %p9141_p13, %p9385_p8 }
  0x71   : > { %p9144_p1 = pneg %p9143_p0 }
  0x73   : > { %p9149_p2 = pnand %p9147_p3, %p9144_p1 }
  0x75   : > { %9152 = shalt.err (!%p9149_p2)
}
  0x76   : > { %s9153_s19 = scalar_lea.vmem %s273_s10, 16  ;;  %s9160_s23 = scalar_lea.vmem %s273_s10, 32 }
  0x77   : > { %p9154_p5 = scmp.ne.s32.totalorder %s273_s10, %s9153_s19  ;;  %p9161_p4 = scmp.lt.s32.totalorder %s273_s10, %s273_s10 }
  0x78   : > { %p9162_p10 = scmp.lt.s32.totalorder %s9160_s23, %s9153_s19 }
  0x79   : > { %p9156_p7 = pnand %p9154_p5, %p9385_p8 }
  0x7a   : > { %p9163_p11 = por %p9162_p10, %p9161_p4 }
  0x7b   : > { %p9157_p9 = pneg %p9156_p7 }
  0x7d   : > { %p9164_p12 = pnand %p9163_p11, %p9157_p9 }
  0x7f   : > { %9167 = shalt.err (!%p9164_p12)
}
  0x80   : > { %8672 = dma.hbm_to_vmem [thread:$0]  (!%p9369_p6), %s11924_s5, 16, %s273_s10, [#allocation13]  }
  0x81   : > { %s8298_s20 = sadd.s32 4294967294, %s9276_s29   ;;  %s9497_s12 = sadd.s32 1, %s9276_s29  }
  0x82   : > { %s35_s30 = sadd.s32 1, %s9272_s28  ;;  %s32_s22 = ssub.s32 %s9276_s29, %s9497_s12 }
  0x83   : > { %p42_p8 = scmp.ne.s32.totalorder %s9272_s28, %s9268_s27  ;;  %p33_p13 = scmp.eq.s32.totalorder %s32_s22, 0 }
  0x84   : > { %p43_p0 = scmp.eq.s32.totalorder %s9276_s29, 0  ;;  %p48_p1 = scmp.ne.s32.totalorder %s9268_s27, %s9264_s26 }
  0x85   : > { %p198_p3 = scmp.eq.s32.totalorder %s9353_s8, 1  ;;  %p11936_p5 = scmp.eq.s32.totalorder %s9353_s8, 0 }
  0x86   : > { %s9509_s6 = scalar_select %p33_p13, %s9272_s28, %s35_s30  }
  0x87   : > { %p44_p2 = por %p43_p0, %p42_p8  ;;  %p9513_p7 = por %p11936_p5, %p48_p1 }
  0x88   : > { %p9517_p6 = por %p198_p3, %p42_p8  ;;  %p204_p9 = scmp.eq.s32.totalorder %s8298_s20, 1 }
  0x89   : > { %p8686_p4 = scmp.lt.s32.totalorder %s9276_s29, 2  ;;  %s286_s15 = sand.u32 1, %s9272_s28  }
  0x8a   : > { %s11938_s10 = scalar_select %p9517_p6, 1, 0 }
  0x8b   : > { %p9523_p10 = por %p204_p9, %p48_p1  ;;  %s8306_s17 = sshll.u32 %s286_s15, 8 }
  0x8c   : > { %s8425_s18 = sshll.u32 %s9276_s29, 12  ;;  %s290_s14 = scalar_lea.vmem [#allocation3], %s8306_s17 }
  0x8d   : > { %s11939_s16 = scalar_select %p9523_p10, 1, 0 }
  0x8e   : > { %s9531_s23 = scalar_lea.hbm %s11919_s0, %s8425_s18  ;;  %s297_s21 = sshll.u32 %s290_s14, 4  ;;  %s9537_s21 = int_to_ptr.vmem [resolvable:$true] %s297_s21 }
  0x8f   : > { %p9533_p11 = pnand %p8686_p4, %p44_p2  ;;  %s9539_s30 = scalar_lea.sflag [#allocation4], %s286_s15 }
  0x90   : > { %s9168_s22 = scalar_lea.hbm %s9531_s23, 4096  ;;  %s9173_s11 = scalar_lea.hbm %s11919_s0, 8192 }
  0x91   : > { %p9169_p12 = scmp.ne.s32.totalorder %s9531_s23, %s9168_s22  ;;  %p9170_p8 = pneg %p9533_p11 }
  0x92   : > { %p9174_p1 = scmp.lt.u32.totalorder %s9531_s23, %s11919_s0  ;;  %p9175_p3 = scmp.lt.u32.totalorder %s9173_s11, %s9168_s22 }
  0x93   : > { %p9171_p13 = pnand %p9170_p8, %p9169_p12  ;;  %p9177_p5 = scmp.lt.u32.totalorder %s9168_s22, %s9531_s23 }
  0x94   : > { %p9176_p2 = por %p9175_p3, %p9174_p1 }
  0x95   : > { %p9172_p0 = pneg %p9171_p13 }
  0x96   : > { %p9178_p9 = por %p9177_p5, %p9176_p2 }
  0x98   : > { %p9179_p4 = pnand %p9178_p9, %p9172_p0 }
  0x9a   : > { %9182 = shalt.err (!%p9179_p4)
}
  0x9b   : > { %s9183_s15 = scalar_lea.vmem %s9537_s21, 4096  ;;  %s9285_s17 = smov [#allocation3]  }
  0x9c   : > { %p9184_p12 = scmp.ne.s32.totalorder %s9537_s21, %s9183_s15  ;;  %s9188_s18 = sshll.u32 %s9285_s17, 4  ;;  %s9189_s18 = int_to_ptr.vmem [resolvable:$false] %s9188_s18 }
  0x9d   : > { %s9190_s19 = scalar_lea.vmem %s9189_s18, 8192  ;;  %p9191_p6 = scmp.lt.s32.totalorder %s9537_s21, %s9189_s18 }
  0x9e   : > { %p9186_p13 = pnand %p9184_p12, %p9170_p8  ;;  %p9192_p1 = scmp.lt.s32.totalorder %s9190_s19, %s9183_s15 }
  0xa0   : > { %p9187_p10 = pneg %p9186_p13  ;;  %p9193_p3 = por %p9192_p1, %p9191_p6 }
  0xa2   : > { %p9194_p2 = pnand %p9193_p3, %p9187_p10 }
  0xa4   : > { %9197 = shalt.err (!%p9194_p2)
}
  0xa5   : > { %8676 = dma.hbm_to_vmem [thread:$0]  (!%p9533_p11), %s9531_s23, 4096, %s9537_s21, %s9539_s30, %s9281_s24, %s9281_s24, %s9282_s25  }
  0xa6   : > { %p11941_p8 = scmp.ne.s32.totalorder %s11933_s9, 0 }
  0xa8   : > { %309 = sbr.rel (%p11941_p8) target bundleno = 1391 (0x56f), region = 48 }
  0xaf   : > { %s9573_s22 = sand.u32 1, %s9268_s27  }
  0xb0   : > { %s8310_s11 = sshll.u32 %s9573_s22, 8  ;;  %s312_s14 = scalar_lea.sflag [#allocation4], %s9573_s22 }
  0xb1   : > { %s9577_s15 = scalar_lea.vmem [#allocation3], %s8310_s11 }
  0xb2   : > { %9243 = dma.done.wait (%p9513_p7), %s312_s14, 4096  }
  0xb3   : > { %9245 = vsyncadd (%p9513_p7), %s312_s14, 4294963200  ;;  %p11942_p6 = scmp.eq.s32.totalorder %s9353_s8, 0 }
  0xb5   : > { %9247 = dma.done.wait (%p11942_p6), [#allocation7], 272   ;;  %p11943_p10 = pmov %p11942_p6 }
  0xb6   : > { %p11944_p11 = pmov %p11942_p6 }
  0xb7   : > { %9249 = vsyncadd (%p11943_p10), [#allocation7], 4294967024 }
  0xb8   : > { %9251 = dma.done.wait (%p11944_p11), [#allocation10], 272   ;;  %p11945_p0 = pmov %p11942_p6 }
  0xba   : > { %9253 = vsyncadd (%p11945_p0), [#allocation10], 4294967024  ;;  %p11946_p5 = pmov %p11945_p0 }
  0xbb   : > { %p11947_p9 = pmov %p11945_p0 }
  0xbc   : > { %9255 = dma.done.wait (%p11946_p5), [#allocation13], 16  }
  0xbd   : > { %9257 = vsyncadd (%p11947_p9), [#allocation13], 4294967280  ;;  %v8736_v1 = vld [vmem:[#allocation6] sm:$0xff]   ;;  %v8737_v2 = vld [vmem:[#allocation6 + $0x8] sm:$0xff]   ;;  %vm615_vm0 = vcmask 261120   ;;  %vm7798_vm1 = vcmask 130112  }
  0xbe   : > { %8495 = vmatprep.subr.bf16.mxu0 %v8736_v1  ;;  %v8738_v3 = vld [vmem:[%s9577_s15] sm:$0xff]   ;;  %v8739_v4 = vld [vmem:[%s9577_s15 + $0x8] sm:$0xff]   ;;  %v8740_v5 = vld [vmem:[%s9577_s15 + $0x10] sm:$0xff]   ;;  %vm7805_vm2 = vcmask 195712   ;;  %vm7812_vm3 = vcmask 261312   ;;  %vm7819_vm4 = vcmask 326912  }
  0xbf   : > { %8496 = vmatpush3.bf16.msra.mxu0 %v8736_v1  ;;  %8499 = vmatprep.mubr.msk.bf16.mxu0 %vm615_vm0, %v8738_v3  ;;  %v8741_v6 = vld [vmem:[%s9577_s15 + $0x18] sm:$0xff]   ;;  %v8742_v7 = vld [vmem:[%s9577_s15 + $0x20] sm:$0xff]   ;;  %v8743_v8 = vld [vmem:[%s9577_s15 + $0x28] sm:$0xff]   ;;  %vm7826_vm5 = vcmask 392512   ;;  %vm7833_vm6 = vcmask 458112   ;;  %vm7840_vm7 = vcmask 523712  }
  0xc0   : > { %8497 = vmatprep.subr.bf16.mxu0 %v8737_v2  ;;  %v8744_v9 = vld [vmem:[%s9577_s15 + $0x30] sm:$0xff]   ;;  %v8745_v10 = vld [vmem:[%s9577_s15 + $0x38] sm:$0xff]   ;;  %v8746_v11 = vld [vmem:[%s9577_s15 + $0x40] sm:$0xff]   ;;  %vm7847_vm8 = vcmask 589312   ;;  %vm7854_vm9 = vcmask 654912   ;;  %vm7861_vm10 = vcmask 720512  }
  0xc1   : > { %v8747_v12 = vld [vmem:[%s9577_s15 + $0x48] sm:$0xff]   ;;  %v8748_v13 = vld [vmem:[%s9577_s15 + $0x50] sm:$0xff]   ;;  %v8749_v14 = vld [vmem:[%s9577_s15 + $0x58] sm:$0xff]   ;;  %vm7868_vm11 = vcmask 786112   ;;  %vm7875_vm12 = vcmask 851712   ;;  %vm7882_vm13 = vcmask 917312  }
  0xc2   : > { %v8750_v15 = vld [vmem:[%s9577_s15 + $0x60] sm:$0xff]   ;;  %v8751_v16 = vld [vmem:[%s9577_s15 + $0x68] sm:$0xff]   ;;  %v8752_v17 = vld [vmem:[%s9577_s15 + $0x70] sm:$0xff]   ;;  %vm7889_vm14 = vcmask 982912   ;;  %vm7896_vm15 = vcmask 1048512   ;;  %s8316_s24 = sshll.u32 %s9573_s22, 2 }
  0xc3   : > { %8498 = vmatpush3.bf16.msra.mxu0 %v8737_v2  ;;  %v8753_v18 = vld [vmem:[%s9577_s15 + $0x78] sm:$0xff]   ;;  %v8754_v19 = vld [vmem:[%s9577_s15 + $0x80] sm:$0xff]   ;;  %v8755_v20 = vld [vmem:[%s9577_s15 + $0x88] sm:$0xff]   ;;  %s8426_s25 = sshll.u32 %s9353_s8, 6  ;;  %s365_s13 = scalar_lea.vmem [#allocation14], %s8316_s24 }
  0xc4   : > { %v8756_v21 = vld [vmem:[%s9577_s15 + $0x90] sm:$0xff]   ;;  %v8757_v22 = vld [vmem:[%s9577_s15 + $0x98] sm:$0xff]   ;;  %v8758_v23 = vld [vmem:[%s9577_s15 + $0xa0] sm:$0xff]   ;;  %s8180_s23 = sshll.u32 %s365_s13, 4  ;;  %s11875_s30 = scalar_lea.hbm %s11926_s7, %s8426_s25  ;;  %s11877_s23 = int_to_ptr.vmem [resolvable:$true] %s8180_s23 }
  0xc5   : > { %v8759_v24 = vld [vmem:[%s9577_s15 + $0xa8] sm:$0xff]   ;;  %v8760_v25 = vld [vmem:[%s9577_s15 + $0xb0] sm:$0xff]   ;;  %v8761_v26 = vld [vmem:[%s9577_s15 + $0xb8] sm:$0xff]   ;;  %s8166_s17 = scalar_lea.sflag [#allocation5], %s9573_s22  ;;  %s9198_s8 = scalar_lea.vmem %s11877_s23, 64 }
  0xc6   : > { %8500 = vmatmul.mubr.msk.bf16.vlgmr.msra.gmra.mrb[0].mxu0 %vm615_vm0, %v8739_v4  ;;  %v8762_v27 = vld [vmem:[%s9577_s15 + $0xc0] sm:$0xff]   ;;  %v8770_v28 = vld [vmem:[#allocation9] sm:$0xff]   ;;  %v8763_v30 = vld [vmem:[%s9577_s15 + $0xc8] sm:$0xff]   ;;  %p9199_p7 = scmp.ne.s32.totalorder %s11877_s23, %s9198_s8  ;;  %p11957_p4 = scmp.ne.s32.totalorder %s11938_s10, 0 }
  0xc7   : > { %8503 = vmatprep.mubr.msk.bf16.mxu0 %vm615_vm0, %v8740_v5  ;;  %8563 = vmatprep.subr.bf16.mxu1 %v8770_v28  ;;  %v8771_v29 = vld [vmem:[#allocation9 + $0x8] sm:$0xff]   ;;  %v8764_v31 = vld [vmem:[%s9577_s15 + $0xd0] sm:$0xff]   ;;  %v8767_v34 = vld [vmem:[%s9577_s15 + $0xe8] sm:$0xff]   ;;  %s9288_s18 = smov [#allocation14]  }
  0xc8   : > { %8564 = vmatpush3.bf16.msra.mxu1 %v8770_v28  ;;  %v8765_v32 = vld [vmem:[%s9577_s15 + $0xd8] sm:$0xff]   ;;  %v8766_v33 = vld [vmem:[%s9577_s15 + $0xe0] sm:$0xff]   ;;  %v8768_v35 = vld [vmem:[%s9577_s15 + $0xf0] sm:$0xff]   ;;  %p9200_p12 = pnand %p9199_p7, %p11957_p4  ;;  %s9202_s19 = sshll.u32 %s9288_s18, 4  ;;  %s9203_s19 = int_to_ptr.vmem [resolvable:$false] %s9202_s19 }
  0xc9   : > { %8565 = vmatprep.subr.bf16.mxu1 %v8771_v29  ;;  %v8769_v36 = vld [vmem:[%s9577_s15 + $0xf8] sm:$0xff]   ;;  %v9659_v37 = vld [vmem:[#allocation8] ss:$0 sm:$0xff]  ;;  %s9204_s11 = scalar_lea.vmem %s9203_s19, 128  ;;  %p9205_p1 = scmp.lt.s32.totalorder %s11877_s23, %s9203_s19 }
  0xca   : > { %p9201_p13 = pneg %p9200_p12  ;;  %p9206_p3 = scmp.lt.s32.totalorder %s9204_s11, %s9198_s8 }
  0xcc   : > { %8566 = vmatpush3.bf16.msra.mxu1 %v8771_v29  ;;  %p9207_p2 = por %p9206_p3, %p9205_p1 }
  0xce   : > { %8504 = vmatmul.mubr.msk.bf16.gmra.mrb[4].mxu0 %vm615_vm0, %v8741_v6  ;;  %p9208_p8 = pnand %p9207_p2, %p9201_p13 }
  0xcf   : > { %8507 = vmatprep.mubr.msk.bf16.mxu0 %vm615_vm0, %v8742_v7 }
  0xd6   : > { %8508 = vmatmul.mubr.msk.bf16.gmra.mrb[8].mxu0 %vm615_vm0, %v8743_v8 }
  0xd7   : > { %8511 = vmatprep.mubr.msk.bf16.mxu0 %vm615_vm0, %v8744_v9 }
  0xde   : > { %8512 = vmatmul.mubr.msk.bf16.gmra.mrb[12].mxu0 %vm615_vm0, %v8745_v10 }
  0xdf   : > { %8515 = vmatprep.mubr.msk.bf16.mxu0 %vm615_vm0, %v8746_v11 }
  0xe6   : > { %8516 = vmatmul.mubr.msk.bf16.gmra.mrb[16].mxu0 %vm615_vm0, %v8747_v12 }
  0xe7   : > { %8519 = vmatprep.mubr.msk.bf16.mxu0 %vm615_vm0, %v8748_v13 }
  0xee   : > { %8520 = vmatmul.mubr.msk.bf16.gmra.mrb[20].mxu0 %vm615_vm0, %v8749_v14 }
  0xef   : > { %8523 = vmatprep.mubr.msk.bf16.mxu0 %vm615_vm0, %v8750_v15 }
  0xf6   : > { %8524 = vmatmul.mubr.msk.bf16.gmra.mrb[24].mxu0 %vm615_vm0, %v8751_v16 }
  0xf7   : > { %8527 = vmatprep.mubr.msk.bf16.mxu0 %vm615_vm0, %v8752_v17 }
  0xfe   : > { %8528 = vmatmul.mubr.msk.bf16.gmra.mrb[28].mxu0 %vm615_vm0, %v8753_v18 }
  0xff   : > { %8531 = vmatprep.mubr.msk.bf16.mxu0 %vm615_vm0, %v8754_v19 }
 0x106   : > { %8532 = vmatmul.mubr.msk.bf16.gmra.mrb[32].mxu0 %vm615_vm0, %v8755_v20 }
 0x107   : > { %8535 = vmatprep.mubr.msk.bf16.mxu0 %vm615_vm0, %v8756_v21 }
 0x10e   : > { %8536 = vmatmul.mubr.msk.bf16.gmra.mrb[36].mxu0 %vm615_vm0, %v8757_v22 }
 0x10f   : > { %8539 = vmatprep.mubr.msk.bf16.mxu0 %vm615_vm0, %v8758_v23 }
 0x116   : > { %8540 = vmatmul.mubr.msk.bf16.gmra.mrb[40].mxu0 %vm615_vm0, %v8759_v24 }
 0x117   : > { %8543 = vmatprep.mubr.msk.bf16.mxu0 %vm615_vm0, %v8760_v25 }
 0x11e   : > { %8544 = vmatmul.mubr.msk.bf16.gmra.mrb[44].mxu0 %vm615_vm0, %v8761_v26 }
 0x11f   : > { %8547 = vmatprep.mubr.msk.bf16.mxu0 %vm615_vm0, %v8762_v27 }
 0x126   : > { %8548 = vmatmul.mubr.msk.bf16.gmra.mrb[48].mxu0 %vm615_vm0, %v8763_v30 }
 0x127   : > { %8551 = vmatprep.mubr.msk.bf16.mxu0 %vm615_vm0, %v8764_v31 }
 0x12e   : > { %8552 = vmatmul.mubr.msk.bf16.gmra.mrb[52].mxu0 %vm615_vm0, %v8765_v32 }
 0x12f   : > { %8555 = vmatprep.mubr.msk.bf16.mxu0 %vm615_vm0, %v8766_v33 }
 0x136   : > { %8556 = vmatmul.mubr.msk.bf16.gmra.mrb[56].mxu0 %vm615_vm0, %v8767_v34 }
 0x137   : > { %8559 = vmatprep.mubr.msk.bf16.mxu0 %vm615_vm0, %v8768_v35 }
 0x13e   : > { %8560 = vmatmul.mubr.msk.bf16.gmra.mrb[60].mxu0 %vm615_vm0, %v8769_v36 }
 0x199   : > { %v8501_v38 = vpop.f32.mrb[0].mxu0 }
 0x19a   : > { %v755_v39 = vadd.f32 %v8501_v38, %v9659_v37  ;;  %v746_v40 = vpop.f32.mrb[1].mxu0 }
 0x19b   : > { %v747_v41 = vadd.f32 %v9659_v37, %v746_v40  ;;  %v8502_v42 = vpop.f32.mrb[2].mxu0 }
 0x19c   : > { %v1003_v43 = vmul.f32 0.2, %v755_v39  ;;  %v758_v44 = vadd.f32 %v8502_v42, %v9659_v37  ;;  %v749_v45 = vpop.f32.mrb[3].mxu0 }
 0x19d   : > { %v1001_v46 = vmul.f32 0.2, %v747_v41  ;;  %v750_v47 = vadd.f32 %v9659_v37, %v749_v45 }
 0x19e   : > { %v1004_v48 = vmul.f32 0.2, %v758_v44  ;;  %v1067_v50 = vmax.f32 %v755_v39, %v1003_v43 }
 0x19f   : > { %v1002_v49 = vmul.f32 0.2, %v750_v47  ;;  %v1065_v52 = vmax.f32 %v747_v41, %v1001_v46 }
 0x1a0   : > { %v1068_v51 = vmax.f32 %v758_v44, %v1004_v48 }
 0x1a1   : > { %v1066_v53 = vmax.f32 %v750_v47, %v1002_v49  ;;  %v8505_v54 = vpop.f32.mrb[4].mxu0 }
 0x1a2   : > { %v1135_v55 = vpack.c.bf16 %v1068_v51, %v1067_v50  ;;  %v771_v56 = vadd.f32 %v8505_v54, %v9659_v37  ;;  %v762_v57 = vpop.f32.mrb[5].mxu0 }
 0x1a3   : > { %v763_v58 = vadd.f32 %v9659_v37, %v762_v57  ;;  %v8506_v59 = vpop.f32.mrb[6].mxu0  ;;  %v1134_v60 = vpack.c.bf16 %v1066_v53, %v1065_v52 }
 0x1a4   : > { %v1007_v61 = vmul.f32 0.2, %v771_v56  ;;  %v774_v62 = vadd.f32 %v8506_v59, %v9659_v37  ;;  %v765_v63 = vpop.f32.mrb[7].mxu0 }
 0x1a5   : > { %v1005_v0 = vmul.f32 0.2, %v763_v58  ;;  %v766_v1 = vadd.f32 %v9659_v37, %v765_v63  ;;  %8567 = vmatprep.mubr.msk.bf16.mxu1 %vm615_vm0, %v1134_v60 }
 0x1a6   : > { %v1008_v2 = vmul.f32 0.2, %v774_v62  ;;  %8568 = vmatmul.mubr.msk.bf16.vlgmr.msra.gmra.mrb[0].mxu1 %vm615_vm0, %v1135_v55  ;;  %v1071_v4 = vmax.f32 %v771_v56, %v1007_v61 }
 0x1a7   : > { %v1006_v3 = vmul.f32 0.2, %v766_v1  ;;  %v1069_v6 = vmax.f32 %v763_v58, %v1005_v0 }
 0x1a8   : > { %v1072_v5 = vmax.f32 %v774_v62, %v1008_v2 }
 0x1a9   : > { %v1070_v7 = vmax.f32 %v766_v1, %v1006_v3  ;;  %v8509_v8 = vpop.f32.mrb[8].mxu0 }
 0x1aa   : > { %v1137_v9 = vpack.c.bf16 %v1072_v5, %v1071_v4  ;;  %v787_v10 = vadd.f32 %v8509_v8, %v9659_v37  ;;  %v778_v11 = vpop.f32.mrb[9].mxu0 }
 0x1ab   : > { %v1136_v12 = vpack.c.bf16 %v1070_v7, %v1069_v6  ;;  %v779_v13 = vadd.f32 %v9659_v37, %v778_v11  ;;  %v8510_v14 = vpop.f32.mrb[10].mxu0 }
 0x1ac   : > { %v1011_v15 = vmul.f32 0.2, %v787_v10  ;;  %v790_v16 = vadd.f32 %v8510_v14, %v9659_v37  ;;  %v781_v17 = vpop.f32.mrb[11].mxu0 }
 0x1ad   : > { %v1009_v18 = vmul.f32 0.2, %v779_v13  ;;  %v782_v19 = vadd.f32 %v9659_v37, %v781_v17  ;;  %8571 = vmatprep.mubr.msk.bf16.mxu1 %vm615_vm0, %v1136_v12 }
 0x1ae   : > { %v1012_v20 = vmul.f32 0.2, %v790_v16  ;;  %8572 = vmatmul.mubr.msk.bf16.gmra.mrb[4].mxu1 %vm615_vm0, %v1137_v9  ;;  %v1075_v22 = vmax.f32 %v787_v10, %v1011_v15 }
 0x1af   : > { %v1010_v21 = vmul.f32 0.2, %v782_v19  ;;  %v1073_v24 = vmax.f32 %v779_v13, %v1009_v18 }
 0x1b0   : > { %v1076_v23 = vmax.f32 %v790_v16, %v1012_v20 }
 0x1b1   : > { %v1074_v25 = vmax.f32 %v782_v19, %v1010_v21  ;;  %v8513_v26 = vpop.f32.mrb[12].mxu0 }
 0x1b2   : > { %v1139_v27 = vpack.c.bf16 %v1076_v23, %v1075_v22  ;;  %v803_v28 = vadd.f32 %v8513_v26, %v9659_v37  ;;  %v794_v29 = vpop.f32.mrb[13].mxu0 }
 0x1b3   : > { %v1138_v30 = vpack.c.bf16 %v1074_v25, %v1073_v24  ;;  %v795_v31 = vadd.f32 %v9659_v37, %v794_v29  ;;  %v8514_v32 = vpop.f32.mrb[14].mxu0 }
 0x1b4   : > { %v1015_v33 = vmul.f32 0.2, %v803_v28  ;;  %v806_v34 = vadd.f32 %v8514_v32, %v9659_v37  ;;  %v797_v35 = vpop.f32.mrb[15].mxu0 }
 0x1b5   : > { %v1013_v36 = vmul.f32 0.2, %v795_v31  ;;  %v798_v38 = vadd.f32 %v9659_v37, %v797_v35  ;;  %8575 = vmatprep.mubr.msk.bf16.mxu1 %vm615_vm0, %v1138_v30 }
 0x1b6   : > { %v1016_v39 = vmul.f32 0.2, %v806_v34  ;;  %8576 = vmatmul.mubr.msk.bf16.gmra.mrb[8].mxu1 %vm615_vm0, %v1139_v27  ;;  %v1079_v41 = vmax.f32 %v803_v28, %v1015_v33 }
 0x1b7   : > { %v1014_v40 = vmul.f32 0.2, %v798_v38  ;;  %v1077_v43 = vmax.f32 %v795_v31, %v1013_v36 }
 0x1b8   : > { %v1080_v42 = vmax.f32 %v806_v34, %v1016_v39 }
 0x1b9   : > { %v1078_v44 = vmax.f32 %v798_v38, %v1014_v40  ;;  %v8517_v45 = vpop.f32.mrb[16].mxu0 }
 0x1ba   : > { %v1141_v46 = vpack.c.bf16 %v1080_v42, %v1079_v41  ;;  %v819_v47 = vadd.f32 %v8517_v45, %v9659_v37  ;;  %v810_v48 = vpop.f32.mrb[17].mxu0 }
 0x1bb   : > { %v1140_v49 = vpack.c.bf16 %v1078_v44, %v1077_v43  ;;  %v811_v50 = vadd.f32 %v9659_v37, %v810_v48  ;;  %v8518_v51 = vpop.f32.mrb[18].mxu0 }
 0x1bc   : > { %v1019_v52 = vmul.f32 0.2, %v819_v47  ;;  %v822_v53 = vadd.f32 %v8518_v51, %v9659_v37  ;;  %v813_v54 = vpop.f32.mrb[19].mxu0 }
 0x1bd   : > { %v1017_v55 = vmul.f32 0.2, %v811_v50  ;;  %v814_v56 = vadd.f32 %v9659_v37, %v813_v54  ;;  %8579 = vmatprep.mubr.msk.bf16.mxu1 %vm615_vm0, %v1140_v49 }
 0x1be   : > { %v1020_v57 = vmul.f32 0.2, %v822_v53  ;;  %8580 = vmatmul.mubr.msk.bf16.gmra.mrb[12].mxu1 %vm615_vm0, %v1141_v46  ;;  %v1083_v59 = vmax.f32 %v819_v47, %v1019_v52 }
 0x1bf   : > { %v1018_v58 = vmul.f32 0.2, %v814_v56  ;;  %v1081_v61 = vmax.f32 %v811_v50, %v1017_v55 }
 0x1c0   : > { %v1084_v60 = vmax.f32 %v822_v53, %v1020_v57 }
 0x1c1   : > { %v1082_v62 = vmax.f32 %v814_v56, %v1018_v58  ;;  %v8521_v63 = vpop.f32.mrb[20].mxu0 }
 0x1c2   : > { %v1143_v0 = vpack.c.bf16 %v1084_v60, %v1083_v59  ;;  %v835_v1 = vadd.f32 %v8521_v63, %v9659_v37  ;;  %v826_v2 = vpop.f32.mrb[21].mxu0 }
 0x1c3   : > { %v1142_v3 = vpack.c.bf16 %v1082_v62, %v1081_v61  ;;  %v827_v4 = vadd.f32 %v9659_v37, %v826_v2  ;;  %v8522_v5 = vpop.f32.mrb[22].mxu0 }
 0x1c4   : > { %v1023_v6 = vmul.f32 0.2, %v835_v1  ;;  %v838_v7 = vadd.f32 %v8522_v5, %v9659_v37  ;;  %v829_v8 = vpop.f32.mrb[23].mxu0 }
 0x1c5   : > { %v1021_v9 = vmul.f32 0.2, %v827_v4  ;;  %v830_v10 = vadd.f32 %v9659_v37, %v829_v8  ;;  %8583 = vmatprep.mubr.msk.bf16.mxu1 %vm615_vm0, %v1142_v3 }
 0x1c6   : > { %v1024_v11 = vmul.f32 0.2, %v838_v7  ;;  %8584 = vmatmul.mubr.msk.bf16.gmra.mrb[16].mxu1 %vm615_vm0, %v1143_v0  ;;  %v1087_v13 = vmax.f32 %v835_v1, %v1023_v6 }
 0x1c7   : > { %v1022_v12 = vmul.f32 0.2, %v830_v10  ;;  %v1085_v15 = vmax.f32 %v827_v4, %v1021_v9 }
 0x1c8   : > { %v1088_v14 = vmax.f32 %v838_v7, %v1024_v11 }
 0x1c9   : > { %v1086_v16 = vmax.f32 %v830_v10, %v1022_v12  ;;  %v8525_v17 = vpop.f32.mrb[24].mxu0 }
 0x1ca   : > { %v1145_v18 = vpack.c.bf16 %v1088_v14, %v1087_v13  ;;  %v851_v19 = vadd.f32 %v8525_v17, %v9659_v37  ;;  %v842_v20 = vpop.f32.mrb[25].mxu0 }
 0x1cb   : > { %v1144_v21 = vpack.c.bf16 %v1086_v16, %v1085_v15  ;;  %v843_v22 = vadd.f32 %v9659_v37, %v842_v20  ;;  %v8526_v23 = vpop.f32.mrb[26].mxu0 }
 0x1cc   : > { %v1027_v24 = vmul.f32 0.2, %v851_v19  ;;  %v854_v25 = vadd.f32 %v8526_v23, %v9659_v37  ;;  %v845_v26 = vpop.f32.mrb[27].mxu0 }
 0x1cd   : > { %v1025_v27 = vmul.f32 0.2, %v843_v22  ;;  %v846_v28 = vadd.f32 %v9659_v37, %v845_v26  ;;  %8587 = vmatprep.mubr.msk.bf16.mxu1 %vm615_vm0, %v1144_v21 }
 0x1ce   : > { %v1028_v29 = vmul.f32 0.2, %v854_v25  ;;  %8588 = vmatmul.mubr.msk.bf16.gmra.mrb[20].mxu1 %vm615_vm0, %v1145_v18  ;;  %v1091_v31 = vmax.f32 %v851_v19, %v1027_v24 }
 0x1cf   : > { %v1026_v30 = vmul.f32 0.2, %v846_v28  ;;  %v1089_v33 = vmax.f32 %v843_v22, %v1025_v27 }
 0x1d0   : > { %v1092_v32 = vmax.f32 %v854_v25, %v1028_v29 }
 0x1d1   : > { %v1090_v34 = vmax.f32 %v846_v28, %v1026_v30  ;;  %v8529_v35 = vpop.f32.mrb[28].mxu0 }
 0x1d2   : > { %v1147_v36 = vpack.c.bf16 %v1092_v32, %v1091_v31  ;;  %v867_v38 = vadd.f32 %v8529_v35, %v9659_v37  ;;  %v858_v39 = vpop.f32.mrb[29].mxu0 }
 0x1d3   : > { %v1146_v40 = vpack.c.bf16 %v1090_v34, %v1089_v33  ;;  %v859_v41 = vadd.f32 %v9659_v37, %v858_v39  ;;  %v8530_v42 = vpop.f32.mrb[30].mxu0 }
 0x1d4   : > { %v1031_v43 = vmul.f32 0.2, %v867_v38  ;;  %v870_v44 = vadd.f32 %v8530_v42, %v9659_v37  ;;  %v861_v45 = vpop.f32.mrb[31].mxu0 }
 0x1d5   : > { %v1029_v46 = vmul.f32 0.2, %v859_v41  ;;  %v862_v47 = vadd.f32 %v9659_v37, %v861_v45  ;;  %8591 = vmatprep.mubr.msk.bf16.mxu1 %vm615_vm0, %v1146_v40 }
 0x1d6   : > { %v1032_v48 = vmul.f32 0.2, %v870_v44  ;;  %8592 = vmatmul.mubr.msk.bf16.gmra.mrb[24].mxu1 %vm615_vm0, %v1147_v36  ;;  %v1095_v50 = vmax.f32 %v867_v38, %v1031_v43 }
 0x1d7   : > { %v1030_v49 = vmul.f32 0.2, %v862_v47  ;;  %v1093_v52 = vmax.f32 %v859_v41, %v1029_v46 }
 0x1d8   : > { %v1096_v51 = vmax.f32 %v870_v44, %v1032_v48 }
 0x1d9   : > { %v1094_v53 = vmax.f32 %v862_v47, %v1030_v49  ;;  %v8533_v54 = vpop.f32.mrb[32].mxu0 }
 0x1da   : > { %v1149_v55 = vpack.c.bf16 %v1096_v51, %v1095_v50  ;;  %v883_v56 = vadd.f32 %v8533_v54, %v9659_v37  ;;  %v874_v57 = vpop.f32.mrb[33].mxu0 }
 0x1db   : > { %v1148_v58 = vpack.c.bf16 %v1094_v53, %v1093_v52  ;;  %v875_v59 = vadd.f32 %v9659_v37, %v874_v57  ;;  %v8534_v60 = vpop.f32.mrb[34].mxu0 }
 0x1dc   : > { %v1035_v61 = vmul.f32 0.2, %v883_v56  ;;  %v886_v62 = vadd.f32 %v8534_v60, %v9659_v37  ;;  %v877_v63 = vpop.f32.mrb[35].mxu0 }
 0x1dd   : > { %v1033_v0 = vmul.f32 0.2, %v875_v59  ;;  %v878_v1 = vadd.f32 %v9659_v37, %v877_v63  ;;  %8595 = vmatprep.mubr.msk.bf16.mxu1 %vm615_vm0, %v1148_v58 }
 0x1de   : > { %v1036_v2 = vmul.f32 0.2, %v886_v62  ;;  %8596 = vmatmul.mubr.msk.bf16.gmra.mrb[28].mxu1 %vm615_vm0, %v1149_v55  ;;  %v1099_v4 = vmax.f32 %v883_v56, %v1035_v61 }
 0x1df   : > { %v1034_v3 = vmul.f32 0.2, %v878_v1  ;;  %v1097_v6 = vmax.f32 %v875_v59, %v1033_v0 }
 0x1e0   : > { %v1100_v5 = vmax.f32 %v886_v62, %v1036_v2 }
 0x1e1   : > { %v1098_v7 = vmax.f32 %v878_v1, %v1034_v3  ;;  %v8537_v8 = vpop.f32.mrb[36].mxu0 }
 0x1e2   : > { %v1151_v9 = vpack.c.bf16 %v1100_v5, %v1099_v4  ;;  %v899_v10 = vadd.f32 %v8537_v8, %v9659_v37  ;;  %v890_v11 = vpop.f32.mrb[37].mxu0 }
 0x1e3   : > { %v1150_v12 = vpack.c.bf16 %v1098_v7, %v1097_v6  ;;  %v891_v13 = vadd.f32 %v9659_v37, %v890_v11  ;;  %v8538_v14 = vpop.f32.mrb[38].mxu0 }
 0x1e4   : > { %v1039_v15 = vmul.f32 0.2, %v899_v10  ;;  %v902_v16 = vadd.f32 %v8538_v14, %v9659_v37  ;;  %v893_v17 = vpop.f32.mrb[39].mxu0 }
 0x1e5   : > { %v1037_v18 = vmul.f32 0.2, %v891_v13  ;;  %v894_v19 = vadd.f32 %v9659_v37, %v893_v17  ;;  %8599 = vmatprep.mubr.msk.bf16.mxu1 %vm615_vm0, %v1150_v12 }
 0x1e6   : > { %v1040_v20 = vmul.f32 0.2, %v902_v16  ;;  %8600 = vmatmul.mubr.msk.bf16.gmra.mrb[32].mxu1 %vm615_vm0, %v1151_v9  ;;  %v1103_v22 = vmax.f32 %v899_v10, %v1039_v15 }
 0x1e7   : > { %v1038_v21 = vmul.f32 0.2, %v894_v19  ;;  %v1101_v24 = vmax.f32 %v891_v13, %v1037_v18 }
 0x1e8   : > { %v1104_v23 = vmax.f32 %v902_v16, %v1040_v20 }
 0x1e9   : > { %v1102_v25 = vmax.f32 %v894_v19, %v1038_v21  ;;  %v8541_v26 = vpop.f32.mrb[40].mxu0 }
 0x1ea   : > { %v1153_v27 = vpack.c.bf16 %v1104_v23, %v1103_v22  ;;  %v915_v28 = vadd.f32 %v8541_v26, %v9659_v37  ;;  %v906_v29 = vpop.f32.mrb[41].mxu0 }
 0x1eb   : > { %v1152_v30 = vpack.c.bf16 %v1102_v25, %v1101_v24  ;;  %v907_v31 = vadd.f32 %v9659_v37, %v906_v29  ;;  %v8542_v32 = vpop.f32.mrb[42].mxu0 }
 0x1ec   : > { %v1043_v33 = vmul.f32 0.2, %v915_v28  ;;  %v918_v34 = vadd.f32 %v8542_v32, %v9659_v37  ;;  %v909_v35 = vpop.f32.mrb[43].mxu0 }
 0x1ed   : > { %v1041_v36 = vmul.f32 0.2, %v907_v31  ;;  %v910_v38 = vadd.f32 %v9659_v37, %v909_v35  ;;  %8603 = vmatprep.mubr.msk.bf16.mxu1 %vm615_vm0, %v1152_v30 }
 0x1ee   : > { %v1044_v39 = vmul.f32 0.2, %v918_v34  ;;  %8604 = vmatmul.mubr.msk.bf16.gmra.mrb[36].mxu1 %vm615_vm0, %v1153_v27  ;;  %v1107_v41 = vmax.f32 %v915_v28, %v1043_v33 }
 0x1ef   : > { %v1042_v40 = vmul.f32 0.2, %v910_v38  ;;  %v1105_v43 = vmax.f32 %v907_v31, %v1041_v36 }
 0x1f0   : > { %v1108_v42 = vmax.f32 %v918_v34, %v1044_v39 }
 0x1f1   : > { %v1106_v44 = vmax.f32 %v910_v38, %v1042_v40  ;;  %v8545_v45 = vpop.f32.mrb[44].mxu0 }
 0x1f2   : > { %v1155_v46 = vpack.c.bf16 %v1108_v42, %v1107_v41  ;;  %v931_v47 = vadd.f32 %v8545_v45, %v9659_v37  ;;  %v922_v48 = vpop.f32.mrb[45].mxu0 }
 0x1f3   : > { %v1154_v49 = vpack.c.bf16 %v1106_v44, %v1105_v43  ;;  %v923_v50 = vadd.f32 %v9659_v37, %v922_v48  ;;  %v8546_v51 = vpop.f32.mrb[46].mxu0 }
 0x1f4   : > { %v1047_v52 = vmul.f32 0.2, %v931_v47  ;;  %v934_v53 = vadd.f32 %v8546_v51, %v9659_v37  ;;  %v925_v54 = vpop.f32.mrb[47].mxu0 }
 0x1f5   : > { %v1045_v55 = vmul.f32 0.2, %v923_v50  ;;  %v926_v56 = vadd.f32 %v9659_v37, %v925_v54  ;;  %8607 = vmatprep.mubr.msk.bf16.mxu1 %vm615_vm0, %v1154_v49 }
 0x1f6   : > { %v1048_v57 = vmul.f32 0.2, %v934_v53  ;;  %8608 = vmatmul.mubr.msk.bf16.gmra.mrb[40].mxu1 %vm615_vm0, %v1155_v46  ;;  %v1111_v59 = vmax.f32 %v931_v47, %v1047_v52 }
 0x1f7   : > { %v1046_v58 = vmul.f32 0.2, %v926_v56  ;;  %v1109_v61 = vmax.f32 %v923_v50, %v1045_v55 }
 0x1f8   : > { %v1112_v60 = vmax.f32 %v934_v53, %v1048_v57 }
 0x1f9   : > { %v1110_v62 = vmax.f32 %v926_v56, %v1046_v58  ;;  %v8549_v63 = vpop.f32.mrb[48].mxu0 }
 0x1fa   : > { %v1157_v0 = vpack.c.bf16 %v1112_v60, %v1111_v59  ;;  %v947_v1 = vadd.f32 %v8549_v63, %v9659_v37  ;;  %v938_v2 = vpop.f32.mrb[49].mxu0 }
 0x1fb   : > { %v1156_v3 = vpack.c.bf16 %v1110_v62, %v1109_v61  ;;  %v939_v4 = vadd.f32 %v9659_v37, %v938_v2  ;;  %v8550_v5 = vpop.f32.mrb[50].mxu0 }
 0x1fc   : > { %v1051_v6 = vmul.f32 0.2, %v947_v1  ;;  %v950_v7 = vadd.f32 %v8550_v5, %v9659_v37  ;;  %v941_v8 = vpop.f32.mrb[51].mxu0 }
 0x1fd   : > { %v1049_v9 = vmul.f32 0.2, %v939_v4  ;;  %v942_v10 = vadd.f32 %v9659_v37, %v941_v8  ;;  %8611 = vmatprep.mubr.msk.bf16.mxu1 %vm615_vm0, %v1156_v3 }
 0x1fe   : > { %v1052_v11 = vmul.f32 0.2, %v950_v7  ;;  %8612 = vmatmul.mubr.msk.bf16.gmra.mrb[44].mxu1 %vm615_vm0, %v1157_v0  ;;  %v1115_v13 = vmax.f32 %v947_v1, %v1051_v6 }
 0x1ff   : > { %v1050_v12 = vmul.f32 0.2, %v942_v10  ;;  %v1113_v15 = vmax.f32 %v939_v4, %v1049_v9 }
 0x200   : > { %v1116_v14 = vmax.f32 %v950_v7, %v1052_v11  ;;  %v9757_v11 = vld [vmem:[#allocation11] ss:$0 sm:$0xff] }
 0x201   : > { %v1114_v16 = vmax.f32 %v942_v10, %v1050_v12  ;;  %v8553_v17 = vpop.f32.mrb[52].mxu0  ;;  %v1698_v10 = vld [vmem:[#allocation2] sm:$0x1] }
 0x202   : > { %v1159_v18 = vpack.c.bf16 %v1116_v14, %v1115_v13  ;;  %v963_v19 = vadd.f32 %v8553_v17, %v9659_v37  ;;  %v954_v20 = vpop.f32.mrb[53].mxu0  ;;  %8631 = vpush %v1698_v10 }
 0x203   : > { %v1158_v21 = vpack.c.bf16 %v1114_v16, %v1113_v15  ;;  %v955_v22 = vadd.f32 %v9659_v37, %v954_v20  ;;  %v8554_v23 = vpop.f32.mrb[54].mxu0 }
 0x204   : > { %v1055_v24 = vmul.f32 0.2, %v963_v19  ;;  %v966_v25 = vadd.f32 %v8554_v23, %v9659_v37  ;;  %v957_v26 = vpop.f32.mrb[55].mxu0 }
 0x205   : > { %v1053_v27 = vmul.f32 0.2, %v955_v22  ;;  %v958_v28 = vadd.f32 %v9659_v37, %v957_v26  ;;  %8615 = vmatprep.mubr.msk.bf16.mxu1 %vm615_vm0, %v1158_v21  ;;  %v9763_v21 = vld [vmem:[#allocation12] ss:$0 sm:$0xff] }
 0x206   : > { %v1056_v29 = vmul.f32 0.2, %v966_v25  ;;  %8616 = vmatmul.mubr.msk.bf16.gmra.mrb[48].mxu1 %vm615_vm0, %v1159_v18  ;;  %v1119_v31 = vmax.f32 %v963_v19, %v1055_v24 }
 0x207   : > { %v1054_v30 = vmul.f32 0.2, %v958_v28  ;;  %v1117_v33 = vmax.f32 %v955_v22, %v1053_v27 }
 0x208   : > { %v1120_v32 = vmax.f32 %v966_v25, %v1056_v29 }
 0x209   : > { %v1118_v34 = vmax.f32 %v958_v28, %v1054_v30  ;;  %v8557_v35 = vpop.f32.mrb[56].mxu0 }
 0x20a   : > { %v1161_v36 = vpack.c.bf16 %v1120_v32, %v1119_v31  ;;  %v979_v38 = vadd.f32 %v8557_v35, %v9659_v37  ;;  %v970_v39 = vpop.f32.mrb[57].mxu0 }
 0x20b   : > { %v1160_v40 = vpack.c.bf16 %v1118_v34, %v1117_v33  ;;  %v971_v41 = vadd.f32 %v9659_v37, %v970_v39  ;;  %v8558_v42 = vpop.f32.mrb[58].mxu0 }
 0x20c   : > { %v1059_v43 = vmul.f32 0.2, %v979_v38  ;;  %v982_v44 = vadd.f32 %v8558_v42, %v9659_v37  ;;  %v973_v45 = vpop.f32.mrb[59].mxu0 }
 0x20d   : > { %v1057_v46 = vmul.f32 0.2, %v971_v41  ;;  %v974_v47 = vadd.f32 %v9659_v37, %v973_v45  ;;  %8619 = vmatprep.mubr.msk.bf16.mxu1 %vm615_vm0, %v1160_v40 }
 0x20e   : > { %v1060_v48 = vmul.f32 0.2, %v982_v44  ;;  %8620 = vmatmul.mubr.msk.bf16.gmra.mrb[52].mxu1 %vm615_vm0, %v1161_v36  ;;  %v1123_v50 = vmax.f32 %v979_v38, %v1059_v43 }
 0x20f   : > { %v1058_v49 = vmul.f32 0.2, %v974_v47  ;;  %v1121_v52 = vmax.f32 %v971_v41, %v1057_v46 }
 0x210   : > { %v1124_v51 = vmax.f32 %v982_v44, %v1060_v48 }
 0x211   : > { %v1122_v53 = vmax.f32 %v974_v47, %v1058_v49  ;;  %v8561_v54 = vpop.f32.mrb[60].mxu0 }
 0x212   : > { %v1163_v55 = vpack.c.bf16 %v1124_v51, %v1123_v50  ;;  %v995_v56 = vadd.f32 %v8561_v54, %v9659_v37  ;;  %v986_v57 = vpop.f32.mrb[61].mxu0 }
 0x213   : > { %v1162_v58 = vpack.c.bf16 %v1122_v53, %v1121_v52  ;;  %v987_v59 = vadd.f32 %v9659_v37, %v986_v57  ;;  %v8562_v60 = vpop.f32.mrb[62].mxu0 }
 0x214   : > { %v1063_v61 = vmul.f32 0.2, %v995_v56  ;;  %v998_v62 = vadd.f32 %v8562_v60, %v9659_v37  ;;  %v989_v63 = vpop.f32.mrb[63].mxu0 }
 0x215   : > { %v1061_v0 = vmul.f32 0.2, %v987_v59  ;;  %v990_v1 = vadd.f32 %v9659_v37, %v989_v63  ;;  %8623 = vmatprep.mubr.msk.bf16.mxu1 %vm615_vm0, %v1162_v58 }
 0x216   : > { %v1127_v2 = vmax.f32 %v995_v56, %v1063_v61  ;;  %v1064_v3 = vmul.f32 0.2, %v998_v62  ;;  %8624 = vmatmul.mubr.msk.bf16.gmra.mrb[56].mxu1 %vm615_vm0, %v1163_v55 }
 0x217   : > { %v1125_v4 = vmax.f32 %v987_v59, %v1061_v0  ;;  %v1062_v5 = vmul.f32 0.2, %v990_v1 }
 0x218   : > { %v1128_v6 = vmax.f32 %v998_v62, %v1064_v3 }
 0x219   : > { %v1126_v7 = vmax.f32 %v990_v1, %v1062_v5 }
 0x21a   : > { %v1165_v8 = vpack.c.bf16 %v1128_v6, %v1127_v2 }
 0x21b   : > { %v1164_v9 = vpack.c.bf16 %v1126_v7, %v1125_v4 }
 0x21d   : > { %8627 = vmatprep.mubr.msk.bf16.mxu1 %vm615_vm0, %v1164_v9 }
 0x21e   : > { %8628 = vmatmul.mubr.msk.bf16.gmra.mrb[60].mxu1 %vm615_vm0, %v1165_v8 }
 0x233   : > { %s8632_s9 = spop %8631 }
 0x279   : > { %v8569_v37 = vpop.f32.mrb[0].mxu1 }
 0x27a   : > { %v1323_v12 = vadd.f32 %v8569_v37, %v9757_v11  ;;  %v1314_v13 = vpop.f32.mrb[1].mxu1 }
 0x27b   : > { %v1315_v14 = vadd.f32 %v9757_v11, %v1314_v13  ;;  %v8570_v15 = vpop.f32.mrb[2].mxu1 }
 0x27c   : > { %v1571_v16 = vmul.f32 0.2, %v1323_v12  ;;  %v1326_v17 = vadd.f32 %v8570_v15, %v9757_v11  ;;  %v1317_v18 = vpop.f32.mrb[3].mxu1 }
 0x27d   : > { %v1569_v19 = vmul.f32 0.2, %v1315_v14  ;;  %v1318_v20 = vadd.f32 %v9757_v11, %v1317_v18 }
 0x27e   : > { %v1635_v22 = vmax.f32 %v1323_v12, %v1571_v16  ;;  %v1572_v23 = vmul.f32 0.2, %v1326_v17 }
 0x27f   : > { %v1633_v24 = vmax.f32 %v1315_v14, %v1569_v19  ;;  %v1570_v25 = vmul.f32 0.2, %v1318_v20 }
 0x280   : > { %v1636_v26 = vmax.f32 %v1326_v17, %v1572_v23  ;;  %v1707_v27 = vmul.f32 %v9763_v21, %v1635_v22 }
 0x281   : > { %v1634_v28 = vmax.f32 %v1318_v20, %v1570_v25  ;;  %v8573_v29 = vpop.f32.mrb[4].mxu1  ;;  %v1705_v30 = vmul.f32 %v9763_v21, %v1633_v24 }
 0x282   : > { %v1339_v31 = vadd.f32 %v8573_v29, %v9757_v11  ;;  %v1330_v32 = vpop.f32.mrb[5].mxu1  ;;  %v1775_v33 = vsel %vm615_vm0, %v1707_v27, 0.0  ;;  %v1708_v34 = vmul.f32 %v9763_v21, %v1636_v26 }
 0x283   : > { %v1331_v35 = vadd.f32 %v9757_v11, %v1330_v32  ;;  %1776 = vadd.xlane.f32.xlu1 %v1775_v33  ;;  %v8574_v36 = vpop.f32.mrb[6].mxu1  ;;  %v1769_v38 = vsel %vm615_vm0, %v1705_v30, 0.0  ;;  %v1706_v39 = vmul.f32 %v9763_v21, %v1634_v28 }
 0x284   : > { %v1575_v40 = vmul.f32 0.2, %v1339_v31  ;;  %v1342_v41 = vadd.f32 %v8574_v36, %v9757_v11  ;;  %v1333_v42 = vpop.f32.mrb[7].mxu1  ;;  %1770 = vadd.xlane.f32.xlu0 %v1769_v38  ;;  %v1778_v47 = vsel %vm615_vm0, %v1708_v34, 0.0 }
 0x285   : > { %v1573_v43 = vmul.f32 0.2, %v1331_v35  ;;  %v1334_v44 = vadd.f32 %v9757_v11, %v1333_v42  ;;  %v1772_v50 = vsel %vm615_vm0, %v1706_v39, 0.0 }
 0x286   : > { %v1639_v45 = vmax.f32 %v1339_v31, %v1575_v40  ;;  %v1576_v46 = vmul.f32 0.2, %v1342_v41 }
 0x287   : > { %v1637_v48 = vmax.f32 %v1331_v35, %v1573_v43  ;;  %v1574_v49 = vmul.f32 0.2, %v1334_v44  ;;  %1779 = vadd.xlane.f32.xlu1 %v1778_v47 }
 0x288   : > { %v1640_v51 = vmax.f32 %v1342_v41, %v1576_v46  ;;  %1773 = vadd.xlane.f32.xlu0 %v1772_v50  ;;  %v1711_v52 = vmul.f32 %v9763_v21, %v1639_v45 }
 0x289   : > { %v1638_v53 = vmax.f32 %v1334_v44, %v1574_v49  ;;  %v8577_v54 = vpop.f32.mrb[8].mxu1  ;;  %v1709_v61 = vmul.f32 %v9763_v21, %v1637_v48 }
 0x28a   : > { %v1355_v55 = vadd.f32 %v8577_v54, %v9757_v11  ;;  %v1346_v56 = vpop.f32.mrb[9].mxu1  ;;  %v1787_v57 = vsel %vm615_vm0, %v1711_v52, 0.0  ;;  %v1712_v58 = vmul.f32 %v9763_v21, %v1640_v51 }
 0x28b   : > { %v1347_v59 = vadd.f32 %v9757_v11, %v1346_v56  ;;  %v8578_v60 = vpop.f32.mrb[10].mxu1  ;;  %v1710_v2 = vmul.f32 %v9763_v21, %v1638_v53  ;;  %v1781_v9 = vsel %vm615_vm0, %v1709_v61, 0.0 }
 0x28c   : > { %v1579_v62 = vmul.f32 0.2, %v1355_v55  ;;  %v1358_v63 = vadd.f32 %v8578_v60, %v9757_v11  ;;  %v1349_v0 = vpop.f32.mrb[11].mxu1  ;;  %1788 = vadd.xlane.f32.xlu0 %v1787_v57  ;;  %v1790_v1 = vsel %vm615_vm0, %v1712_v58, 0.0 }
 0x28d   : > { %v1577_v3 = vmul.f32 0.2, %v1347_v59  ;;  %v1350_v4 = vadd.f32 %v9757_v11, %v1349_v0  ;;  %1791 = vadd.xlane.f32.xlu1 %v1790_v1  ;;  %v1784_v37 = vsel %vm615_vm0, %v1710_v2, 0.0 }
 0x28e   : > { %v1643_v5 = vmax.f32 %v1355_v55, %v1579_v62  ;;  %v1580_v6 = vmul.f32 0.2, %v1358_v63 }
 0x28f   : > { %v1641_v7 = vmax.f32 %v1347_v59, %v1577_v3  ;;  %v1578_v8 = vmul.f32 0.2, %v1350_v4 }
 0x290   : > { %v1644_v10 = vmax.f32 %v1358_v63, %v1580_v6  ;;  %1782 = vadd.xlane.f32.xlu0 %v1781_v9  ;;  %v1715_v12 = vmul.f32 %v9763_v21, %v1643_v5 }
 0x291   : > { %v1642_v13 = vmax.f32 %v1350_v4, %v1578_v8  ;;  %v8581_v14 = vpop.f32.mrb[12].mxu1  ;;  %1785 = vadd.xlane.f32.xlu1 %v1784_v37  ;;  %v1713_v22 = vmul.f32 %v9763_v21, %v1641_v7 }
 0x292   : > { %v1371_v15 = vadd.f32 %v8581_v14, %v9757_v11  ;;  %v1362_v16 = vpop.f32.mrb[13].mxu1  ;;  %v1799_v17 = vsel %vm615_vm0, %v1715_v12, 0.0  ;;  %v1716_v18 = vmul.f32 %v9763_v21, %v1644_v10 }
 0x293   : > { %v1363_v19 = vadd.f32 %v9757_v11, %v1362_v16  ;;  %v8582_v20 = vpop.f32.mrb[14].mxu1  ;;  %v1714_v27 = vmul.f32 %v9763_v21, %v1642_v13  ;;  %v1793_v34 = vsel %vm615_vm0, %v1713_v22, 0.0 }
 0x294   : > { %v1583_v23 = vmul.f32 0.2, %v1371_v15  ;;  %v1374_v24 = vadd.f32 %v8582_v20, %v9757_v11  ;;  %v1365_v25 = vpop.f32.mrb[15].mxu1  ;;  %1800 = vadd.xlane.f32.xlu0 %v1799_v17  ;;  %v1802_v26 = vsel %vm615_vm0, %v1716_v18, 0.0 }
 0x295   : > { %v1581_v28 = vmul.f32 0.2, %v1363_v19  ;;  %v1366_v29 = vadd.f32 %v9757_v11, %v1365_v25  ;;  %1803 = vadd.xlane.f32.xlu1 %v1802_v26  ;;  %v1796_v36 = vsel %vm615_vm0, %v1714_v27, 0.0 }
 0x296   : > { %v1647_v30 = vmax.f32 %v1371_v15, %v1583_v23  ;;  %v1584_v31 = vmul.f32 0.2, %v1374_v24 }
 0x297   : > { %v1645_v32 = vmax.f32 %v1363_v19, %v1581_v28  ;;  %v1582_v33 = vmul.f32 0.2, %v1366_v29 }
 0x298   : > { %v1648_v35 = vmax.f32 %v1374_v24, %v1584_v31  ;;  %1794 = vadd.xlane.f32.xlu0 %v1793_v34  ;;  %v1719_v38 = vmul.f32 %v9763_v21, %v1647_v30 }
 0x299   : > { %v1646_v39 = vmax.f32 %v1366_v29, %v1582_v33  ;;  %v8585_v40 = vpop.f32.mrb[16].mxu1  ;;  %1797 = vadd.xlane.f32.xlu1 %v1796_v36  ;;  %v1717_v47 = vmul.f32 %v9763_v21, %v1645_v32 }
 0x29a   : > { %v1387_v41 = vadd.f32 %v8585_v40, %v9757_v11  ;;  %v1378_v42 = vpop.f32.mrb[17].mxu1  ;;  %v1811_v43 = vsel %vm615_vm0, %v1719_v38, 0.0  ;;  %v1720_v44 = vmul.f32 %v9763_v21, %v1648_v35 }
 0x29b   : > { %v1379_v45 = vadd.f32 %v9757_v11, %v1378_v42  ;;  %v8586_v46 = vpop.f32.mrb[18].mxu1  ;;  %v1718_v52 = vmul.f32 %v9763_v21, %v1646_v39  ;;  %v1805_v59 = vsel %vm615_vm0, %v1717_v47, 0.0 }
 0x29c   : > { %v1587_v48 = vmul.f32 0.2, %v1387_v41  ;;  %v1390_v49 = vadd.f32 %v8586_v46, %v9757_v11  ;;  %v1381_v50 = vpop.f32.mrb[19].mxu1  ;;  %1812 = vadd.xlane.f32.xlu0 %v1811_v43  ;;  %v1814_v51 = vsel %vm615_vm0, %v1720_v44, 0.0 }
 0x29d   : > { %v1585_v53 = vmul.f32 0.2, %v1379_v45  ;;  %v1382_v54 = vadd.f32 %v9757_v11, %v1381_v50  ;;  %1815 = vadd.xlane.f32.xlu1 %v1814_v51  ;;  %v1808_v61 = vsel %vm615_vm0, %v1718_v52, 0.0 }
 0x29e   : > { %v1651_v55 = vmax.f32 %v1387_v41, %v1587_v48  ;;  %v1588_v56 = vmul.f32 0.2, %v1390_v49 }
 0x29f   : > { %v1649_v57 = vmax.f32 %v1379_v45, %v1585_v53  ;;  %v1586_v58 = vmul.f32 0.2, %v1382_v54 }
 0x2a0   : > { %v1652_v60 = vmax.f32 %v1390_v49, %v1588_v56  ;;  %1806 = vadd.xlane.f32.xlu0 %v1805_v59  ;;  %v1723_v62 = vmul.f32 %v9763_v21, %v1651_v55 }
 0x2a1   : > { %v1650_v63 = vmax.f32 %v1382_v54, %v1586_v58  ;;  %v8589_v0 = vpop.f32.mrb[20].mxu1  ;;  %1809 = vadd.xlane.f32.xlu1 %v1808_v61  ;;  %v1721_v7 = vmul.f32 %v9763_v21, %v1649_v57 }
 0x2a2   : > { %v1403_v1 = vadd.f32 %v8589_v0, %v9757_v11  ;;  %v1394_v2 = vpop.f32.mrb[21].mxu1  ;;  %v1823_v3 = vsel %vm615_vm0, %v1723_v62, 0.0  ;;  %v1724_v4 = vmul.f32 %v9763_v21, %v1652_v60 }
 0x2a3   : > { %v1395_v5 = vadd.f32 %v9757_v11, %v1394_v2  ;;  %v8590_v6 = vpop.f32.mrb[22].mxu1  ;;  %v1722_v12 = vmul.f32 %v9763_v21, %v1650_v63  ;;  %v1817_v19 = vsel %vm615_vm0, %v1721_v7, 0.0 }
 0x2a4   : > { %v1591_v8 = vmul.f32 0.2, %v1403_v1  ;;  %v1406_v9 = vadd.f32 %v8590_v6, %v9757_v11  ;;  %v1397_v10 = vpop.f32.mrb[23].mxu1  ;;  %1824 = vadd.xlane.f32.xlu0 %v1823_v3  ;;  %v1826_v37 = vsel %vm615_vm0, %v1724_v4, 0.0 }
 0x2a5   : > { %v1589_v13 = vmul.f32 0.2, %v1395_v5  ;;  %v1398_v14 = vadd.f32 %v9757_v11, %v1397_v10  ;;  %1827 = vadd.xlane.f32.xlu1 %v1826_v37  ;;  %v1820_v22 = vsel %vm615_vm0, %v1722_v12, 0.0 }
 0x2a6   : > { %v1655_v15 = vmax.f32 %v1403_v1, %v1591_v8  ;;  %v1592_v16 = vmul.f32 0.2, %v1406_v9 }
 0x2a7   : > { %v1653_v17 = vmax.f32 %v1395_v5, %v1589_v13  ;;  %v1590_v18 = vmul.f32 0.2, %v1398_v14 }
 0x2a8   : > { %v1656_v20 = vmax.f32 %v1406_v9, %v1592_v16  ;;  %1818 = vadd.xlane.f32.xlu0 %v1817_v19  ;;  %v1727_v23 = vmul.f32 %v9763_v21, %v1655_v15 }
 0x2a9   : > { %v1654_v24 = vmax.f32 %v1398_v14, %v1590_v18  ;;  %v8593_v25 = vpop.f32.mrb[24].mxu1  ;;  %1821 = vadd.xlane.f32.xlu1 %v1820_v22  ;;  %v1725_v32 = vmul.f32 %v9763_v21, %v1653_v17 }
 0x2aa   : > { %v1419_v26 = vadd.f32 %v8593_v25, %v9757_v11  ;;  %v1410_v27 = vpop.f32.mrb[25].mxu1  ;;  %v1835_v28 = vsel %vm615_vm0, %v1727_v23, 0.0  ;;  %v1728_v29 = vmul.f32 %v9763_v21, %v1656_v20 }
 0x2ab   : > { %v1411_v30 = vadd.f32 %v9757_v11, %v1410_v27  ;;  %v8594_v31 = vpop.f32.mrb[26].mxu1  ;;  %v1726_v38 = vmul.f32 %v9763_v21, %v1654_v24  ;;  %v1829_v45 = vsel %vm615_vm0, %v1725_v32, 0.0 }
 0x2ac   : > { %v1595_v33 = vmul.f32 0.2, %v1419_v26  ;;  %v1422_v34 = vadd.f32 %v8594_v31, %v9757_v11  ;;  %v1413_v35 = vpop.f32.mrb[27].mxu1  ;;  %1836 = vadd.xlane.f32.xlu0 %v1835_v28  ;;  %v1838_v36 = vsel %vm615_vm0, %v1728_v29, 0.0 }
 0x2ad   : > { %v1593_v39 = vmul.f32 0.2, %v1411_v30  ;;  %v1414_v40 = vadd.f32 %v9757_v11, %v1413_v35  ;;  %1839 = vadd.xlane.f32.xlu1 %v1838_v36  ;;  %v1832_v47 = vsel %vm615_vm0, %v1726_v38, 0.0 }
 0x2ae   : > { %v1659_v41 = vmax.f32 %v1419_v26, %v1595_v33  ;;  %v1596_v42 = vmul.f32 0.2, %v1422_v34  ;;  %v9286_v26 = vmov 0  }
 0x2af   : > { %v1657_v43 = vmax.f32 %v1411_v30, %v1593_v39  ;;  %v1594_v44 = vmul.f32 0.2, %v1414_v40  ;;  %8735 = vset.pattern.permute.xlu0 %v9286_v26  ;;  %8734 = vset.pattern.permute.xlu1 %v9286_v26 }
 0x2b0   : > { %v1660_v46 = vmax.f32 %v1422_v34, %v1596_v42  ;;  %1830 = vadd.xlane.f32.xlu0 %v1829_v45  ;;  %v1731_v48 = vmul.f32 %v9763_v21, %v1659_v41 }
 0x2b1   : > { %v1658_v49 = vmax.f32 %v1414_v40, %v1594_v44  ;;  %v8597_v50 = vpop.f32.mrb[28].mxu1  ;;  %1833 = vadd.xlane.f32.xlu1 %v1832_v47  ;;  %v1729_v57 = vmul.f32 %v9763_v21, %v1657_v43 }
 0x2b2   : > { %v1435_v51 = vadd.f32 %v8597_v50, %v9757_v11  ;;  %v1426_v52 = vpop.f32.mrb[29].mxu1  ;;  %v1847_v53 = vsel %vm615_vm0, %v1731_v48, 0.0  ;;  %v1732_v54 = vmul.f32 %v9763_v21, %v1660_v46 }
 0x2b3   : > { %v1427_v55 = vadd.f32 %v9757_v11, %v1426_v52  ;;  %v8598_v56 = vpop.f32.mrb[30].mxu1  ;;  %v1730_v62 = vmul.f32 %v9763_v21, %v1658_v49  ;;  %v1841_v5 = vsel %vm615_vm0, %v1729_v57, 0.0 }
 0x2b4   : > { %v1599_v58 = vmul.f32 0.2, %v1435_v51  ;;  %v1438_v59 = vadd.f32 %v8598_v56, %v9757_v11  ;;  %v1429_v60 = vpop.f32.mrb[31].mxu1  ;;  %1848 = vadd.xlane.f32.xlu0 %v1847_v53  ;;  %v1850_v61 = vsel %vm615_vm0, %v1732_v54, 0.0 }
 0x2b5   : > { %v1597_v63 = vmul.f32 0.2, %v1427_v55  ;;  %v1430_v0 = vadd.f32 %v9757_v11, %v1429_v60  ;;  %1851 = vadd.xlane.f32.xlu1 %v1850_v61  ;;  %v1844_v7 = vsel %vm615_vm0, %v1730_v62, 0.0 }
 0x2b6   : > { %v1663_v1 = vmax.f32 %v1435_v51, %v1599_v58  ;;  %v1600_v2 = vmul.f32 0.2, %v1438_v59 }
 0x2b7   : > { %v1661_v3 = vmax.f32 %v1427_v55, %v1597_v63  ;;  %v1598_v4 = vmul.f32 0.2, %v1430_v0 }
 0x2b8   : > { %v1664_v6 = vmax.f32 %v1438_v59, %v1600_v2  ;;  %1842 = vadd.xlane.f32.xlu0 %v1841_v5  ;;  %v1735_v8 = vmul.f32 %v9763_v21, %v1663_v1 }
 0x2b9   : > { %v1662_v9 = vmax.f32 %v1430_v0, %v1598_v4  ;;  %v8601_v10 = vpop.f32.mrb[32].mxu1  ;;  %1845 = vadd.xlane.f32.xlu1 %v1844_v7  ;;  %v1733_v17 = vmul.f32 %v9763_v21, %v1661_v3 }
 0x2ba   : > { %v1451_v37 = vadd.f32 %v8601_v10, %v9757_v11  ;;  %v1442_v12 = vpop.f32.mrb[33].mxu1  ;;  %v1859_v13 = vsel %vm615_vm0, %v1735_v8, 0.0  ;;  %v1736_v14 = vmul.f32 %v9763_v21, %v1664_v6 }
 0x2bb   : > { %v1443_v15 = vadd.f32 %v9757_v11, %v1442_v12  ;;  %v8602_v16 = vpop.f32.mrb[34].mxu1  ;;  %v1734_v18 = vmul.f32 %v9763_v21, %v1662_v9  ;;  %v1853_v31 = vsel %vm615_vm0, %v1733_v17, 0.0 }
 0x2bc   : > { %v1603_v19 = vmul.f32 0.2, %v1451_v37  ;;  %v1454_v20 = vadd.f32 %v8602_v16, %v9757_v11  ;;  %v1445_v22 = vpop.f32.mrb[35].mxu1  ;;  %1860 = vadd.xlane.f32.xlu0 %v1859_v13  ;;  %v1862_v23 = vsel %vm615_vm0, %v1736_v14, 0.0 }
 0x2bd   : > { %v1601_v24 = vmul.f32 0.2, %v1443_v15  ;;  %v1446_v25 = vadd.f32 %v9757_v11, %v1445_v22  ;;  %1863 = vadd.xlane.f32.xlu1 %v1862_v23  ;;  %v1856_v33 = vsel %vm615_vm0, %v1734_v18, 0.0 }
 0x2be   : > { %v1667_v27 = vmax.f32 %v1451_v37, %v1603_v19  ;;  %v1604_v28 = vmul.f32 0.2, %v1454_v20 }
 0x2bf   : > { %v1665_v29 = vmax.f32 %v1443_v15, %v1601_v24  ;;  %v1602_v30 = vmul.f32 0.2, %v1446_v25 }
 0x2c0   : > { %v1668_v32 = vmax.f32 %v1454_v20, %v1604_v28  ;;  %1854 = vadd.xlane.f32.xlu0 %v1853_v31  ;;  %v1739_v34 = vmul.f32 %v9763_v21, %v1667_v27 }
 0x2c1   : > { %v1666_v35 = vmax.f32 %v1446_v25, %v1602_v30  ;;  %v8605_v36 = vpop.f32.mrb[36].mxu1  ;;  %1857 = vadd.xlane.f32.xlu1 %v1856_v33  ;;  %v1737_v44 = vmul.f32 %v9763_v21, %v1665_v29 }
 0x2c2   : > { %v1467_v38 = vadd.f32 %v8605_v36, %v9757_v11  ;;  %v1458_v39 = vpop.f32.mrb[37].mxu1  ;;  %v1871_v40 = vsel %vm615_vm0, %v1739_v34, 0.0  ;;  %v1740_v41 = vmul.f32 %v9763_v21, %v1668_v32 }
 0x2c3   : > { %v1459_v42 = vadd.f32 %v9757_v11, %v1458_v39  ;;  %v8606_v43 = vpop.f32.mrb[38].mxu1  ;;  %v1738_v49 = vmul.f32 %v9763_v21, %v1666_v35  ;;  %v1865_v56 = vsel %vm615_vm0, %v1737_v44, 0.0 }
 0x2c4   : > { %v1607_v45 = vmul.f32 0.2, %v1467_v38  ;;  %v1470_v46 = vadd.f32 %v8606_v43, %v9757_v11  ;;  %v1461_v47 = vpop.f32.mrb[39].mxu1  ;;  %1872 = vadd.xlane.f32.xlu0 %v1871_v40  ;;  %v1874_v48 = vsel %vm615_vm0, %v1740_v41, 0.0 }
 0x2c5   : > { %v1605_v50 = vmul.f32 0.2, %v1459_v42  ;;  %v1462_v51 = vadd.f32 %v9757_v11, %v1461_v47  ;;  %1875 = vadd.xlane.f32.xlu1 %v1874_v48  ;;  %v1868_v58 = vsel %vm615_vm0, %v1738_v49, 0.0 }
 0x2c6   : > { %v1671_v52 = vmax.f32 %v1467_v38, %v1607_v45  ;;  %v1608_v53 = vmul.f32 0.2, %v1470_v46 }
 0x2c7   : > { %v1669_v54 = vmax.f32 %v1459_v42, %v1605_v50  ;;  %v1606_v55 = vmul.f32 0.2, %v1462_v51 }
 0x2c8   : > { %v1672_v57 = vmax.f32 %v1470_v46, %v1608_v53  ;;  %1866 = vadd.xlane.f32.xlu0 %v1865_v56  ;;  %v1743_v59 = vmul.f32 %v9763_v21, %v1671_v52 }
 0x2c9   : > { %v1670_v60 = vmax.f32 %v1462_v51, %v1606_v55  ;;  %v8609_v61 = vpop.f32.mrb[40].mxu1  ;;  %1869 = vadd.xlane.f32.xlu1 %v1868_v58  ;;  %v1741_v4 = vmul.f32 %v9763_v21, %v1669_v54 }
 0x2ca   : > { %v1483_v62 = vadd.f32 %v8609_v61, %v9757_v11  ;;  %v1474_v63 = vpop.f32.mrb[41].mxu1  ;;  %v1883_v0 = vsel %vm615_vm0, %v1743_v59, 0.0  ;;  %v1744_v1 = vmul.f32 %v9763_v21, %v1672_v57 }
 0x2cb   : > { %v1475_v2 = vadd.f32 %v9757_v11, %v1474_v63  ;;  %v8610_v3 = vpop.f32.mrb[42].mxu1  ;;  %v1742_v9 = vmul.f32 %v9763_v21, %v1670_v60  ;;  %v1877_v16 = vsel %vm615_vm0, %v1741_v4, 0.0 }
 0x2cc   : > { %v1611_v5 = vmul.f32 0.2, %v1483_v62  ;;  %v1486_v6 = vadd.f32 %v8610_v3, %v9757_v11  ;;  %v1477_v7 = vpop.f32.mrb[43].mxu1  ;;  %1884 = vadd.xlane.f32.xlu0 %v1883_v0  ;;  %v1886_v8 = vsel %vm615_vm0, %v1744_v1, 0.0 }
 0x2cd   : > { %v1609_v10 = vmul.f32 0.2, %v1475_v2  ;;  %v1478_v37 = vadd.f32 %v9757_v11, %v1477_v7  ;;  %1887 = vadd.xlane.f32.xlu1 %v1886_v8  ;;  %v1880_v18 = vsel %vm615_vm0, %v1742_v9, 0.0 }
 0x2ce   : > { %v1675_v12 = vmax.f32 %v1483_v62, %v1611_v5  ;;  %v1612_v13 = vmul.f32 0.2, %v1486_v6 }
 0x2cf   : > { %v1673_v14 = vmax.f32 %v1475_v2, %v1609_v10  ;;  %v1610_v15 = vmul.f32 0.2, %v1478_v37 }
 0x2d0   : > { %v1676_v17 = vmax.f32 %v1486_v6, %v1612_v13  ;;  %1878 = vadd.xlane.f32.xlu0 %v1877_v16  ;;  %v1747_v19 = vmul.f32 %v9763_v21, %v1675_v12 }
 0x2d1   : > { %v1674_v20 = vmax.f32 %v1478_v37, %v1610_v15  ;;  %v8613_v22 = vpop.f32.mrb[44].mxu1  ;;  %1881 = vadd.xlane.f32.xlu1 %v1880_v18  ;;  %v1745_v29 = vmul.f32 %v9763_v21, %v1673_v14 }
 0x2d2   : > { %v1499_v23 = vadd.f32 %v8613_v22, %v9757_v11  ;;  %v1490_v24 = vpop.f32.mrb[45].mxu1  ;;  %v1895_v25 = vsel %vm615_vm0, %v1747_v19, 0.0  ;;  %v1748_v26 = vmul.f32 %v9763_v21, %v1676_v17 }
 0x2d3   : > { %v1491_v27 = vadd.f32 %v9757_v11, %v1490_v24  ;;  %v8614_v28 = vpop.f32.mrb[46].mxu1  ;;  %v1746_v34 = vmul.f32 %v9763_v21, %v1674_v20  ;;  %v1889_v42 = vsel %vm615_vm0, %v1745_v29, 0.0 }
 0x2d4   : > { %v1615_v30 = vmul.f32 0.2, %v1499_v23  ;;  %v1502_v31 = vadd.f32 %v8614_v28, %v9757_v11  ;;  %v1493_v32 = vpop.f32.mrb[47].mxu1  ;;  %1896 = vadd.xlane.f32.xlu0 %v1895_v25  ;;  %v1898_v33 = vsel %vm615_vm0, %v1748_v26, 0.0 }
 0x2d5   : > { %v1613_v35 = vmul.f32 0.2, %v1491_v27  ;;  %v1494_v36 = vadd.f32 %v9757_v11, %v1493_v32  ;;  %1899 = vadd.xlane.f32.xlu1 %v1898_v33  ;;  %v1892_v44 = vsel %vm615_vm0, %v1746_v34, 0.0 }
 0x2d6   : > { %v1679_v38 = vmax.f32 %v1499_v23, %v1615_v30  ;;  %v1616_v39 = vmul.f32 0.2, %v1502_v31 }
 0x2d7   : > { %v1677_v40 = vmax.f32 %v1491_v27, %v1613_v35  ;;  %v1614_v41 = vmul.f32 0.2, %v1494_v36 }
 0x2d8   : > { %v1680_v43 = vmax.f32 %v1502_v31, %v1616_v39  ;;  %1890 = vadd.xlane.f32.xlu0 %v1889_v42  ;;  %v1751_v45 = vmul.f32 %v9763_v21, %v1679_v38 }
 0x2d9   : > { %v1678_v46 = vmax.f32 %v1494_v36, %v1614_v41  ;;  %v8617_v47 = vpop.f32.mrb[48].mxu1  ;;  %1893 = vadd.xlane.f32.xlu1 %v1892_v44  ;;  %v1749_v54 = vmul.f32 %v9763_v21, %v1677_v40 }
 0x2da   : > { %v1515_v48 = vadd.f32 %v8617_v47, %v9757_v11  ;;  %v1506_v49 = vpop.f32.mrb[49].mxu1  ;;  %v1907_v50 = vsel %vm615_vm0, %v1751_v45, 0.0  ;;  %v1752_v51 = vmul.f32 %v9763_v21, %v1680_v43 }
 0x2db   : > { %v1507_v52 = vadd.f32 %v9757_v11, %v1506_v49  ;;  %v8618_v53 = vpop.f32.mrb[50].mxu1  ;;  %v1750_v59 = vmul.f32 %v9763_v21, %v1678_v46  ;;  %v1901_v2 = vsel %vm615_vm0, %v1749_v54, 0.0 }
 0x2dc   : > { %v1619_v55 = vmul.f32 0.2, %v1515_v48  ;;  %v1518_v56 = vadd.f32 %v8618_v53, %v9757_v11  ;;  %v1509_v57 = vpop.f32.mrb[51].mxu1  ;;  %1908 = vadd.xlane.f32.xlu0 %v1907_v50  ;;  %v1910_v58 = vsel %vm615_vm0, %v1752_v51, 0.0 }
 0x2dd   : > { %v1617_v60 = vmul.f32 0.2, %v1507_v52  ;;  %v1510_v61 = vadd.f32 %v9757_v11, %v1509_v57  ;;  %1911 = vadd.xlane.f32.xlu1 %v1910_v58  ;;  %v1904_v4 = vsel %vm615_vm0, %v1750_v59, 0.0 }
 0x2de   : > { %v1683_v62 = vmax.f32 %v1515_v48, %v1619_v55  ;;  %v1620_v63 = vmul.f32 0.2, %v1518_v56 }
 0x2df   : > { %v1681_v0 = vmax.f32 %v1507_v52, %v1617_v60  ;;  %v1618_v1 = vmul.f32 0.2, %v1510_v61 }
 0x2e0   : > { %v1684_v3 = vmax.f32 %v1518_v56, %v1620_v63  ;;  %1902 = vadd.xlane.f32.xlu0 %v1901_v2  ;;  %v1755_v5 = vmul.f32 %v9763_v21, %v1683_v62 }
 0x2e1   : > { %v1682_v6 = vmax.f32 %v1510_v61, %v1618_v1  ;;  %v8621_v7 = vpop.f32.mrb[52].mxu1  ;;  %1905 = vadd.xlane.f32.xlu1 %v1904_v4  ;;  %v1753_v14 = vmul.f32 %v9763_v21, %v1681_v0 }
 0x2e2   : > { %v1531_v8 = vadd.f32 %v8621_v7, %v9757_v11  ;;  %v1522_v9 = vpop.f32.mrb[53].mxu1  ;;  %v1919_v10 = vsel %vm615_vm0, %v1755_v5, 0.0  ;;  %v1756_v37 = vmul.f32 %v9763_v21, %v1684_v3 }
 0x2e3   : > { %v1523_v12 = vadd.f32 %v9757_v11, %v1522_v9  ;;  %v8622_v13 = vpop.f32.mrb[54].mxu1  ;;  %v1754_v19 = vmul.f32 %v9763_v21, %v1682_v6  ;;  %v1913_v27 = vsel %vm615_vm0, %v1753_v14, 0.0 }
 0x2e4   : > { %v1623_v15 = vmul.f32 0.2, %v1531_v8  ;;  %v1534_v16 = vadd.f32 %v8622_v13, %v9757_v11  ;;  %v1525_v17 = vpop.f32.mrb[55].mxu1  ;;  %1920 = vadd.xlane.f32.xlu0 %v1919_v10  ;;  %v1922_v18 = vsel %vm615_vm0, %v1756_v37, 0.0 }
 0x2e5   : > { %v1621_v20 = vmul.f32 0.2, %v1523_v12  ;;  %v1526_v22 = vadd.f32 %v9757_v11, %v1525_v17  ;;  %1923 = vadd.xlane.f32.xlu1 %v1922_v18  ;;  %v1916_v29 = vsel %vm615_vm0, %v1754_v19, 0.0 }
 0x2e6   : > { %v1687_v23 = vmax.f32 %v1531_v8, %v1623_v15  ;;  %v1624_v24 = vmul.f32 0.2, %v1534_v16 }
 0x2e7   : > { %v1685_v25 = vmax.f32 %v1523_v12, %v1621_v20  ;;  %v1622_v26 = vmul.f32 0.2, %v1526_v22 }
 0x2e8   : > { %v1688_v28 = vmax.f32 %v1534_v16, %v1624_v24  ;;  %1914 = vadd.xlane.f32.xlu0 %v1913_v27  ;;  %v1759_v30 = vmul.f32 %v9763_v21, %v1687_v23  ;;  %v9953_v24 = vstv %s8632_s9 }
 0x2e9   : > { %v1686_v31 = vmax.f32 %v1526_v22, %v1622_v26  ;;  %v8625_v32 = vpop.f32.mrb[56].mxu1  ;;  %1917 = vadd.xlane.f32.xlu1 %v1916_v29  ;;  %v1757_v40 = vmul.f32 %v9763_v21, %v1685_v25 }
 0x2ea   : > { %v1547_v33 = vadd.f32 %v8625_v32, %v9757_v11  ;;  %v1538_v34 = vpop.f32.mrb[57].mxu1  ;;  %v1931_v35 = vsel %vm615_vm0, %v1759_v30, 0.0  ;;  %v1760_v36 = vmul.f32 %v9763_v21, %v1688_v28 }
 0x2eb   : > { %v1539_v38 = vadd.f32 %v9757_v11, %v1538_v34  ;;  %v8626_v39 = vpop.f32.mrb[58].mxu1  ;;  %v1758_v45 = vmul.f32 %v9763_v21, %v1686_v31  ;;  %v1925_v52 = vsel %vm615_vm0, %v1757_v40, 0.0 }
 0x2ec   : > { %v1627_v41 = vmul.f32 0.2, %v1547_v33  ;;  %v1550_v42 = vadd.f32 %v8626_v39, %v9757_v11  ;;  %v1541_v43 = vpop.f32.mrb[59].mxu1  ;;  %1932 = vadd.xlane.f32.xlu0 %v1931_v35  ;;  %v1934_v44 = vsel %vm615_vm0, %v1760_v36, 0.0 }
 0x2ed   : > { %v1625_v46 = vmul.f32 0.2, %v1539_v38  ;;  %v1542_v47 = vadd.f32 %v9757_v11, %v1541_v43  ;;  %1935 = vadd.xlane.f32.xlu1 %v1934_v44  ;;  %v1928_v54 = vsel %vm615_vm0, %v1758_v45, 0.0 }
 0x2ee   : > { %v1691_v48 = vmax.f32 %v1547_v33, %v1627_v41  ;;  %v1628_v49 = vmul.f32 0.2, %v1550_v42 }
 0x2ef   : > { %v1689_v50 = vmax.f32 %v1539_v38, %v1625_v46  ;;  %v1626_v51 = vmul.f32 0.2, %v1542_v47 }
 0x2f0   : > { %v1692_v53 = vmax.f32 %v1550_v42, %v1628_v49  ;;  %1926 = vadd.xlane.f32.xlu0 %v1925_v52  ;;  %v1763_v55 = vmul.f32 %v9763_v21, %v1691_v48  ;;  %v11930_v48 = vlaneseq }
 0x2f1   : > { %v1690_v56 = vmax.f32 %v1542_v47, %v1626_v51  ;;  %v8629_v57 = vpop.f32.mrb[60].mxu1  ;;  %1929 = vadd.xlane.f32.xlu1 %v1928_v54  ;;  %v1761_v0 = vmul.f32 %v9763_v21, %v1689_v50 }
 0x2f2   : > { %v1563_v58 = vadd.f32 %v8629_v57, %v9757_v11  ;;  %v1554_v59 = vpop.f32.mrb[61].mxu1  ;;  %v1943_v60 = vsel %vm615_vm0, %v1763_v55, 0.0  ;;  %v1764_v61 = vmul.f32 %v9763_v21, %v1692_v53 }
 0x2f3   : > { %v1555_v62 = vadd.f32 %v9757_v11, %v1554_v59  ;;  %v8630_v63 = vpop.f32.mrb[62].mxu1  ;;  %v1762_v5 = vmul.f32 %v9763_v21, %v1690_v56  ;;  %v1937_v12 = vsel %vm615_vm0, %v1761_v0, 0.0 }
 0x2f4   : > { %v1631_v1 = vmul.f32 0.2, %v1563_v58  ;;  %v1566_v2 = vadd.f32 %v8630_v63, %v9757_v11  ;;  %v1557_v3 = vpop.f32.mrb[63].mxu1  ;;  %1944 = vadd.xlane.f32.xlu0 %v1943_v60  ;;  %v1946_v4 = vsel %vm615_vm0, %v1764_v61, 0.0 }
 0x2f5   : > { %v1629_v6 = vmul.f32 0.2, %v1555_v62  ;;  %v1558_v7 = vadd.f32 %v9757_v11, %v1557_v3  ;;  %1947 = vadd.xlane.f32.xlu1 %v1946_v4  ;;  %v1940_v14 = vsel %vm615_vm0, %v1762_v5, 0.0 }
 0x2f6   : > { %v1695_v8 = vmax.f32 %v1563_v58, %v1631_v1  ;;  %v1632_v9 = vmul.f32 0.2, %v1566_v2  ;;  %v9964_v58 = vshrl.u32 %v11930_v48, 7 }
 0x2f7   : > { %v1693_v10 = vmax.f32 %v1555_v62, %v1629_v6  ;;  %v1630_v37 = vmul.f32 0.2, %v1558_v7 }
 0x2f8   : > { %v1696_v13 = vmax.f32 %v1566_v2, %v1632_v9  ;;  %1938 = vadd.xlane.f32.xlu0 %v1937_v12  ;;  %v1767_v15 = vmul.f32 %v9763_v21, %v1695_v8  ;;  %v9287_v8 = vmov 1966171168  }
 0x2f9   : > { %v1694_v16 = vmax.f32 %v1558_v7, %v1630_v37  ;;  %1941 = vadd.xlane.f32.xlu1 %v1940_v14  ;;  %v1765_v11 = vmul.f32 %v9763_v21, %v1693_v10  ;;  %v9969_v7 = vsub.s32 0, %v9964_v58  ;;  %v4464_v9 = vunpack.c.l.s4 %v9287_v8 }
 0x2fa   : > { %v1955_v17 = vsel %vm615_vm0, %v1767_v15, 0.0  ;;  %v1768_v18 = vmul.f32 %v9763_v21, %v1696_v13 }
 0x2fb   : > { %v1766_v20 = vmul.f32 %v9763_v21, %v1694_v16  ;;  %v1949_v22 = vsel %vm615_vm0, %v1765_v11, 0.0  ;;  %v9974_v11 = vsub.s32 1, %v9964_v58 }
 0x2fc   : > { %1956 = vadd.xlane.f32.xlu0 %v1955_v17  ;;  %v1958_v19 = vsel %vm615_vm0, %v1768_v18, 0.0 }
 0x2fd   : > { %1959 = vadd.xlane.f32.xlu1 %v1958_v19  ;;  %v1952_v23 = vsel %vm615_vm0, %v1766_v20, 0.0  ;;  %v9977_v19 = vsub.s32 2, %v9964_v58 }
 0x300   : > { %1950 = vadd.xlane.f32.xlu0 %v1949_v22 }
 0x301   : > { %1953 = vadd.xlane.f32.xlu1 %v1952_v23  ;;  %v9980_v23 = vsub.s32 3, %v9964_v58 }
 0x310   : > { %v1777_v25 = vpop.xlane.xlu1 %1776 }
 0x311   : > { %v1965_v26 = vadd.f32 %v9953_v24, %v1777_v25  ;;  %v1771_v27 = vpop.xlane.xlu0 %1770  ;;  %v9983_v25 = vsub.s32 4, %v9964_v58 }
 0x312   : > { %v1963_v28 = vadd.f32 %v9953_v24, %v1771_v27 }
 0x313   : > { %v2029_v29 = vsub.f32 0.0, %v1965_v26 }
 0x314   : > { %v2027_v30 = vsub.f32 0.0, %v1963_v28  ;;  %v1780_v31 = vpop.xlane.xlu1 %1779 }
 0x315   : > { %v2095_v21 = vmul.f32 1.442695, %v2029_v29  ;;  %v1966_v32 = vadd.f32 %v9953_v24, %v1780_v31  ;;  %v1774_v33 = vpop.xlane.xlu0 %1773 }
 0x316   : > { %v2091_v34 = vmul.f32 1.442695, %v2027_v30  ;;  %v1964_v35 = vadd.f32 %v9953_v24, %v1774_v33  ;;  %v4465_v30 = vunpack.c.0.s8 %v4464_v9 }
 0x317   : > { %8772 = vpow2.f32 %v2095_v21  ;;  %v2030_v36 = vsub.f32 0.0, %v1966_v32 }
 0x318   : > { %8774 = vpow2.f32 %v2091_v34  ;;  %v2028_v38 = vsub.f32 0.0, %v1964_v35 }
 0x319   : > { %v2097_v39 = vmul.f32 1.442695, %v2030_v36  ;;  %v1789_v40 = vpop.xlane.xlu0 %1788  ;;  %v9988_v36 = vsub.s32 5, %v9964_v58 }
 0x31a   : > { %v2093_v41 = vmul.f32 1.442695, %v2028_v38  ;;  %v1969_v42 = vadd.f32 %v9953_v24, %v1789_v40  ;;  %v1792_v43 = vpop.xlane.xlu1 %1791  ;;  %v9991_v40 = vsub.s32 6, %v9964_v58 }
 0x31b   : > { %8776 = vpow2.f32 %v2097_v39  ;;  %v1970_v44 = vadd.f32 %v9953_v24, %v1792_v43 }
 0x31c   : > { %8778 = vpow2.f32 %v2093_v41  ;;  %v2033_v45 = vsub.f32 0.0, %v1969_v42  ;;  %v9994_v41 = vsub.s32 7, %v9964_v58 }
 0x31d   : > { %v2034_v46 = vsub.f32 0.0, %v1970_v44  ;;  %v1783_v47 = vpop.xlane.xlu0 %1782 }
 0x31e   : > { %v2103_v49 = vmul.f32 1.442695, %v2033_v45  ;;  %v1967_v50 = vadd.f32 %v9953_v24, %v1783_v47  ;;  %v1786_v51 = vpop.xlane.xlu1 %1785 }
 0x31f   : > { %v2105_v52 = vmul.f32 1.442695, %v2034_v46  ;;  %v1968_v53 = vadd.f32 %v9953_v24, %v1786_v51  ;;  %v10000_v46 = vsub.s32 %v4465_v30, %v9964_v58 }
 0x320   : > { %8780 = vpow2.f32 %v2103_v49  ;;  %v2031_v54 = vsub.f32 0.0, %v1967_v50 }
 0x321   : > { %v8773_v55 = vpop.eup %8772  ;;  %8782 = vpow2.f32 %v2105_v52  ;;  %v2032_v56 = vsub.f32 0.0, %v1968_v53  ;;  %v1801_v57 = vpop.xlane.xlu0 %1800  ;;  %11948 = vst [vmem:[#allocation20_spill] sm:$0xff] %v10000_v46 }
 0x322   : > { %v8775_v59 = vpop.eup %8774  ;;  %v2221_v60 = vadd.f32 1.0, %v8773_v55  ;;  %v2099_v61 = vmul.f32 1.442695, %v2031_v54  ;;  %v1973_v62 = vadd.f32 %v9953_v24, %v1801_v57  ;;  %v1804_v63 = vpop.xlane.xlu1 %1803 }
 0x323   : > { %v2219_v0 = vadd.f32 1.0, %v8775_v59  ;;  %v2101_v1 = vmul.f32 1.442695, %v2032_v56  ;;  %v1974_v2 = vadd.f32 %v9953_v24, %v1804_v63 }
 0x324   : > { %8784 = vrcp.f32 %v2221_v60  ;;  %v2037_v3 = vsub.f32 0.0, %v1973_v62 }
 0x325   : > { %v8777_v4 = vpop.eup %8776  ;;  %8786 = vrcp.f32 %v2219_v0  ;;  %v2038_v5 = vsub.f32 0.0, %v1974_v2  ;;  %v1795_v6 = vpop.xlane.xlu0 %1794 }
 0x326   : > { %v8779_v10 = vpop.eup %8778  ;;  %v2222_v37 = vadd.f32 1.0, %v8777_v4  ;;  %8788 = vpow2.f32 %v2099_v61  ;;  %v2111_v12 = vmul.f32 1.442695, %v2037_v3  ;;  %v1971_v13 = vadd.f32 %v9953_v24, %v1795_v6  ;;  %v1798_v14 = vpop.xlane.xlu1 %1797 }
 0x327   : > { %v2220_v15 = vadd.f32 1.0, %v8779_v10  ;;  %8790 = vpow2.f32 %v2101_v1  ;;  %v2113_v16 = vmul.f32 1.442695, %v2038_v5  ;;  %v1972_v17 = vadd.f32 %v9953_v24, %v1798_v14 }
 0x328   : > { %8792 = vrcp.f32 %v2222_v37  ;;  %v2035_v18 = vsub.f32 0.0, %v1971_v13 }
 0x329   : > { %8794 = vrcp.f32 %v2220_v15  ;;  %v2036_v20 = vsub.f32 0.0, %v1972_v17  ;;  %v1813_v22 = vpop.xlane.xlu0 %1812 }
 0x32a   : > { %v8781_v26 = vpop.eup %8780  ;;  %8796 = vpow2.f32 %v2111_v12  ;;  %v2107_v27 = vmul.f32 1.442695, %v2035_v18  ;;  %v1977_v28 = vadd.f32 %v9953_v24, %v1813_v22  ;;  %v1816_v29 = vpop.xlane.xlu1 %1815 }
 0x32b   : > { %v8783_v31 = vpop.eup %8782  ;;  %v2225_v21 = vadd.f32 1.0, %v8781_v26  ;;  %8798 = vpow2.f32 %v2113_v16  ;;  %v2109_v32 = vmul.f32 1.442695, %v2036_v20  ;;  %v1978_v33 = vadd.f32 %v9953_v24, %v1816_v29 }
 0x32c   : > { %v2226_v34 = vadd.f32 1.0, %v8783_v31  ;;  %8800 = vpow2.f32 %v2107_v27  ;;  %v2041_v35 = vsub.f32 0.0, %v1977_v28 }
 0x32d   : > { %8802 = vrcp.f32 %v2225_v21  ;;  %v2042_v38 = vsub.f32 0.0, %v1978_v33  ;;  %v1807_v39 = vpop.xlane.xlu0 %1806 }
 0x32e   : > { %v9996_v42 = vpop.eup %8784  ;;  %8804 = vrcp.f32 %v2226_v34  ;;  %v2119_v43 = vmul.f32 1.442695, %v2041_v35  ;;  %v1975_v44 = vadd.f32 %v9953_v24, %v1807_v39  ;;  %v1810_v45 = vpop.xlane.xlu1 %1809 }
 0x32f   : > { %v10002_v47 = vpop.eup %8786  ;;  %8806 = vpow2.f32 %v2109_v32  ;;  %v2121_v49 = vmul.f32 1.442695, %v2042_v38  ;;  %v1976_v50 = vadd.f32 %v9953_v24, %v1810_v45  ;;  %v2478_v51 = vrot.slane %v9996_v42, %v9969_v7 }
 0x330   : > { %v8789_v52 = vpop.eup %8788  ;;  %8808 = vpow2.f32 %v2119_v43  ;;  %v2039_v53 = vsub.f32 0.0, %v1975_v44  ;;  %v2482_v54 = vrot.slane %v9996_v42, %v9974_v11  ;;  %v2486_v55 = vrot.slane %v9996_v42, %v9977_v19 }
 0x331   : > { %v8791_v56 = vpop.eup %8790  ;;  %v2223_v57 = vadd.f32 1.0, %v8789_v52  ;;  %8810 = vpow2.f32 %v2121_v49  ;;  %v2040_v59 = vsub.f32 0.0, %v1976_v50  ;;  %v1825_v60 = vpop.xlane.xlu0 %1824  ;;  %v2490_v61 = vrot.slane %v9996_v42, %v9980_v23 }
 0x332   : > { %v10013_v62 = vpop.eup %8792  ;;  %v2224_v63 = vadd.f32 1.0, %v8791_v56  ;;  %v2115_v0 = vmul.f32 1.442695, %v2039_v53  ;;  %v1981_v1 = vadd.f32 %v9953_v24, %v1825_v60  ;;  %v1828_v2 = vpop.xlane.xlu1 %1827  ;;  %v2494_v3 = vrot.slane %v9996_v42, %v9983_v25 }
 0x333   : > { %v10018_v4 = vpop.eup %8794  ;;  %8812 = vrcp.f32 %v2223_v57  ;;  %v2117_v5 = vmul.f32 1.442695, %v2040_v59  ;;  %v1982_v6 = vadd.f32 %v9953_v24, %v1828_v2  ;;  %v2498_v8 = vrot.slane %v9996_v42, %v9988_v36 }
 0x334   : > { %v8797_v9 = vpop.eup %8796  ;;  %8814 = vrcp.f32 %v2224_v63  ;;  %v2045_v10 = vsub.f32 0.0, %v1981_v1  ;;  %v2502_v37 = vrot.slane %v9996_v42, %v9991_v40  ;;  %v2506_v12 = vrot.slane %v9996_v42, %v9994_v41 }
 0x335   : > { %v8799_v13 = vpop.eup %8798  ;;  %v2229_v14 = vadd.f32 1.0, %v8797_v9  ;;  %8816 = vpow2.f32 %v2115_v0  ;;  %v2046_v15 = vsub.f32 0.0, %v1982_v6  ;;  %v1819_v16 = vpop.xlane.xlu0 %1818  ;;  %v4557_v17 = vcombine.low %v2478_v51, %v2482_v54 }
 0x336   : > { %v8801_v18 = vpop.eup %8800  ;;  %v2230_v20 = vadd.f32 1.0, %v8799_v13  ;;  %8818 = vpow2.f32 %v2117_v5  ;;  %v2127_v22 = vmul.f32 1.442695, %v2045_v10  ;;  %v1979_v26 = vadd.f32 %v9953_v24, %v1819_v16  ;;  %v1822_v27 = vpop.xlane.xlu1 %1821 }
 0x337   : > { %v10028_v28 = vpop.eup %8802  ;;  %8820 = vrcp.f32 %v2229_v14  ;;  %v2227_v29 = vadd.f32 1.0, %v8801_v18  ;;  %v2129_v30 = vmul.f32 1.442695, %v2046_v15  ;;  %v1980_v31 = vadd.f32 %v9953_v24, %v1822_v27 }
 0x338   : > { %v10031_v21 = vpop.eup %8804  ;;  %8822 = vrcp.f32 %v2230_v20  ;;  %v2043_v32 = vsub.f32 0.0, %v1979_v26  ;;  %v4558_v33 = vcombine.low %v2486_v55, %v2490_v61  ;;  %v4559_v34 = vcombine.low %v2494_v3, %v2498_v8 }
 0x339   : > { %v8807_v35 = vpop.eup %8806  ;;  %8824 = vrcp.f32 %v2227_v29  ;;  %v2044_v38 = vsub.f32 0.0, %v1980_v31  ;;  %v1837_v39 = vpop.xlane.xlu0 %1836  ;;  %v4560_v42 = vcombine.low %v2502_v37, %v2506_v12  ;;  %v4567_v43 = vrot.slane %v4557_v17, %v10000_v46 }
 0x33a   : > { %v8809_v44 = vpop.eup %8808  ;;  %v2228_v45 = vadd.f32 1.0, %v8807_v35  ;;  %8826 = vpow2.f32 %v2127_v22  ;;  %v2123_v49 = vmul.f32 1.442695, %v2043_v32  ;;  %v1985_v50 = vadd.f32 %v9953_v24, %v1837_v39  ;;  %v1840_v51 = vpop.xlane.xlu1 %1839 }
 0x33b   : > { %v8811_v52 = vpop.eup %8810  ;;  %v2233_v53 = vadd.f32 1.0, %v8809_v44  ;;  %8828 = vpow2.f32 %v2129_v30  ;;  %v2125_v54 = vmul.f32 1.442695, %v2044_v38  ;;  %v1986_v55 = vadd.f32 %v9953_v24, %v1840_v51 }
 0x33c   : > { %8830 = vrcp.f32 %v2228_v45  ;;  %v2234_v56 = vadd.f32 1.0, %v8811_v52  ;;  %v2049_v57 = vsub.f32 0.0, %v1985_v50  ;;  %v4574_v59 = vrot.slane %v4558_v33, %v10000_v46 }
 0x33d   : > { %v10037_v60 = vpop.eup %8812  ;;  %8832 = vrcp.f32 %v2233_v53  ;;  %v2050_v61 = vsub.f32 0.0, %v1986_v55  ;;  %v4581_v63 = vrot.slane %v4559_v34, %v10000_v46  ;;  %v4588_v0 = vrot.slane %v4560_v42, %v10000_v46  ;;  %v1831_v20 = vpop.xlane.xlu0 %1830 }
 0x33e   : > { %v10041_v1 = vpop.eup %8814  ;;  %8834 = vrcp.f32 %v2234_v56  ;;  %v2135_v2 = vmul.f32 1.442695, %v2049_v57  ;;  %v4589_v3 = vcombine.low %v4567_v43, %v4574_v59  ;;  %v2414_v5 = vrot.slane %v10002_v47, %v9969_v7  ;;  %v1834_v30 = vpop.xlane.xlu1 %1833 }
 0x33f   : > { %v8817_v6 = vpop.eup %8816  ;;  %8836 = vpow2.f32 %v2123_v49  ;;  %v2137_v8 = vmul.f32 1.442695, %v2050_v61  ;;  %v4590_v9 = vcombine.low %v4581_v63, %v4588_v0  ;;  %v2418_v10 = vrot.slane %v10002_v47, %v9974_v11 }
 0x340   : > { %v8819_v37 = vpop.eup %8818  ;;  %v2231_v12 = vadd.f32 1.0, %v8817_v6  ;;  %8838 = vpow2.f32 %v2125_v54  ;;  %v4597_v13 = vrot.slane %v4589_v3, %v10000_v46  ;;  %v2422_v14 = vrot.slane %v10002_v47, %v9977_v19 }
 0x341   : > { %v10050_v15 = vpop.eup %8820  ;;  %v2232_v16 = vadd.f32 1.0, %v8819_v37  ;;  %8840 = vpow2.f32 %v2135_v2  ;;  %v4604_v17 = vrot.slane %v4590_v9, %v10000_v46  ;;  %v2426_v18 = vrot.slane %v10002_v47, %v9980_v23 }
 0x342   : > { %v10055_v22 = vpop.eup %8822  ;;  %8842 = vrcp.f32 %v2231_v12  ;;  %v2430_v26 = vrot.slane %v10002_v47, %v9983_v25  ;;  %v2434_v27 = vrot.slane %v10002_v47, %v9988_v36  ;;  %v2438_v29 = vrot.slane %v10002_v47, %v9991_v40 }
 0x343   : > { %v10063_v31 = vpop.eup %8824  ;;  %8844 = vrcp.f32 %v2232_v16  ;;  %v4605_v32 = vcombine.low %v4597_v13, %v4604_v17  ;;  %v2442_v33 = vrot.slane %v10002_v47, %v9994_v41  ;;  %v4459_v34 = vcombine.low %v2414_v5, %v2418_v10 }
 0x344   : > { %v8827_v35 = vpop.eup %8826  ;;  %8846 = vpow2.f32 %v2137_v8  ;;  %v4460_v38 = vcombine.low %v2422_v14, %v2426_v18  ;;  %v4461_v39 = vcombine.low %v2430_v26, %v2434_v27  ;;  %v1983_v42 = vadd.f32 %v9953_v24, %v1831_v20  ;;  %v1849_v20 = vpop.xlane.xlu0 %1848 }
 0x345   : > { %v8829_v43 = vpop.eup %8828  ;;  %v2237_v44 = vadd.f32 1.0, %v8827_v35  ;;  %7602 = vperm.xlu1 %8734, %v4605_v32   ;;  %v4462_v45 = vcombine.low %v2438_v29, %v2442_v33  ;;  %v4469_v49 = vrot.slane %v4459_v34, %v10000_v46  ;;  %v1984_v50 = vadd.f32 %v9953_v24, %v1834_v30  ;;  %v1852_v32 = vpop.xlane.xlu1 %1851 }
 0x346   : > { %v10070_v51 = vpop.eup %8830  ;;  %v2238_v52 = vadd.f32 1.0, %v8829_v43  ;;  %v4476_v47 = vrot.slane %v4460_v38, %v10000_v46  ;;  %v4483_v53 = vrot.slane %v4461_v39, %v10000_v46  ;;  %v2047_v54 = vsub.f32 0.0, %v1983_v42 }
 0x347   : > { %v10074_v55 = vpop.eup %8832  ;;  %8848 = vrcp.f32 %v2237_v44  ;;  %v4490_v56 = vrot.slane %v4462_v45, %v10000_v46  ;;  %v2048_v57 = vsub.f32 0.0, %v1984_v50  ;;  %v2510_v59 = vrot.slane %v10013_v62, %v9969_v7 }
 0x348   : > { %v10079_v61 = vpop.eup %8834  ;;  %8850 = vrcp.f32 %v2238_v52  ;;  %v4491_v63 = vcombine.low %v4469_v49, %v4476_v47  ;;  %v2131_v0 = vmul.f32 1.442695, %v2047_v54  ;;  %v2514_v2 = vrot.slane %v10013_v62, %v9974_v11 }
 0x349   : > { %v8837_v3 = vpop.eup %8836  ;;  %v4492_v5 = vcombine.low %v4483_v53, %v4490_v56  ;;  %v2133_v6 = vmul.f32 1.442695, %v2048_v57  ;;  %v2518_v8 = vrot.slane %v10013_v62, %v9977_v19  ;;  %v2522_v9 = vrot.slane %v10013_v62, %v9980_v23 }
 0x34a   : > { %v8839_v10 = vpop.eup %8838  ;;  %v2235_v37 = vadd.f32 1.0, %v8837_v3  ;;  %v4499_v12 = vrot.slane %v4491_v63, %v10000_v46  ;;  %8852 = vpow2.f32 %v2131_v0  ;;  %v2526_v13 = vrot.slane %v10013_v62, %v9983_v25 }
 0x34b   : > { %v8841_v14 = vpop.eup %8840  ;;  %v2236_v16 = vadd.f32 1.0, %v8839_v10  ;;  %v4506_v17 = vrot.slane %v4492_v5, %v10000_v46  ;;  %8854 = vpow2.f32 %v2133_v6  ;;  %v2530_v18 = vrot.slane %v10013_v62, %v9988_v36 }
 0x34c   : > { %v10093_v26 = vpop.eup %8842  ;;  %8856 = vrcp.f32 %v2235_v37  ;;  %v2241_v27 = vadd.f32 1.0, %v8841_v14  ;;  %v2534_v29 = vrot.slane %v10013_v62, %v9991_v40  ;;  %v2538_v30 = vrot.slane %v10013_v62, %v9994_v41 }
 0x34d   : > { %v10099_v33 = vpop.eup %8844  ;;  %8858 = vrcp.f32 %v2236_v16  ;;  %v4507_v34 = vcombine.low %v4499_v12, %v4506_v17  ;;  %v4606_v35 = vcombine.low %v2510_v59, %v2514_v2  ;;  %v4607_v38 = vcombine.low %v2518_v8, %v2522_v9  ;;  %v1843_v17 = vpop.xlane.xlu0 %1842 }
 0x34e   : > { %v8847_v39 = vpop.eup %8846  ;;  %8860 = vrcp.f32 %v2241_v27  ;;  %v4608_v42 = vcombine.low %v2526_v13, %v2530_v18  ;;  %v4609_v43 = vcombine.low %v2534_v29, %v2538_v30  ;;  %v1989_v44 = vadd.f32 %v9953_v24, %v1849_v20  ;;  %v1846_v30 = vpop.xlane.xlu1 %1845 }
 0x34f   : > { %v2242_v45 = vadd.f32 1.0, %v8847_v39  ;;  %7596 = vperm.xlu0 %8735, %v4507_v34   ;;  %v4616_v49 = vrot.slane %v4606_v35, %v10000_v46  ;;  %v4623_v50 = vrot.slane %v4607_v38, %v10000_v46  ;;  %v1990_v62 = vadd.f32 %v9953_v24, %v1852_v32 }
 0x350   : > { %v4630_v52 = vrot.slane %v4608_v42, %v10000_v46  ;;  %v4637_v47 = vrot.slane %v4609_v43, %v10000_v46  ;;  %v2053_v53 = vsub.f32 0.0, %v1989_v44  ;;  %v2446_v54 = vrot.slane %v10018_v4, %v9969_v7 }
 0x351   : > { %v10109_v56 = vpop.eup %8848  ;;  %8862 = vrcp.f32 %v2242_v45  ;;  %v4638_v57 = vcombine.low %v4616_v49, %v4623_v50  ;;  %v2054_v59 = vsub.f32 0.0, %v1990_v62  ;;  %v2450_v63 = vrot.slane %v10018_v4, %v9974_v11 }
 0x352   : > { %v10113_v0 = vpop.eup %8850  ;;  %v4639_v2 = vcombine.low %v4630_v52, %v4637_v47  ;;  %v2143_v3 = vmul.f32 1.442695, %v2053_v53  ;;  %v2454_v5 = vrot.slane %v10018_v4, %v9977_v19  ;;  %v2458_v6 = vrot.slane %v10018_v4, %v9980_v23 }
 0x353   : > { %v4646_v8 = vrot.slane %v4638_v57, %v10000_v46  ;;  %v2145_v9 = vmul.f32 1.442695, %v2054_v59  ;;  %v2462_v10 = vrot.slane %v10018_v4, %v9983_v25  ;;  %v2466_v37 = vrot.slane %v10018_v4, %v9988_v36 }
 0x354   : > { %v8853_v12 = vpop.eup %8852  ;;  %v4653_v13 = vrot.slane %v4639_v2, %v10000_v46  ;;  %8864 = vpow2.f32 %v2143_v3  ;;  %v2470_v14 = vrot.slane %v10018_v4, %v9991_v40  ;;  %v2474_v16 = vrot.slane %v10018_v4, %v9994_v41 }
 0x355   : > { %v8855_v18 = vpop.eup %8854  ;;  %v2239_v20 = vadd.f32 1.0, %v8853_v12  ;;  %8866 = vpow2.f32 %v2145_v9  ;;  %v4508_v27 = vcombine.low %v2446_v54, %v2450_v63  ;;  %v4509_v29 = vcombine.low %v2454_v5, %v2458_v6 }
 0x356   : > { %v10129_v32 = vpop.eup %8856  ;;  %v2240_v34 = vadd.f32 1.0, %v8855_v18  ;;  %v4654_v35 = vcombine.low %v4646_v8, %v4653_v13  ;;  %v4510_v38 = vcombine.low %v2462_v10, %v2466_v37  ;;  %v4511_v39 = vcombine.low %v2470_v14, %v2474_v16  ;;  %v1861_v10 = vpop.xlane.xlu0 %1860 }
 0x357   : > { %v10131_v42 = vpop.eup %8858  ;;  %8868 = vrcp.f32 %v2239_v20  ;;  %v4518_v43 = vrot.slane %v4508_v27, %v10000_v46  ;;  %v4525_v4 = vrot.slane %v4509_v29, %v10000_v46  ;;  %v1987_v44 = vadd.f32 %v9953_v24, %v1843_v17  ;;  %v1864_v20 = vpop.xlane.xlu1 %1863 }
 0x358   : > { %v10136_v45 = vpop.eup %8860  ;;  %8870 = vrcp.f32 %v2240_v34  ;;  %7605 = vperm.xlu1 %8734, %v4654_v35   ;;  %v4532_v49 = vrot.slane %v4510_v38, %v10000_v46  ;;  %v4539_v50 = vrot.slane %v4511_v39, %v10000_v46  ;;  %v1988_v62 = vadd.f32 %v9953_v24, %v1846_v30 }
 0x359   : > { %v4540_v52 = vcombine.low %v4518_v43, %v4525_v4  ;;  %v2051_v47 = vsub.f32 0.0, %v1987_v44  ;;  %v2606_v53 = vrot.slane %v10028_v28, %v9969_v7  ;;  %v2610_v54 = vrot.slane %v10028_v28, %v9974_v11 }
 0x35a   : > { %v4541_v57 = vcombine.low %v4532_v49, %v4539_v50  ;;  %v2052_v59 = vsub.f32 0.0, %v1988_v62  ;;  %v2614_v63 = vrot.slane %v10028_v28, %v9977_v19  ;;  %v2618_v2 = vrot.slane %v10028_v28, %v9980_v23 }
 0x35b   : > { %v10149_v3 = vpop.eup %8862  ;;  %v4548_v5 = vrot.slane %v4540_v52, %v10000_v46  ;;  %v2139_v6 = vmul.f32 1.442695, %v2051_v47  ;;  %v2622_v8 = vrot.slane %v10028_v28, %v9983_v25  ;;  %v2626_v9 = vrot.slane %v10028_v28, %v9988_v36 }
 0x35c   : > { %v4555_v37 = vrot.slane %v4541_v57, %v10000_v46  ;;  %v2141_v12 = vmul.f32 1.442695, %v2052_v59  ;;  %v2630_v13 = vrot.slane %v10028_v28, %v9991_v40  ;;  %v2634_v14 = vrot.slane %v10028_v28, %v9994_v41 }
 0x35d   : > { %8872 = vpow2.f32 %v2139_v6  ;;  %v4753_v16 = vcombine.low %v2606_v53, %v2610_v54  ;;  %v4754_v17 = vcombine.low %v2614_v63, %v2618_v2  ;;  %v4755_v18 = vcombine.low %v2622_v8, %v2626_v9 }
 0x35e   : > { %v8865_v27 = vpop.eup %8864  ;;  %v4556_v29 = vcombine.low %v4548_v5, %v4555_v37  ;;  %8874 = vpow2.f32 %v2141_v12  ;;  %v4756_v30 = vcombine.low %v2630_v13, %v2634_v14  ;;  %v1993_v34 = vadd.f32 %v9953_v24, %v1861_v10 }
 0x35f   : > { %v8867_v35 = vpop.eup %8866  ;;  %v2245_v38 = vadd.f32 1.0, %v8865_v27  ;;  %v4763_v39 = vrot.slane %v4753_v16, %v10000_v46  ;;  %v4770_v43 = vrot.slane %v4754_v17, %v10000_v46  ;;  %v4777_v4 = vrot.slane %v4755_v18, %v10000_v46 }
 0x360   : > { %v2246_v28 = vadd.f32 1.0, %v8867_v35  ;;  %7599 = vperm.xlu1 %8734, %v4556_v29   ;;  %v4784_v44 = vrot.slane %v4756_v30, %v10000_v46  ;;  %v2057_v49 = vsub.f32 0.0, %v1993_v34  ;;  %v1994_v50 = vadd.f32 %v9953_v24, %v1864_v20 }
 0x361   : > { %v10167_v62 = vpop.eup %8868  ;;  %8876 = vrcp.f32 %v2245_v38  ;;  %v4785_v52 = vcombine.low %v4763_v39, %v4770_v43  ;;  %v2542_v47 = vrot.slane %v10037_v60, %v9969_v7  ;;  %v2546_v53 = vrot.slane %v10037_v60, %v9974_v11 }
 0x362   : > { %v10173_v54 = vpop.eup %8870  ;;  %8878 = vrcp.f32 %v2246_v28  ;;  %v4786_v57 = vcombine.low %v4777_v4, %v4784_v44  ;;  %v2151_v59 = vmul.f32 1.442695, %v2057_v49  ;;  %v2058_v63 = vsub.f32 0.0, %v1994_v50 }
 0x363   : > { %v4793_v2 = vrot.slane %v4785_v52, %v10000_v46  ;;  %v2550_v5 = vrot.slane %v10037_v60, %v9977_v19  ;;  %v2554_v6 = vrot.slane %v10037_v60, %v9980_v23  ;;  %v2558_v8 = vrot.slane %v10037_v60, %v9983_v25  ;;  %v1855_v52 = vpop.xlane.xlu0 %1854 }
 0x364   : > { %v4800_v9 = vrot.slane %v4786_v57, %v10000_v46  ;;  %8880 = vpow2.f32 %v2151_v59  ;;  %v2153_v10 = vmul.f32 1.442695, %v2058_v63  ;;  %v2562_v37 = vrot.slane %v10037_v60, %v9988_v36  ;;  %v1858_v59 = vpop.xlane.xlu1 %1857 }
 0x365   : > { %v2566_v12 = vrot.slane %v10037_v60, %v9991_v40  ;;  %v2570_v13 = vrot.slane %v10037_v60, %v9994_v41  ;;  %v4655_v14 = vcombine.low %v2542_v47, %v2546_v53  ;;  %v4656_v16 = vcombine.low %v2550_v5, %v2554_v6 }
 0x366   : > { %v4801_v17 = vcombine.low %v4793_v2, %v4800_v9  ;;  %8882 = vpow2.f32 %v2153_v10  ;;  %v4657_v18 = vcombine.low %v2558_v8, %v2562_v37  ;;  %v2766_v20 = vrot.slane %v10055_v22, %v9969_v7 }
 0x367   : > { %v8873_v27 = vpop.eup %8872  ;;  %v4658_v29 = vcombine.low %v2566_v12, %v2570_v13  ;;  %v4665_v30 = vrot.slane %v4655_v14, %v10000_v46  ;;  %v4672_v34 = vrot.slane %v4656_v16, %v10000_v46  ;;  %v2770_v35 = vrot.slane %v10055_v22, %v9974_v11 }
 0x368   : > { %v8875_v38 = vpop.eup %8874  ;;  %v2243_v39 = vadd.f32 1.0, %v8873_v27  ;;  %7614 = vperm.xlu1 %8734, %v4801_v17   ;;  %v4679_v60 = vrot.slane %v4657_v18, %v10000_v46  ;;  %v2774_v43 = vrot.slane %v10055_v22, %v9977_v19  ;;  %v2778_v4 = vrot.slane %v10055_v22, %v9980_v23 }
 0x369   : > { %v2244_v28 = vadd.f32 1.0, %v8875_v38  ;;  %v4686_v44 = vrot.slane %v4658_v29, %v10000_v46  ;;  %v4687_v49 = vcombine.low %v4665_v30, %v4672_v34  ;;  %v2782_v50 = vrot.slane %v10055_v22, %v9983_v25 }
 0x36a   : > { %8884 = vrcp.f32 %v2243_v39  ;;  %v2786_v47 = vrot.slane %v10055_v22, %v9988_v36  ;;  %v2790_v53 = vrot.slane %v10055_v22, %v9991_v40  ;;  %v2794_v57 = vrot.slane %v10055_v22, %v9994_v41 }
 0x36b   : > { %v10209_v63 = vpop.eup %8876  ;;  %8886 = vrcp.f32 %v2244_v28  ;;  %v4688_v2 = vcombine.low %v4679_v60, %v4686_v44  ;;  %v4695_v5 = vrot.slane %v4687_v49, %v10000_v46  ;;  %v4998_v6 = vcombine.low %v2766_v20, %v2770_v35 }
 0x36c   : > { %v10212_v8 = vpop.eup %8878  ;;  %v4999_v9 = vcombine.low %v2774_v43, %v2778_v4  ;;  %v5000_v10 = vcombine.low %v2782_v50, %v2786_v47  ;;  %v5001_v37 = vcombine.low %v2790_v53, %v2794_v57  ;;  %v1991_v12 = vadd.f32 %v9953_v24, %v1855_v52 }
 0x36d   : > { %v4702_v13 = vrot.slane %v4688_v2, %v10000_v46  ;;  %v5008_v14 = vrot.slane %v4998_v6, %v10000_v46  ;;  %v1992_v22 = vadd.f32 %v9953_v24, %v1858_v59  ;;  %v2638_v16 = vrot.slane %v10031_v21, %v9969_v7 }
 0x36e   : > { %v8881_v17 = vpop.eup %8880  ;;  %v5015_v18 = vrot.slane %v4999_v9, %v10000_v46  ;;  %v5022_v20 = vrot.slane %v5000_v10, %v10000_v46  ;;  %v5029_v27 = vrot.slane %v5001_v37, %v10000_v46  ;;  %v2055_v29 = vsub.f32 0.0, %v1991_v12 }
 0x36f   : > { %v2249_v30 = vadd.f32 1.0, %v8881_v17  ;;  %v4703_v34 = vcombine.low %v4695_v5, %v4702_v13  ;;  %v2056_v35 = vsub.f32 0.0, %v1992_v22  ;;  %v2642_v38 = vrot.slane %v10031_v21, %v9974_v11 }
 0x370   : > { %v8883_v39 = vpop.eup %8882  ;;  %v5030_v60 = vcombine.low %v5008_v14, %v5015_v18  ;;  %v5031_v43 = vcombine.low %v5022_v20, %v5029_v27  ;;  %v2147_v4 = vmul.f32 1.442695, %v2055_v29  ;;  %v2646_v28 = vrot.slane %v10031_v21, %v9977_v19  ;;  %v1873_v20 = vpop.xlane.xlu0 %1872 }
 0x371   : > { %8888 = vrcp.f32 %v2249_v30  ;;  %v2250_v44 = vadd.f32 1.0, %v8883_v39  ;;  %7608 = vperm.xlu1 %8734, %v4703_v34   ;;  %v2149_v49 = vmul.f32 1.442695, %v2056_v35  ;;  %v2650_v50 = vrot.slane %v10031_v21, %v9980_v23  ;;  %v1876_v35 = vpop.xlane.xlu1 %1875 }
 0x372   : > { %v5038_v52 = vrot.slane %v5030_v60, %v10000_v46  ;;  %v5045_v47 = vrot.slane %v5031_v43, %v10000_v46  ;;  %8890 = vpow2.f32 %v2147_v4  ;;  %v2654_v53 = vrot.slane %v10031_v21, %v9983_v25 }
 0x373   : > { %8892 = vrcp.f32 %v2250_v44  ;;  %v2658_v57 = vrot.slane %v10031_v21, %v9988_v36  ;;  %v2662_v59 = vrot.slane %v10031_v21, %v9991_v40  ;;  %v2666_v2 = vrot.slane %v10031_v21, %v9994_v41 }
 0x374   : > { %v10239_v5 = vpop.eup %8884  ;;  %v5046_v6 = vcombine.low %v5038_v52, %v5045_v47  ;;  %8894 = vpow2.f32 %v2149_v49  ;;  %v4802_v9 = vcombine.low %v2638_v16, %v2642_v38  ;;  %v4803_v10 = vcombine.low %v2646_v28, %v2650_v50 }
 0x375   : > { %v10241_v37 = vpop.eup %8886  ;;  %v4804_v12 = vcombine.low %v2654_v53, %v2658_v57  ;;  %v4805_v13 = vcombine.low %v2662_v59, %v2666_v2  ;;  %v2702_v14 = vrot.slane %v10070_v51, %v9969_v7  ;;  %v2706_v22 = vrot.slane %v10070_v51, %v9974_v11 }
 0x376   : > { %7629 = vperm.xlu0 %8735, %v5046_v6   ;;  %v4812_v17 = vrot.slane %v4802_v9, %v10000_v46  ;;  %v4819_v21 = vrot.slane %v4803_v10, %v10000_v46  ;;  %v2710_v18 = vrot.slane %v10070_v51, %v9977_v19  ;;  %v2714_v16 = vrot.slane %v10070_v51, %v9980_v23 }
 0x377   : > { %v4826_v27 = vrot.slane %v4804_v12, %v10000_v46  ;;  %v4833_v29 = vrot.slane %v4805_v13, %v10000_v46  ;;  %v2718_v30 = vrot.slane %v10070_v51, %v9983_v25  ;;  %v2722_v34 = vrot.slane %v10070_v51, %v9988_v36 }
 0x378   : > { %v4834_v38 = vcombine.low %v4812_v17, %v4819_v21  ;;  %v2726_v39 = vrot.slane %v10070_v51, %v9991_v40  ;;  %v2730_v60 = vrot.slane %v10070_v51, %v9994_v41  ;;  %v4900_v43 = vcombine.low %v2702_v14, %v2706_v22 }
 0x379   : > { %v4835_v4 = vcombine.low %v4826_v27, %v4833_v29  ;;  %v4901_v28 = vcombine.low %v2710_v18, %v2714_v16  ;;  %v4902_v44 = vcombine.low %v2718_v30, %v2722_v34  ;;  %v1997_v49 = vadd.f32 %v9953_v24, %v1873_v20 }
 0x37a   : > { %v4842_v50 = vrot.slane %v4834_v38, %v10000_v46  ;;  %v4903_v52 = vcombine.low %v2726_v39, %v2730_v60  ;;  %v4910_v47 = vrot.slane %v4900_v43, %v10000_v46  ;;  %v1998_v53 = vadd.f32 %v9953_v24, %v1876_v35 }
 0x37b   : > { %v10267_v57 = vpop.eup %8888  ;;  %v4849_v59 = vrot.slane %v4835_v4, %v10000_v46  ;;  %v4917_v2 = vrot.slane %v4901_v28, %v10000_v46  ;;  %v4924_v51 = vrot.slane %v4902_v44, %v10000_v46  ;;  %v2061_v6 = vsub.f32 0.0, %v1997_v49 }
 0x37c   : > { %v8891_v9 = vpop.eup %8890  ;;  %v4931_v10 = vrot.slane %v4903_v52, %v10000_v46  ;;  %v2062_v12 = vsub.f32 0.0, %v1998_v53  ;;  %v2574_v13 = vrot.slane %v10041_v1, %v9969_v7  ;;  %v2578_v14 = vrot.slane %v10041_v1, %v9974_v11 }
 0x37d   : > { %v10277_v22 = vpop.eup %8892  ;;  %v2247_v17 = vadd.f32 1.0, %v8891_v9  ;;  %v4850_v21 = vcombine.low %v4842_v50, %v4849_v59  ;;  %v4932_v18 = vcombine.low %v4910_v47, %v4917_v2  ;;  %v2159_v16 = vmul.f32 1.442695, %v2061_v6  ;;  %v1867_v6 = vpop.xlane.xlu0 %1866 }
 0x37e   : > { %v8895_v20 = vpop.eup %8894  ;;  %v4933_v27 = vcombine.low %v4924_v51, %v4931_v10  ;;  %v2161_v29 = vmul.f32 1.442695, %v2062_v12  ;;  %v2582_v30 = vrot.slane %v10041_v1, %v9977_v19  ;;  %v2586_v34 = vrot.slane %v10041_v1, %v9980_v23 }
 0x37f   : > { %8896 = vrcp.f32 %v2247_v17  ;;  %v2248_v35 = vadd.f32 1.0, %v8895_v20  ;;  %7617 = vperm.xlu1 %8734, %v4850_v21   ;;  %v4940_v38 = vrot.slane %v4932_v18, %v10000_v46  ;;  %v2590_v39 = vrot.slane %v10041_v1, %v9983_v25 }
 0x380   : > { %v4947_v60 = vrot.slane %v4933_v27, %v10000_v46  ;;  %8898 = vpow2.f32 %v2159_v16  ;;  %v2594_v43 = vrot.slane %v10041_v1, %v9988_v36  ;;  %v2598_v4 = vrot.slane %v10041_v1, %v9991_v40 }
 0x381   : > { %8900 = vrcp.f32 %v2248_v35  ;;  %v2602_v28 = vrot.slane %v10041_v1, %v9994_v41  ;;  %v4704_v44 = vcombine.low %v2574_v13, %v2578_v14  ;;  %v4705_v49 = vcombine.low %v2582_v30, %v2586_v34  ;;  %v1870_v13 = vpop.xlane.xlu1 %1869 }
 0x382   : > { %v4948_v50 = vcombine.low %v4940_v38, %v4947_v60  ;;  %8902 = vpow2.f32 %v2161_v29  ;;  %v4706_v52 = vcombine.low %v2590_v39, %v2594_v43  ;;  %v2894_v47 = vrot.slane %v10079_v61, %v9969_v7 }
 0x383   : > { %v4707_v53 = vcombine.low %v2598_v4, %v2602_v28  ;;  %v4714_v59 = vrot.slane %v4704_v44, %v10000_v46  ;;  %v4721_v2 = vrot.slane %v4705_v49, %v10000_v46  ;;  %v2898_v51 = vrot.slane %v10079_v61, %v9974_v11 }
 0x384   : > { %7623 = vperm.xlu0 %8735, %v4948_v50   ;;  %v4728_v1 = vrot.slane %v4706_v52, %v10000_v46  ;;  %v2902_v9 = vrot.slane %v10079_v61, %v9977_v19  ;;  %v2906_v10 = vrot.slane %v10079_v61, %v9980_v23  ;;  %v2910_v12 = vrot.slane %v10079_v61, %v9983_v25 }
 0x385   : > { %v4735_v14 = vrot.slane %v4707_v53, %v10000_v46  ;;  %v4736_v17 = vcombine.low %v4714_v59, %v4721_v2  ;;  %v2914_v21 = vrot.slane %v10079_v61, %v9988_v36  ;;  %v2918_v18 = vrot.slane %v10079_v61, %v9991_v40 }
 0x386   : > { %v2922_v16 = vrot.slane %v10079_v61, %v9994_v41  ;;  %v5194_v20 = vcombine.low %v2894_v47, %v2898_v51  ;;  %v5195_v27 = vcombine.low %v2902_v9, %v2906_v10  ;;  %v1995_v29 = vadd.f32 %v9953_v24, %v1867_v6 }
 0x387   : > { %v4737_v30 = vcombine.low %v4728_v1, %v4735_v14  ;;  %v4744_v34 = vrot.slane %v4736_v17, %v10000_v46  ;;  %v5196_v35 = vcombine.low %v2910_v12, %v2914_v21  ;;  %v1996_v38 = vadd.f32 %v9953_v24, %v1870_v13 }
 0x388   : > { %v5197_v39 = vcombine.low %v2918_v18, %v2922_v16  ;;  %v5204_v60 = vrot.slane %v5194_v20, %v10000_v46  ;;  %v5211_v43 = vrot.slane %v5195_v27, %v10000_v46  ;;  %v2059_v4 = vsub.f32 0.0, %v1995_v29 }
 0x389   : > { %v10318_v28 = vpop.eup %8896  ;;  %v4751_v61 = vrot.slane %v4737_v30, %v10000_v46  ;;  %v5218_v44 = vrot.slane %v5196_v35, %v10000_v46  ;;  %v2060_v49 = vsub.f32 0.0, %v1996_v38  ;;  %v2734_v50 = vrot.slane %v10050_v15, %v9969_v7 }
 0x38a   : > { %v8899_v52 = vpop.eup %8898  ;;  %v5225_v47 = vrot.slane %v5197_v39, %v10000_v46  ;;  %v5226_v53 = vcombine.low %v5204_v60, %v5211_v43  ;;  %v2155_v59 = vmul.f32 1.442695, %v2059_v4  ;;  %v2738_v2 = vrot.slane %v10050_v15, %v9974_v11 }
 0x38b   : > { %v10327_v51 = vpop.eup %8900  ;;  %v2253_v6 = vadd.f32 1.0, %v8899_v52  ;;  %v4752_v1 = vcombine.low %v4744_v34, %v4751_v61  ;;  %v2157_v9 = vmul.f32 1.442695, %v2060_v49  ;;  %v2742_v10 = vrot.slane %v10050_v15, %v9977_v19  ;;  %v1885_v49 = vpop.xlane.xlu0 %1884 }
 0x38c   : > { %v8903_v12 = vpop.eup %8902  ;;  %v5227_v13 = vcombine.low %v5218_v44, %v5225_v47  ;;  %v5234_v14 = vrot.slane %v5226_v53, %v10000_v46  ;;  %8904 = vpow2.f32 %v2155_v59  ;;  %v2746_v17 = vrot.slane %v10050_v15, %v9980_v23  ;;  %v1888_v59 = vpop.xlane.xlu1 %1887 }
 0x38d   : > { %8906 = vrcp.f32 %v2253_v6  ;;  %v2254_v21 = vadd.f32 1.0, %v8903_v12  ;;  %7611 = vperm.xlu1 %8734, %v4752_v1   ;;  %v2750_v18 = vrot.slane %v10050_v15, %v9983_v25  ;;  %v2754_v16 = vrot.slane %v10050_v15, %v9988_v36 }
 0x38e   : > { %v5241_v20 = vrot.slane %v5227_v13, %v10000_v46  ;;  %8908 = vpow2.f32 %v2157_v9  ;;  %v2758_v27 = vrot.slane %v10050_v15, %v9991_v40  ;;  %v2762_v29 = vrot.slane %v10050_v15, %v9994_v41 }
 0x38f   : > { %8910 = vrcp.f32 %v2254_v21  ;;  %v4949_v30 = vcombine.low %v2734_v50, %v2738_v2  ;;  %v4950_v34 = vcombine.low %v2742_v10, %v2746_v17  ;;  %v4951_v35 = vcombine.low %v2750_v18, %v2754_v16 }
 0x390   : > { %v5242_v38 = vcombine.low %v5234_v14, %v5241_v20  ;;  %v4952_v39 = vcombine.low %v2758_v27, %v2762_v29  ;;  %v2830_v60 = vrot.slane %v10099_v33, %v9969_v7  ;;  %v2834_v43 = vrot.slane %v10099_v33, %v9974_v11 }
 0x391   : > { %v4959_v4 = vrot.slane %v4949_v30, %v10000_v46  ;;  %v4966_v61 = vrot.slane %v4950_v34, %v10000_v46  ;;  %v4973_v44 = vrot.slane %v4951_v35, %v10000_v46  ;;  %v2838_v15 = vrot.slane %v10099_v33, %v9977_v19 }
 0x392   : > { %7641 = vperm.xlu0 %8735, %v5242_v38   ;;  %v4980_v50 = vrot.slane %v4952_v39, %v10000_v46  ;;  %v2842_v52 = vrot.slane %v10099_v33, %v9980_v23  ;;  %v2846_v47 = vrot.slane %v10099_v33, %v9983_v25  ;;  %v2850_v53 = vrot.slane %v10099_v33, %v9988_v36 }
 0x393   : > { %v4981_v2 = vcombine.low %v4959_v4, %v4966_v61  ;;  %v2854_v6 = vrot.slane %v10099_v33, %v9991_v40  ;;  %v2858_v1 = vrot.slane %v10099_v33, %v9994_v41  ;;  %v5096_v9 = vcombine.low %v2830_v60, %v2834_v43 }
 0x394   : > { %v4982_v10 = vcombine.low %v4973_v44, %v4980_v50  ;;  %v5097_v12 = vcombine.low %v2838_v15, %v2842_v52  ;;  %v5098_v13 = vcombine.low %v2846_v47, %v2850_v53  ;;  %v2001_v14 = vadd.f32 %v9953_v24, %v1885_v49 }
 0x395   : > { %v4989_v17 = vrot.slane %v4981_v2, %v10000_v46  ;;  %v5099_v21 = vcombine.low %v2854_v6, %v2858_v1  ;;  %v5106_v18 = vrot.slane %v5096_v9, %v10000_v46  ;;  %v2002_v16 = vadd.f32 %v9953_v24, %v1888_v59 }
 0x396   : > { %v8905_v20 = vpop.eup %8904  ;;  %v4996_v27 = vrot.slane %v4982_v10, %v10000_v46  ;;  %v5113_v29 = vrot.slane %v5097_v12, %v10000_v46  ;;  %v5120_v33 = vrot.slane %v5098_v13, %v10000_v46  ;;  %v2065_v30 = vsub.f32 0.0, %v2001_v14 }
 0x397   : > { %v10370_v34 = vpop.eup %8906  ;;  %v2251_v35 = vadd.f32 1.0, %v8905_v20  ;;  %v5127_v38 = vrot.slane %v5099_v21, %v10000_v46  ;;  %v2066_v39 = vsub.f32 0.0, %v2002_v16  ;;  %v2670_v60 = vrot.slane %v10063_v31, %v9969_v7 }
 0x398   : > { %v8909_v43 = vpop.eup %8908  ;;  %v4997_v4 = vcombine.low %v4989_v17, %v4996_v27  ;;  %v5128_v61 = vcombine.low %v5106_v18, %v5113_v29  ;;  %v2167_v44 = vmul.f32 1.442695, %v2065_v30  ;;  %v2674_v15 = vrot.slane %v10063_v31, %v9974_v11 }
 0x399   : > { %v10377_v49 = vpop.eup %8910  ;;  %8912 = vrcp.f32 %v2251_v35  ;;  %v2252_v50 = vadd.f32 1.0, %v8909_v43  ;;  %v5129_v52 = vcombine.low %v5120_v33, %v5127_v38  ;;  %v2169_v47 = vmul.f32 1.442695, %v2066_v39  ;;  %v1879_v33 = vpop.xlane.xlu0 %1878 }
 0x39a   : > { %7626 = vperm.xlu1 %8734, %v4997_v4   ;;  %v5136_v53 = vrot.slane %v5128_v61, %v10000_v46  ;;  %8914 = vpow2.f32 %v2167_v44  ;;  %v2678_v59 = vrot.slane %v10063_v31, %v9977_v19  ;;  %v2682_v2 = vrot.slane %v10063_v31, %v9980_v23  ;;  %v1882_v39 = vpop.xlane.xlu1 %1881 }
 0x39b   : > { %8916 = vrcp.f32 %v2252_v50  ;;  %v5143_v6 = vrot.slane %v5129_v52, %v10000_v46  ;;  %v2686_v1 = vrot.slane %v10063_v31, %v9983_v25  ;;  %v2690_v9 = vrot.slane %v10063_v31, %v9988_v36 }
 0x39c   : > { %8918 = vpow2.f32 %v2169_v47  ;;  %v2694_v10 = vrot.slane %v10063_v31, %v9991_v40  ;;  %v2698_v12 = vrot.slane %v10063_v31, %v9994_v41  ;;  %v4851_v13 = vcombine.low %v2670_v60, %v2674_v15 }
 0x39d   : > { %v5144_v14 = vcombine.low %v5136_v53, %v5143_v6  ;;  %v4852_v17 = vcombine.low %v2678_v59, %v2682_v2  ;;  %v4853_v21 = vcombine.low %v2686_v1, %v2690_v9  ;;  %v3022_v18 = vrot.slane %v10113_v0, %v9969_v7 }
 0x39e   : > { %v4854_v16 = vcombine.low %v2694_v10, %v2698_v12  ;;  %v4861_v20 = vrot.slane %v4851_v13, %v10000_v46  ;;  %v3026_v27 = vrot.slane %v10113_v0, %v9974_v11  ;;  %v3030_v29 = vrot.slane %v10113_v0, %v9977_v19 }
 0x39f   : > { %7635 = vperm.xlu0 %8735, %v5144_v14   ;;  %v4868_v31 = vrot.slane %v4852_v17, %v10000_v46  ;;  %v4875_v30 = vrot.slane %v4853_v21, %v10000_v46  ;;  %v3034_v35 = vrot.slane %v10113_v0, %v9980_v23  ;;  %v3038_v38 = vrot.slane %v10113_v0, %v9983_v25 }
 0x3a0   : > { %v4882_v60 = vrot.slane %v4854_v16, %v10000_v46  ;;  %v3042_v43 = vrot.slane %v10113_v0, %v9988_v36  ;;  %v3046_v4 = vrot.slane %v10113_v0, %v9991_v40  ;;  %v3050_v61 = vrot.slane %v10113_v0, %v9994_v41 }
 0x3a1   : > { %v4883_v44 = vcombine.low %v4861_v20, %v4868_v31  ;;  %v5390_v15 = vcombine.low %v3022_v18, %v3026_v27  ;;  %v5391_v50 = vcombine.low %v3030_v29, %v3034_v35  ;;  %v1999_v52 = vadd.f32 %v9953_v24, %v1879_v33 }
 0x3a2   : > { %v4884_v47 = vcombine.low %v4875_v30, %v4882_v60  ;;  %v5392_v53 = vcombine.low %v3038_v38, %v3042_v43  ;;  %v5393_v59 = vcombine.low %v3046_v4, %v3050_v61  ;;  %v2000_v2 = vadd.f32 %v9953_v24, %v1882_v39 }
 0x3a3   : > { %v10415_v6 = vpop.eup %8912  ;;  %v4891_v1 = vrot.slane %v4883_v44, %v10000_v46  ;;  %v5400_v9 = vrot.slane %v5390_v15, %v10000_v46  ;;  %v5407_v10 = vrot.slane %v5391_v50, %v10000_v46  ;;  %v2063_v12 = vsub.f32 0.0, %v1999_v52 }
 0x3a4   : > { %v8915_v0 = vpop.eup %8914  ;;  %v4898_v13 = vrot.slane %v4884_v47, %v10000_v46  ;;  %v5414_v14 = vrot.slane %v5392_v53, %v10000_v46  ;;  %v5421_v17 = vrot.slane %v5393_v59, %v10000_v46  ;;  %v2064_v21 = vsub.f32 0.0, %v2000_v2 }
 0x3a5   : > { %v10423_v18 = vpop.eup %8916  ;;  %v2257_v16 = vadd.f32 1.0, %v8915_v0  ;;  %v5422_v20 = vcombine.low %v5400_v9, %v5407_v10  ;;  %v2163_v27 = vmul.f32 1.442695, %v2063_v12  ;;  %v2862_v29 = vrot.slane %v10074_v55, %v9969_v7 }
 0x3a6   : > { %v8919_v33 = vpop.eup %8918  ;;  %v4899_v31 = vcombine.low %v4891_v1, %v4898_v13  ;;  %v5423_v30 = vcombine.low %v5414_v14, %v5421_v17  ;;  %v2165_v35 = vmul.f32 1.442695, %v2064_v21  ;;  %v2866_v38 = vrot.slane %v10074_v55, %v9974_v11  ;;  %v1897_v14 = vpop.xlane.xlu0 %1896 }
 0x3a7   : > { %8920 = vrcp.f32 %v2257_v16  ;;  %v2258_v39 = vadd.f32 1.0, %v8919_v33  ;;  %v5430_v60 = vrot.slane %v5422_v20, %v10000_v46  ;;  %v2870_v43 = vrot.slane %v10074_v55, %v9977_v19 }
 0x3a8   : > { %7620 = vperm.xlu1 %8734, %v4899_v31   ;;  %v5437_v4 = vrot.slane %v5423_v30, %v10000_v46  ;;  %8922 = vpow2.f32 %v2163_v27  ;;  %v2874_v61 = vrot.slane %v10074_v55, %v9980_v23  ;;  %v2878_v44 = vrot.slane %v10074_v55, %v9983_v25  ;;  %v1900_v27 = vpop.xlane.xlu1 %1899 }
 0x3a9   : > { %8924 = vrcp.f32 %v2258_v39  ;;  %v2882_v15 = vrot.slane %v10074_v55, %v9988_v36  ;;  %v2886_v50 = vrot.slane %v10074_v55, %v9991_v40  ;;  %v2890_v52 = vrot.slane %v10074_v55, %v9994_v41 }
 0x3aa   : > { %v5438_v47 = vcombine.low %v5430_v60, %v5437_v4  ;;  %8926 = vpow2.f32 %v2165_v35  ;;  %v5145_v53 = vcombine.low %v2862_v29, %v2866_v38  ;;  %v5146_v59 = vcombine.low %v2870_v43, %v2874_v61 }
 0x3ab   : > { %v5147_v2 = vcombine.low %v2878_v44, %v2882_v15  ;;  %v5148_v1 = vcombine.low %v2886_v50, %v2890_v52  ;;  %v2958_v9 = vrot.slane %v10131_v42, %v9969_v7  ;;  %v2962_v10 = vrot.slane %v10131_v42, %v9974_v11 }
 0x3ac   : > { %7653 = vperm.xlu0 %8735, %v5438_v47   ;;  %v5155_v12 = vrot.slane %v5145_v53, %v10000_v46  ;;  %v5162_v0 = vrot.slane %v5146_v59, %v10000_v46  ;;  %v2966_v55 = vrot.slane %v10131_v42, %v9977_v19  ;;  %v2970_v13 = vrot.slane %v10131_v42, %v9980_v23 }
 0x3ad   : > { %v5169_v17 = vrot.slane %v5147_v2, %v10000_v46  ;;  %v5176_v21 = vrot.slane %v5148_v1, %v10000_v46  ;;  %v2974_v16 = vrot.slane %v10131_v42, %v9983_v25  ;;  %v2978_v20 = vrot.slane %v10131_v42, %v9988_v36 }
 0x3ae   : > { %v5177_v29 = vcombine.low %v5155_v12, %v5162_v0  ;;  %v2982_v33 = vrot.slane %v10131_v42, %v9991_v40  ;;  %v2986_v31 = vrot.slane %v10131_v42, %v9994_v41  ;;  %v5292_v30 = vcombine.low %v2958_v9, %v2962_v10 }
 0x3af   : > { %v5178_v35 = vcombine.low %v5169_v17, %v5176_v21  ;;  %v5293_v38 = vcombine.low %v2966_v55, %v2970_v13  ;;  %v5294_v39 = vcombine.low %v2974_v16, %v2978_v20  ;;  %v2005_v60 = vadd.f32 %v9953_v24, %v1897_v14 }
 0x3b0   : > { %v5185_v43 = vrot.slane %v5177_v29, %v10000_v46  ;;  %v5295_v4 = vcombine.low %v2982_v33, %v2986_v31  ;;  %v5302_v61 = vrot.slane %v5292_v30, %v10000_v46  ;;  %v2006_v44 = vadd.f32 %v9953_v24, %v1900_v27 }
 0x3b1   : > { %v10467_v15 = vpop.eup %8920  ;;  %v5192_v50 = vrot.slane %v5178_v35, %v10000_v46  ;;  %v5309_v52 = vrot.slane %v5293_v38, %v10000_v46  ;;  %v5316_v42 = vrot.slane %v5294_v39, %v10000_v46  ;;  %v2069_v47 = vsub.f32 0.0, %v2005_v60 }
 0x3b2   : > { %v8923_v53 = vpop.eup %8922  ;;  %v5323_v59 = vrot.slane %v5295_v4, %v10000_v46  ;;  %v2070_v2 = vsub.f32 0.0, %v2006_v44  ;;  %v2798_v1 = vrot.slane %v10093_v26, %v9969_v7  ;;  %v2802_v9 = vrot.slane %v10093_v26, %v9974_v11 }
 0x3b3   : > { %v10477_v10 = vpop.eup %8924  ;;  %v2255_v12 = vadd.f32 1.0, %v8923_v53  ;;  %v5193_v0 = vcombine.low %v5185_v43, %v5192_v50  ;;  %v5324_v55 = vcombine.low %v5302_v61, %v5309_v52  ;;  %v2175_v13 = vmul.f32 1.442695, %v2069_v47  ;;  %v1891_v47 = vpop.xlane.xlu0 %1890 }
 0x3b4   : > { %v8927_v14 = vpop.eup %8926  ;;  %v5325_v17 = vcombine.low %v5316_v42, %v5323_v59  ;;  %v2177_v21 = vmul.f32 1.442695, %v2070_v2  ;;  %v2806_v16 = vrot.slane %v10093_v26, %v9977_v19  ;;  %v2810_v20 = vrot.slane %v10093_v26, %v9980_v23 }
 0x3b5   : > { %8928 = vrcp.f32 %v2255_v12  ;;  %v2256_v27 = vadd.f32 1.0, %v8927_v14  ;;  %7638 = vperm.xlu1 %8734, %v5193_v0   ;;  %v5332_v29 = vrot.slane %v5324_v55, %v10000_v46  ;;  %v2814_v33 = vrot.slane %v10093_v26, %v9983_v25 }
 0x3b6   : > { %v5339_v31 = vrot.slane %v5325_v17, %v10000_v46  ;;  %8930 = vpow2.f32 %v2175_v13  ;;  %v2818_v30 = vrot.slane %v10093_v26, %v9988_v36  ;;  %v2822_v35 = vrot.slane %v10093_v26, %v9991_v40 }
 0x3b7   : > { %8932 = vrcp.f32 %v2256_v27  ;;  %v2826_v38 = vrot.slane %v10093_v26, %v9994_v41  ;;  %v5047_v39 = vcombine.low %v2798_v1, %v2802_v9  ;;  %v5048_v60 = vcombine.low %v2806_v16, %v2810_v20  ;;  %v1894_v1 = vpop.xlane.xlu1 %1893 }
 0x3b8   : > { %v5340_v43 = vcombine.low %v5332_v29, %v5339_v31  ;;  %8934 = vpow2.f32 %v2177_v21  ;;  %v5049_v4 = vcombine.low %v2814_v33, %v2818_v30  ;;  %v3150_v61 = vrot.slane %v10149_v3, %v9969_v7 }
 0x3b9   : > { %v5050_v44 = vcombine.low %v2822_v35, %v2826_v38  ;;  %v5057_v50 = vrot.slane %v5047_v39, %v10000_v46  ;;  %v5064_v52 = vrot.slane %v5048_v60, %v10000_v46  ;;  %v3154_v42 = vrot.slane %v10149_v3, %v9974_v11 }
 0x3ba   : > { %7647 = vperm.xlu0 %8735, %v5340_v43   ;;  %v5071_v26 = vrot.slane %v5049_v4, %v10000_v46  ;;  %v3158_v53 = vrot.slane %v10149_v3, %v9977_v19  ;;  %v3162_v59 = vrot.slane %v10149_v3, %v9980_v23  ;;  %v3166_v2 = vrot.slane %v10149_v3, %v9983_v25 }
 0x3bb   : > { %v5078_v9 = vrot.slane %v5050_v44, %v10000_v46  ;;  %v5079_v12 = vcombine.low %v5057_v50, %v5064_v52  ;;  %v3170_v0 = vrot.slane %v10149_v3, %v9988_v36  ;;  %v3174_v55 = vrot.slane %v10149_v3, %v9991_v40 }
 0x3bc   : > { %v3178_v13 = vrot.slane %v10149_v3, %v9994_v41  ;;  %v5586_v14 = vcombine.low %v3150_v61, %v3154_v42  ;;  %v5587_v17 = vcombine.low %v3158_v53, %v3162_v59  ;;  %v2003_v21 = vadd.f32 %v9953_v24, %v1891_v47 }
 0x3bd   : > { %v5080_v16 = vcombine.low %v5071_v26, %v5078_v9  ;;  %v5087_v20 = vrot.slane %v5079_v12, %v10000_v46  ;;  %v5588_v27 = vcombine.low %v3166_v2, %v3170_v0  ;;  %v2004_v29 = vadd.f32 %v9953_v24, %v1894_v1 }
 0x3be   : > { %v5589_v33 = vcombine.low %v3174_v55, %v3178_v13  ;;  %v5596_v31 = vrot.slane %v5586_v14, %v10000_v46  ;;  %v5603_v30 = vrot.slane %v5587_v17, %v10000_v46  ;;  %v2067_v35 = vsub.f32 0.0, %v2003_v21 }
 0x3bf   : > { %v10518_v38 = vpop.eup %8928  ;;  %v5094_v3 = vrot.slane %v5080_v16, %v10000_v46  ;;  %v5610_v39 = vrot.slane %v5588_v27, %v10000_v46  ;;  %v2068_v60 = vsub.f32 0.0, %v2004_v29  ;;  %v2990_v43 = vrot.slane %v10109_v56, %v9969_v7 }
 0x3c0   : > { %v8931_v4 = vpop.eup %8930  ;;  %v5617_v61 = vrot.slane %v5589_v33, %v10000_v46  ;;  %v5618_v44 = vcombine.low %v5596_v31, %v5603_v30  ;;  %v2171_v50 = vmul.f32 1.442695, %v2067_v35  ;;  %v2994_v52 = vrot.slane %v10109_v56, %v9974_v11 }
 0x3c1   : > { %v10527_v42 = vpop.eup %8932  ;;  %v2261_v47 = vadd.f32 1.0, %v8931_v4  ;;  %v5095_v26 = vcombine.low %v5087_v20, %v5094_v3  ;;  %v2173_v53 = vmul.f32 1.442695, %v2068_v60  ;;  %v2998_v59 = vrot.slane %v10109_v56, %v9977_v19  ;;  %v1909_v60 = vpop.xlane.xlu0 %1908 }
 0x3c2   : > { %v8935_v2 = vpop.eup %8934  ;;  %v5619_v1 = vcombine.low %v5610_v39, %v5617_v61  ;;  %v5626_v9 = vrot.slane %v5618_v44, %v10000_v46  ;;  %8936 = vpow2.f32 %v2171_v50  ;;  %v3002_v12 = vrot.slane %v10109_v56, %v9980_v23  ;;  %v1912_v50 = vpop.xlane.xlu1 %1911 }
 0x3c3   : > { %8938 = vrcp.f32 %v2261_v47  ;;  %v2262_v0 = vadd.f32 1.0, %v8935_v2  ;;  %7632 = vperm.xlu1 %8734, %v5095_v26   ;;  %v3006_v55 = vrot.slane %v10109_v56, %v9983_v25  ;;  %v3010_v13 = vrot.slane %v10109_v56, %v9988_v36 }
 0x3c4   : > { %v5633_v14 = vrot.slane %v5619_v1, %v10000_v46  ;;  %8940 = vpow2.f32 %v2173_v53  ;;  %v3014_v17 = vrot.slane %v10109_v56, %v9991_v40  ;;  %v3018_v21 = vrot.slane %v10109_v56, %v9994_v41 }
 0x3c5   : > { %8942 = vrcp.f32 %v2262_v0  ;;  %v5341_v16 = vcombine.low %v2990_v43, %v2994_v52  ;;  %v5342_v20 = vcombine.low %v2998_v59, %v3002_v12  ;;  %v5343_v27 = vcombine.low %v3006_v55, %v3010_v13 }
 0x3c6   : > { %v5634_v29 = vcombine.low %v5626_v9, %v5633_v14  ;;  %v5344_v33 = vcombine.low %v3014_v17, %v3018_v21  ;;  %v3086_v31 = vrot.slane %v10173_v54, %v9969_v7  ;;  %v3090_v30 = vrot.slane %v10173_v54, %v9974_v11 }
 0x3c7   : > { %v5351_v35 = vrot.slane %v5341_v16, %v10000_v46  ;;  %v5358_v3 = vrot.slane %v5342_v20, %v10000_v46  ;;  %v5365_v39 = vrot.slane %v5343_v27, %v10000_v46  ;;  %v3094_v56 = vrot.slane %v10173_v54, %v9977_v19 }
 0x3c8   : > { %7665 = vperm.xlu0 %8735, %v5634_v29   ;;  %v5372_v43 = vrot.slane %v5344_v33, %v10000_v46  ;;  %v3098_v4 = vrot.slane %v10173_v54, %v9980_v23  ;;  %v3102_v61 = vrot.slane %v10173_v54, %v9983_v25  ;;  %v3106_v44 = vrot.slane %v10173_v54, %v9988_v36 }
 0x3c9   : > { %v5373_v52 = vcombine.low %v5351_v35, %v5358_v3  ;;  %v3110_v47 = vrot.slane %v10173_v54, %v9991_v40  ;;  %v3114_v26 = vrot.slane %v10173_v54, %v9994_v41  ;;  %v5488_v53 = vcombine.low %v3086_v31, %v3090_v30 }
 0x3ca   : > { %v5374_v59 = vcombine.low %v5365_v39, %v5372_v43  ;;  %v5489_v2 = vcombine.low %v3094_v56, %v3098_v4  ;;  %v5490_v1 = vcombine.low %v3102_v61, %v3106_v44  ;;  %v2009_v9 = vadd.f32 %v9953_v24, %v1909_v60 }
 0x3cb   : > { %v5381_v12 = vrot.slane %v5373_v52, %v10000_v46  ;;  %v5491_v0 = vcombine.low %v3110_v47, %v3114_v26  ;;  %v5498_v55 = vrot.slane %v5488_v53, %v10000_v46  ;;  %v2010_v13 = vadd.f32 %v9953_v24, %v1912_v50 }
 0x3cc   : > { %v8937_v14 = vpop.eup %8936  ;;  %v5388_v17 = vrot.slane %v5374_v59, %v10000_v46  ;;  %v5505_v21 = vrot.slane %v5489_v2, %v10000_v46  ;;  %v5512_v54 = vrot.slane %v5490_v1, %v10000_v46  ;;  %v2073_v16 = vsub.f32 0.0, %v2009_v9 }
 0x3cd   : > { %v10570_v20 = vpop.eup %8938  ;;  %v2259_v27 = vadd.f32 1.0, %v8937_v14  ;;  %v5519_v29 = vrot.slane %v5491_v0, %v10000_v46  ;;  %v2074_v33 = vsub.f32 0.0, %v2010_v13  ;;  %v2926_v31 = vrot.slane %v10129_v32, %v9969_v7 }
 0x3ce   : > { %v8941_v30 = vpop.eup %8940  ;;  %v5389_v35 = vcombine.low %v5381_v12, %v5388_v17  ;;  %v5520_v3 = vcombine.low %v5498_v55, %v5505_v21  ;;  %v2183_v39 = vmul.f32 1.442695, %v2073_v16  ;;  %v2930_v56 = vrot.slane %v10129_v32, %v9974_v11 }
 0x3cf   : > { %v10577_v60 = vpop.eup %8942  ;;  %8944 = vrcp.f32 %v2259_v27  ;;  %v2260_v43 = vadd.f32 1.0, %v8941_v30  ;;  %v5521_v4 = vcombine.low %v5512_v54, %v5519_v29  ;;  %v2934_v44 = vrot.slane %v10129_v32, %v9977_v19  ;;  %v1903_v54 = vpop.xlane.xlu0 %1902 }
 0x3d0   : > { %7650 = vperm.xlu1 %8734, %v5389_v35   ;;  %v5528_v61 = vrot.slane %v5520_v3, %v10000_v46  ;;  %8946 = vpow2.f32 %v2183_v39  ;;  %v2938_v50 = vrot.slane %v10129_v32, %v9980_v23  ;;  %v2185_v47 = vmul.f32 1.442695, %v2074_v33  ;;  %v1906_v33 = vpop.xlane.xlu1 %1905 }
 0x3d1   : > { %v5535_v52 = vrot.slane %v5521_v4, %v10000_v46  ;;  %v2942_v26 = vrot.slane %v10129_v32, %v9983_v25  ;;  %v2946_v53 = vrot.slane %v10129_v32, %v9988_v36  ;;  %8948 = vrcp.f32 %v2260_v43 }
 0x3d2   : > { %v2950_v59 = vrot.slane %v10129_v32, %v9991_v40  ;;  %v2954_v2 = vrot.slane %v10129_v32, %v9994_v41  ;;  %v5243_v1 = vcombine.low %v2926_v31, %v2930_v56  ;;  %v5244_v12 = vcombine.low %v2934_v44, %v2938_v50 }
 0x3d3   : > { %v5536_v9 = vcombine.low %v5528_v61, %v5535_v52  ;;  %v5245_v0 = vcombine.low %v2942_v26, %v2946_v53  ;;  %v3278_v55 = vrot.slane %v10212_v8, %v9969_v7  ;;  %v3282_v17 = vrot.slane %v10212_v8, %v9974_v11 }
 0x3d4   : > { %v5246_v13 = vcombine.low %v2950_v59, %v2954_v2  ;;  %v5253_v14 = vrot.slane %v5243_v1, %v10000_v46  ;;  %v3286_v21 = vrot.slane %v10212_v8, %v9977_v19  ;;  %v5260_v32 = vrot.slane %v5244_v12, %v10000_v46 }
 0x3d5   : > { %7659 = vperm.xlu0 %8735, %v5536_v9   ;;  %v5267_v16 = vrot.slane %v5245_v0, %v10000_v46  ;;  %v3290_v27 = vrot.slane %v10212_v8, %v9980_v23  ;;  %v3294_v29 = vrot.slane %v10212_v8, %v9983_v25  ;;  %v3298_v30 = vrot.slane %v10212_v8, %v9988_v36 }
 0x3d6   : > { %v5274_v31 = vrot.slane %v5246_v13, %v10000_v46  ;;  %v3302_v35 = vrot.slane %v10212_v8, %v9991_v40  ;;  %v3306_v3 = vrot.slane %v10212_v8, %v9994_v41  ;;  %v5275_v39 = vcombine.low %v5253_v14, %v5260_v32 }
 0x3d7   : > { %v5782_v56 = vcombine.low %v3278_v55, %v3282_v17  ;;  %v5783_v43 = vcombine.low %v3286_v21, %v3290_v27  ;;  %v2007_v4 = vadd.f32 %v9953_v24, %v1903_v54  ;;  %v5784_v44 = vcombine.low %v3294_v29, %v3298_v30 }
 0x3d8   : > { %v5276_v61 = vcombine.low %v5267_v16, %v5274_v31  ;;  %v5785_v50 = vcombine.low %v3302_v35, %v3306_v3  ;;  %v2008_v52 = vadd.f32 %v9953_v24, %v1906_v33  ;;  %v5283_v53 = vrot.slane %v5275_v39, %v10000_v46 }
 0x3d9   : > { %v10615_v26 = vpop.eup %8944  ;;  %v5792_v59 = vrot.slane %v5782_v56, %v10000_v46  ;;  %v5799_v2 = vrot.slane %v5783_v43, %v10000_v46  ;;  %v2071_v1 = vsub.f32 0.0, %v2007_v4  ;;  %v5806_v12 = vrot.slane %v5784_v44, %v10000_v46 }
 0x3da   : > { %v8947_v8 = vpop.eup %8946  ;;  %v5290_v9 = vrot.slane %v5276_v61, %v10000_v46  ;;  %v5813_v0 = vrot.slane %v5785_v50, %v10000_v46  ;;  %v2072_v55 = vsub.f32 0.0, %v2008_v52  ;;  %v3118_v21 = vrot.slane %v10136_v45, %v9969_v7 }
 0x3db   : > { %v2265_v13 = vadd.f32 1.0, %v8947_v8  ;;  %v5814_v14 = vcombine.low %v5792_v59, %v5799_v2  ;;  %v2179_v17 = vmul.f32 1.442695, %v2071_v1  ;;  %v10625_v54 = vpop.eup %8948  ;;  %v3122_v29 = vrot.slane %v10136_v45, %v9974_v11  ;;  %v1921_v8 = vpop.xlane.xlu0 %1920 }
 0x3dc   : > { %v5291_v32 = vcombine.low %v5283_v53, %v5290_v9  ;;  %v5815_v16 = vcombine.low %v5806_v12, %v5813_v0  ;;  %v2181_v27 = vmul.f32 1.442695, %v2072_v55  ;;  %8950 = vpow2.f32 %v2185_v47 }
 0x3dd   : > { %v5822_v33 = vrot.slane %v5814_v14, %v10000_v46  ;;  %v3126_v31 = vrot.slane %v10136_v45, %v9977_v19  ;;  %8952 = vpow2.f32 %v2179_v17  ;;  %v3130_v35 = vrot.slane %v10136_v45, %v9980_v23 }
 0x3de   : > { %7644 = vperm.xlu1 %8734, %v5291_v32   ;;  %v5829_v30 = vrot.slane %v5815_v16, %v10000_v46  ;;  %v3134_v3 = vrot.slane %v10136_v45, %v9983_v25  ;;  %8954 = vrcp.f32 %v2265_v13  ;;  %v3138_v39 = vrot.slane %v10136_v45, %v9988_v36  ;;  %v1924_v13 = vpop.xlane.xlu1 %1923 }
 0x3df   : > { %v3142_v47 = vrot.slane %v10136_v45, %v9991_v40  ;;  %v3146_v56 = vrot.slane %v10136_v45, %v9994_v41  ;;  %8956 = vpow2.f32 %v2181_v27  ;;  %v5537_v4 = vcombine.low %v3118_v21, %v3122_v29 }
 0x3e0   : > { %v5830_v43 = vcombine.low %v5822_v33, %v5829_v30  ;;  %v5538_v61 = vcombine.low %v3126_v31, %v3130_v35  ;;  %v5539_v44 = vcombine.low %v3134_v3, %v3138_v39  ;;  %v3214_v52 = vrot.slane %v10241_v37, %v9969_v7 }
 0x3e1   : > { %v5540_v50 = vcombine.low %v3142_v47, %v3146_v56  ;;  %v3218_v53 = vrot.slane %v10241_v37, %v9974_v11  ;;  %v5547_v59 = vrot.slane %v5537_v4, %v10000_v46  ;;  %v3222_v45 = vrot.slane %v10241_v37, %v9977_v19 }
 0x3e2   : > { %7677 = vperm.xlu0 %8735, %v5830_v43   ;;  %v5554_v2 = vrot.slane %v5538_v61, %v10000_v46  ;;  %v3226_v1 = vrot.slane %v10241_v37, %v9980_v23  ;;  %v5561_v9 = vrot.slane %v5539_v44, %v10000_v46  ;;  %v3230_v0 = vrot.slane %v10241_v37, %v9983_v25 }
 0x3e3   : > { %v5568_v12 = vrot.slane %v5540_v50, %v10000_v46  ;;  %v3234_v55 = vrot.slane %v10241_v37, %v9988_v36  ;;  %v3238_v17 = vrot.slane %v10241_v37, %v9991_v40  ;;  %v3242_v21 = vrot.slane %v10241_v37, %v9994_v41 }
 0x3e4   : > { %v5569_v14 = vcombine.low %v5547_v59, %v5554_v2  ;;  %v5684_v32 = vcombine.low %v3214_v52, %v3218_v53  ;;  %v5685_v27 = vcombine.low %v3222_v45, %v3226_v1  ;;  %v2013_v33 = vadd.f32 %v9953_v24, %v1921_v8 }
 0x3e5   : > { %v5570_v16 = vcombine.low %v5561_v9, %v5568_v12  ;;  %v5686_v29 = vcombine.low %v3230_v0, %v3234_v55  ;;  %v5687_v30 = vcombine.low %v3238_v17, %v3242_v21  ;;  %v2014_v3 = vadd.f32 %v9953_v24, %v1924_v13 }
 0x3e6   : > { %v5577_v31 = vrot.slane %v5569_v14, %v10000_v46  ;;  %v5694_v35 = vrot.slane %v5684_v32, %v10000_v46  ;;  %v10667_v39 = vpop.eup %8950  ;;  %v5701_v56 = vrot.slane %v5685_v27, %v10000_v46  ;;  %v2077_v43 = vsub.f32 0.0, %v2013_v33 }
 0x3e7   : > { %v5584_v47 = vrot.slane %v5570_v16, %v10000_v46  ;;  %v5708_v37 = vrot.slane %v5686_v29, %v10000_v46  ;;  %v8953_v4 = vpop.eup %8952  ;;  %v5715_v61 = vrot.slane %v5687_v30, %v10000_v46  ;;  %v2078_v44 = vsub.f32 0.0, %v2014_v3 }
 0x3e8   : > { %v3054_v50 = vrot.slane %v10167_v62, %v9969_v7  ;;  %v3058_v52 = vrot.slane %v10167_v62, %v9974_v11  ;;  %v10677_v53 = vpop.eup %8954  ;;  %v2263_v59 = vadd.f32 1.0, %v8953_v4  ;;  %v5716_v45 = vcombine.low %v5694_v35, %v5701_v56 }
 0x3e9   : > { %v5585_v2 = vcombine.low %v5577_v31, %v5584_v47  ;;  %v2191_v1 = vmul.f32 1.442695, %v2077_v43  ;;  %v8957_v8 = vpop.eup %8956  ;;  %v5717_v9 = vcombine.low %v5708_v37, %v5715_v61  ;;  %v2193_v12 = vmul.f32 1.442695, %v2078_v44  ;;  %v1915_v43 = vpop.xlane.xlu0 %1914 }
 0x3ea   : > { %v3062_v0 = vrot.slane %v10167_v62, %v9977_v19  ;;  %v3066_v55 = vrot.slane %v10167_v62, %v9980_v23  ;;  %8958 = vrcp.f32 %v2263_v59  ;;  %v2264_v13 = vadd.f32 1.0, %v8957_v8 }
 0x3eb   : > { %7662 = vperm.xlu1 %8734, %v5585_v2   ;;  %v5724_v14 = vrot.slane %v5716_v45, %v10000_v46  ;;  %v3070_v17 = vrot.slane %v10167_v62, %v9983_v25  ;;  %v5731_v21 = vrot.slane %v5717_v9, %v10000_v46  ;;  %8960 = vpow2.f32 %v2191_v1 }
 0x3ec   : > { %v3074_v32 = vrot.slane %v10167_v62, %v9988_v36  ;;  %v3078_v16 = vrot.slane %v10167_v62, %v9991_v40  ;;  %8962 = vrcp.f32 %v2264_v13  ;;  %v3082_v27 = vrot.slane %v10167_v62, %v9994_v41 }
 0x3ed   : > { %v5439_v29 = vcombine.low %v3054_v50, %v3058_v52  ;;  %v5440_v33 = vcombine.low %v3062_v0, %v3066_v55  ;;  %v5732_v31 = vcombine.low %v5724_v14, %v5731_v21  ;;  %8964 = vpow2.f32 %v2193_v12  ;;  %v1918_v50 = vpop.xlane.xlu1 %1917 }
 0x3ee   : > { %v5441_v30 = vcombine.low %v3070_v17, %v3074_v32  ;;  %v3406_v35 = vrot.slane %v10277_v22, %v9969_v7  ;;  %v5442_v3 = vcombine.low %v3078_v16, %v3082_v27  ;;  %v3410_v37 = vrot.slane %v10277_v22, %v9974_v11 }
 0x3ef   : > { %v5449_v47 = vrot.slane %v5439_v29, %v10000_v46  ;;  %v5456_v56 = vrot.slane %v5440_v33, %v10000_v46  ;;  %7671 = vperm.xlu0 %8735, %v5732_v31   ;;  %v3414_v4 = vrot.slane %v10277_v22, %v9977_v19  ;;  %v3418_v61 = vrot.slane %v10277_v22, %v9980_v23 }
 0x3f0   : > { %v5463_v62 = vrot.slane %v5441_v30, %v10000_v46  ;;  %v3422_v44 = vrot.slane %v10277_v22, %v9983_v25  ;;  %v5470_v52 = vrot.slane %v5442_v3, %v10000_v46  ;;  %v3426_v2 = vrot.slane %v10277_v22, %v9988_v36 }
 0x3f1   : > { %v5471_v59 = vcombine.low %v5449_v47, %v5456_v56  ;;  %v3430_v45 = vrot.slane %v10277_v22, %v9991_v40  ;;  %v3434_v1 = vrot.slane %v10277_v22, %v9994_v41  ;;  %v5978_v8 = vcombine.low %v3406_v35, %v3410_v37 }
 0x3f2   : > { %v5979_v9 = vcombine.low %v3414_v4, %v3418_v61  ;;  %v2011_v12 = vadd.f32 %v9953_v24, %v1915_v43  ;;  %v5472_v0 = vcombine.low %v5463_v62, %v5470_v52  ;;  %v5980_v13 = vcombine.low %v3422_v44, %v3426_v2 }
 0x3f3   : > { %v5479_v55 = vrot.slane %v5471_v59, %v10000_v46  ;;  %v2012_v14 = vadd.f32 %v9953_v24, %v1918_v50  ;;  %v5981_v17 = vcombine.low %v3430_v45, %v3434_v1  ;;  %v5988_v21 = vrot.slane %v5978_v8, %v10000_v46 }
 0x3f4   : > { %v5995_v32 = vrot.slane %v5979_v9, %v10000_v46  ;;  %v2075_v16 = vsub.f32 0.0, %v2011_v12  ;;  %v10718_v27 = vpop.eup %8958  ;;  %v5486_v22 = vrot.slane %v5472_v0, %v10000_v46  ;;  %v6002_v29 = vrot.slane %v5980_v13, %v10000_v46 }
 0x3f5   : > { %v2076_v33 = vsub.f32 0.0, %v2012_v14  ;;  %v3246_v31 = vrot.slane %v10209_v63, %v9969_v7  ;;  %v8961_v30 = vpop.eup %8960  ;;  %v6009_v35 = vrot.slane %v5981_v17, %v10000_v46  ;;  %v3250_v56 = vrot.slane %v10209_v63, %v9974_v11 }
 0x3f6   : > { %v6010_v3 = vcombine.low %v5988_v21, %v5995_v32  ;;  %v2187_v47 = vmul.f32 1.442695, %v2075_v16  ;;  %v10727_v37 = vpop.eup %8962  ;;  %v2269_v43 = vadd.f32 1.0, %v8961_v30  ;;  %v5487_v62 = vcombine.low %v5479_v55, %v5486_v22 }
 0x3f7   : > { %v2189_v4 = vmul.f32 1.442695, %v2076_v33  ;;  %v3254_v61 = vrot.slane %v10209_v63, %v9977_v19  ;;  %v8965_v44 = vpop.eup %8964  ;;  %v6011_v50 = vcombine.low %v6002_v29, %v6009_v35  ;;  %v3258_v59 = vrot.slane %v10209_v63, %v9980_v23  ;;  %v1933_v33 = vpop.xlane.xlu0 %1932 }
 0x3f8   : > { %v6018_v52 = vrot.slane %v6010_v3, %v10000_v46  ;;  %8966 = vpow2.f32 %v2187_v47  ;;  %v2270_v2 = vadd.f32 1.0, %v8965_v44  ;;  %7656 = vperm.xlu1 %8734, %v5487_v62   ;;  %v3262_v45 = vrot.slane %v10209_v63, %v9983_v25  ;;  %v1936_v47 = vpop.xlane.xlu1 %1935 }
 0x3f9   : > { %8968 = vrcp.f32 %v2269_v43  ;;  %v3266_v1 = vrot.slane %v10209_v63, %v9988_v36  ;;  %v6025_v8 = vrot.slane %v6011_v50, %v10000_v46  ;;  %v3270_v9 = vrot.slane %v10209_v63, %v9991_v40 }
 0x3fa   : > { %8970 = vpow2.f32 %v2189_v4  ;;  %v3274_v12 = vrot.slane %v10209_v63, %v9994_v41  ;;  %v5733_v0 = vcombine.low %v3246_v31, %v3250_v56  ;;  %v5734_v55 = vcombine.low %v3254_v61, %v3258_v59 }
 0x3fb   : > { %8972 = vrcp.f32 %v2270_v2  ;;  %v5735_v13 = vcombine.low %v3262_v45, %v3266_v1  ;;  %v6026_v14 = vcombine.low %v6018_v52, %v6025_v8  ;;  %v3342_v21 = vrot.slane %v10327_v51, %v9969_v7 }
 0x3fc   : > { %v5736_v17 = vcombine.low %v3270_v9, %v3274_v12  ;;  %v3346_v32 = vrot.slane %v10327_v51, %v9974_v11  ;;  %v5743_v16 = vrot.slane %v5733_v0, %v10000_v46  ;;  %v5750_v22 = vrot.slane %v5734_v55, %v10000_v46 }
 0x3fd   : > { %v5757_v29 = vrot.slane %v5735_v13, %v10000_v46  ;;  %v3350_v63 = vrot.slane %v10327_v51, %v9977_v19  ;;  %7689 = vperm.xlu0 %8735, %v6026_v14   ;;  %v3354_v30 = vrot.slane %v10327_v51, %v9980_v23  ;;  %v3358_v35 = vrot.slane %v10327_v51, %v9983_v25 }
 0x3fe   : > { %v5764_v31 = vrot.slane %v5736_v17, %v10000_v46  ;;  %v3362_v3 = vrot.slane %v10327_v51, %v9988_v36  ;;  %v5765_v56 = vcombine.low %v5743_v16, %v5750_v22  ;;  %v3366_v43 = vrot.slane %v10327_v51, %v9991_v40 }
 0x3ff   : > { %v3370_v62 = vrot.slane %v10327_v51, %v9994_v41  ;;  %v5880_v4 = vcombine.low %v3342_v21, %v3346_v32  ;;  %v5881_v44 = vcombine.low %v3350_v63, %v3354_v30  ;;  %v2017_v52 = vadd.f32 %v9953_v24, %v1933_v33 }
 0x400   : > { %v5766_v61 = vcombine.low %v5757_v29, %v5764_v31  ;;  %v5882_v50 = vcombine.low %v3358_v35, %v3362_v3  ;;  %v5773_v59 = vrot.slane %v5765_v56, %v10000_v46  ;;  %v2018_v1 = vadd.f32 %v9953_v24, %v1936_v47 }
 0x401   : > { %v5883_v2 = vcombine.low %v3366_v43, %v3370_v62  ;;  %v5890_v45 = vrot.slane %v5880_v4, %v10000_v46  ;;  %v5897_v12 = vrot.slane %v5881_v44, %v10000_v46  ;;  %v2081_v0 = vsub.f32 0.0, %v2017_v52 }
 0x402   : > { %v8967_v8 = vpop.eup %8966  ;;  %v5780_v9 = vrot.slane %v5766_v61, %v10000_v46  ;;  %v5904_v51 = vrot.slane %v5882_v50, %v10000_v46  ;;  %v2082_v17 = vsub.f32 0.0, %v2018_v1  ;;  %v3182_v21 = vrot.slane %v10239_v5, %v9969_v7 }
 0x403   : > { %v10770_v55 = vpop.eup %8968  ;;  %v2267_v13 = vadd.f32 1.0, %v8967_v8  ;;  %v5911_v14 = vrot.slane %v5883_v2, %v10000_v46  ;;  %v5912_v22 = vcombine.low %v5890_v45, %v5897_v12  ;;  %v2199_v29 = vmul.f32 1.442695, %v2081_v0 }
 0x404   : > { %v8971_v32 = vpop.eup %8970  ;;  %v5781_v16 = vcombine.low %v5773_v59, %v5780_v9  ;;  %v3186_v63 = vrot.slane %v10239_v5, %v9974_v11  ;;  %v2201_v35 = vmul.f32 1.442695, %v2082_v17  ;;  %v3190_v47 = vrot.slane %v10239_v5, %v9977_v19  ;;  %v1930_v17 = vpop.xlane.xlu1 %1929 }
 0x405   : > { %v10777_v33 = vpop.eup %8972  ;;  %8974 = vrcp.f32 %v2267_v13  ;;  %v2268_v31 = vadd.f32 1.0, %v8971_v32  ;;  %v5913_v30 = vcombine.low %v5904_v51, %v5911_v14  ;;  %v5920_v3 = vrot.slane %v5912_v22, %v10000_v46  ;;  %v1927_v51 = vpop.xlane.xlu0 %1926 }
 0x406   : > { %7674 = vperm.xlu1 %8734, %v5781_v16   ;;  %8976 = vpow2.f32 %v2199_v29  ;;  %v3194_v56 = vrot.slane %v10239_v5, %v9980_v23  ;;  %v3198_v62 = vrot.slane %v10239_v5, %v9983_v25  ;;  %v3202_v4 = vrot.slane %v10239_v5, %v9988_v36 }
 0x407   : > { %8978 = vrcp.f32 %v2268_v31  ;;  %v5927_v43 = vrot.slane %v5913_v30, %v10000_v46  ;;  %v3206_v61 = vrot.slane %v10239_v5, %v9991_v40  ;;  %v3210_v44 = vrot.slane %v10239_v5, %v9994_v41 }
 0x408   : > { %8980 = vpow2.f32 %v2201_v35  ;;  %v5635_v50 = vcombine.low %v3182_v21, %v3186_v63  ;;  %v5636_v59 = vcombine.low %v3190_v47, %v3194_v56  ;;  %v5637_v2 = vcombine.low %v3198_v62, %v3202_v4 }
 0x409   : > { %v5928_v52 = vcombine.low %v5920_v3, %v5927_v43  ;;  %v3534_v45 = vrot.slane %v10377_v49, %v9969_v7  ;;  %v5638_v1 = vcombine.low %v3206_v61, %v3210_v44  ;;  %v3538_v9 = vrot.slane %v10377_v49, %v9974_v11 }
 0x40a   : > { %v5645_v8 = vrot.slane %v5635_v50, %v10000_v46  ;;  %v3542_v12 = vrot.slane %v10377_v49, %v9977_v19  ;;  %v5652_v5 = vrot.slane %v5636_v59, %v10000_v46  ;;  %v5659_v0 = vrot.slane %v5637_v2, %v10000_v46 }
 0x40b   : > { %7683 = vperm.xlu0 %8735, %v5928_v52   ;;  %v3546_v13 = vrot.slane %v10377_v49, %v9980_v23  ;;  %v3550_v14 = vrot.slane %v10377_v49, %v9983_v25  ;;  %v5666_v21 = vrot.slane %v5638_v1, %v10000_v46  ;;  %v3554_v32 = vrot.slane %v10377_v49, %v9988_v36 }
 0x40c   : > { %v3558_v16 = vrot.slane %v10377_v49, %v9991_v40  ;;  %v3562_v22 = vrot.slane %v10377_v49, %v9994_v41  ;;  %v5667_v29 = vcombine.low %v5645_v8, %v5652_v5  ;;  %v6174_v63 = vcombine.low %v3534_v45, %v3538_v9 }
 0x40d   : > { %v6175_v31 = vcombine.low %v3542_v12, %v3546_v13  ;;  %v2015_v30 = vadd.f32 %v9953_v24, %v1927_v51  ;;  %v5668_v35 = vcombine.low %v5659_v0, %v5666_v21  ;;  %v6176_v3 = vcombine.low %v3550_v14, %v3554_v32 }
 0x40e   : > { %v6177_v47 = vcombine.low %v3558_v16, %v3562_v22  ;;  %v2016_v56 = vadd.f32 %v9953_v24, %v1930_v17  ;;  %v5675_v62 = vrot.slane %v5667_v29, %v10000_v46  ;;  %v6184_v4 = vrot.slane %v6174_v63, %v10000_v46 }
 0x40f   : > { %v10815_v43 = vpop.eup %8974  ;;  %v6191_v61 = vrot.slane %v6175_v31, %v10000_v46  ;;  %v2079_v44 = vsub.f32 0.0, %v2015_v30  ;;  %v5682_v50 = vrot.slane %v5668_v35, %v10000_v46  ;;  %v6198_v52 = vrot.slane %v6176_v3, %v10000_v46 }
 0x410   : > { %v8977_v49 = vpop.eup %8976  ;;  %v6205_v59 = vrot.slane %v6177_v47, %v10000_v46  ;;  %v2080_v2 = vsub.f32 0.0, %v2016_v56  ;;  %v3374_v12 = vrot.slane %v10267_v57, %v9969_v7  ;;  %v3378_v14 = vrot.slane %v10267_v57, %v9974_v11 }
 0x411   : > { %v10823_v45 = vpop.eup %8978  ;;  %v2273_v1 = vadd.f32 1.0, %v8977_v49  ;;  %v6206_v8 = vcombine.low %v6184_v4, %v6191_v61  ;;  %v2195_v9 = vmul.f32 1.442695, %v2079_v44  ;;  %v5683_v5 = vcombine.low %v5675_v62, %v5682_v50 }
 0x412   : > { %v8981_v51 = vpop.eup %8980  ;;  %v6207_v0 = vcombine.low %v6198_v52, %v6205_v59  ;;  %v2197_v13 = vmul.f32 1.442695, %v2080_v2  ;;  %v3382_v21 = vrot.slane %v10267_v57, %v9977_v19  ;;  %v3386_v16 = vrot.slane %v10267_v57, %v9980_v23  ;;  %v1945_v52 = vpop.xlane.xlu0 %1944 }
 0x413   : > { %8982 = vrcp.f32 %v2273_v1  ;;  %v6214_v17 = vrot.slane %v6206_v8, %v10000_v46  ;;  %7668 = vperm.xlu1 %8734, %v5683_v5   ;;  %v3390_v22 = vrot.slane %v10267_v57, %v9983_v25  ;;  %v2274_v29 = vadd.f32 1.0, %v8981_v51 }
 0x414   : > { %v6221_v32 = vrot.slane %v6207_v0, %v10000_v46  ;;  %8984 = vpow2.f32 %v2195_v9  ;;  %v3394_v63 = vrot.slane %v10267_v57, %v9988_v36  ;;  %v3398_v31 = vrot.slane %v10267_v57, %v9991_v40  ;;  %v1948_v9 = vpop.xlane.xlu1 %1947 }
 0x415   : > { %v3402_v30 = vrot.slane %v10267_v57, %v9994_v41  ;;  %8986 = vpow2.f32 %v2197_v13  ;;  %v5929_v3 = vcombine.low %v3374_v12, %v3378_v14  ;;  %v5930_v47 = vcombine.low %v3382_v21, %v3386_v16 }
 0x416   : > { %v6222_v35 = vcombine.low %v6214_v17, %v6221_v32  ;;  %v5931_v56 = vcombine.low %v3390_v22, %v3394_v63  ;;  %v3470_v4 = vrot.slane %v10423_v18, %v9969_v7  ;;  %v3474_v61 = vrot.slane %v10423_v18, %v9974_v11 }
 0x417   : > { %v5932_v62 = vcombine.low %v3398_v31, %v3402_v30  ;;  %v5939_v44 = vrot.slane %v5929_v3, %v10000_v46  ;;  %v5946_v49 = vrot.slane %v5930_v47, %v10000_v46  ;;  %v3478_v57 = vrot.slane %v10423_v18, %v9977_v19 }
 0x418   : > { %7701 = vperm.xlu0 %8735, %v6222_v35   ;;  %v3482_v50 = vrot.slane %v10423_v18, %v9980_v23  ;;  %v5953_v59 = vrot.slane %v5931_v56, %v10000_v46  ;;  %v3486_v1 = vrot.slane %v10423_v18, %v9983_v25  ;;  %v3490_v8 = vrot.slane %v10423_v18, %v9988_v36 }
 0x419   : > { %v5960_v2 = vrot.slane %v5932_v62, %v10000_v46  ;;  %v5961_v12 = vcombine.low %v5939_v44, %v5946_v49  ;;  %v3494_v51 = vrot.slane %v10423_v18, %v9991_v40  ;;  %v3498_v5 = vrot.slane %v10423_v18, %v9994_v41 }
 0x41a   : > { %v6076_v0 = vcombine.low %v3470_v4, %v3474_v61  ;;  %v6077_v14 = vcombine.low %v3478_v57, %v3482_v50  ;;  %v6078_v17 = vcombine.low %v3486_v1, %v3490_v8  ;;  %v2021_v21 = vadd.f32 %v9953_v24, %v1945_v52 }
 0x41b   : > { %v5962_v13 = vcombine.low %v5953_v59, %v5960_v2  ;;  %v5969_v32 = vrot.slane %v5961_v12, %v10000_v46  ;;  %v6079_v16 = vcombine.low %v3494_v51, %v3498_v5  ;;  %v2022_v63 = vadd.f32 %v9953_v24, %v1948_v9 }
 0x41c   : > { %v6086_v22 = vrot.slane %v6076_v0, %v10000_v46  ;;  %v6093_v35 = vrot.slane %v6077_v14, %v10000_v46  ;;  %v6100_v18 = vrot.slane %v6078_v17, %v10000_v46  ;;  %v2085_v3 = vsub.f32 0.0, %v2021_v21 }
 0x41d   : > { %v10867_v31 = vpop.eup %8982  ;;  %v5976_v30 = vrot.slane %v5962_v13, %v10000_v46  ;;  %v6107_v56 = vrot.slane %v6079_v16, %v10000_v46  ;;  %v2086_v62 = vsub.f32 0.0, %v2022_v63  ;;  %v3310_v4 = vrot.slane %v10318_v28, %v9969_v7 }
 0x41e   : > { %v8985_v47 = vpop.eup %8984  ;;  %v3314_v61 = vrot.slane %v10318_v28, %v9974_v11  ;;  %v6108_v57 = vcombine.low %v6086_v22, %v6093_v35  ;;  %v2207_v50 = vmul.f32 1.442695, %v2085_v3  ;;  %v3318_v1 = vrot.slane %v10318_v28, %v9977_v19  ;;  %v1939_v35 = vpop.xlane.xlu0 %1938 }
 0x41f   : > { %v2271_v44 = vadd.f32 1.0, %v8985_v47  ;;  %v5977_v49 = vcombine.low %v5969_v32, %v5976_v30  ;;  %v8987_v52 = vpop.eup %8986  ;;  %v6109_v59 = vcombine.low %v6100_v18, %v6107_v56  ;;  %v2209_v2 = vmul.f32 1.442695, %v2086_v62  ;;  %v1942_v56 = vpop.xlane.xlu1 %1941 }
 0x420   : > { %v3322_v8 = vrot.slane %v10318_v28, %v9980_v23  ;;  %8988 = vrcp.f32 %v2274_v29  ;;  %v6116_v9 = vrot.slane %v6108_v57, %v10000_v46  ;;  %v3326_v12 = vrot.slane %v10318_v28, %v9983_v25 }
 0x421   : > { %7686 = vperm.xlu1 %8734, %v5977_v49   ;;  %v6123_v51 = vrot.slane %v6109_v59, %v10000_v46  ;;  %8990 = vpow2.f32 %v2207_v50  ;;  %v3330_v5 = vrot.slane %v10318_v28, %v9988_v36  ;;  %v3334_v0 = vrot.slane %v10318_v28, %v9991_v40 }
 0x422   : > { %8992 = vrcp.f32 %v2271_v44  ;;  %v3338_v13 = vrot.slane %v10318_v28, %v9994_v41  ;;  %v5831_v29 = vcombine.low %v3310_v4, %v3314_v61  ;;  %v5832_v14 = vcombine.low %v3318_v1, %v3322_v8 }
 0x423   : > { %v6124_v17 = vcombine.low %v6116_v9, %v6123_v51  ;;  %8994 = vpow2.f32 %v2209_v2  ;;  %v5833_v21 = vcombine.low %v3326_v12, %v3330_v5  ;;  %v3662_v32 = vrot.slane %v10477_v10, %v9969_v7 }
 0x424   : > { %v5834_v16 = vcombine.low %v3334_v0, %v3338_v13  ;;  %v5841_v22 = vrot.slane %v5831_v29, %v10000_v46  ;;  %v5848_v63 = vrot.slane %v5832_v14, %v10000_v46  ;;  %v3666_v30 = vrot.slane %v10477_v10, %v9974_v11 }
 0x425   : > { %7695 = vperm.xlu0 %8735, %v6124_v17   ;;  %v5855_v28 = vrot.slane %v5833_v21, %v10000_v46  ;;  %v3670_v18 = vrot.slane %v10477_v10, %v9977_v19  ;;  %v3674_v3 = vrot.slane %v10477_v10, %v9980_v23  ;;  %v3678_v47 = vrot.slane %v10477_v10, %v9983_v25 }
 0x426   : > { %v5862_v62 = vrot.slane %v5834_v16, %v10000_v46  ;;  %v5863_v4 = vcombine.low %v5841_v22, %v5848_v63  ;;  %v3682_v61 = vrot.slane %v10477_v10, %v9988_v36  ;;  %v3686_v44 = vrot.slane %v10477_v10, %v9991_v40 }
 0x427   : > { %v3690_v49 = vrot.slane %v10477_v10, %v9994_v41  ;;  %v6370_v57 = vcombine.low %v3662_v32, %v3666_v30  ;;  %v6371_v50 = vcombine.low %v3670_v18, %v3674_v3  ;;  %v2019_v59 = vadd.f32 %v9953_v24, %v1939_v35 }
 0x428   : > { %v5864_v2 = vcombine.low %v5855_v28, %v5862_v62  ;;  %v5871_v1 = vrot.slane %v5863_v4, %v10000_v46  ;;  %v6372_v8 = vcombine.low %v3678_v47, %v3682_v61  ;;  %v2020_v9 = vadd.f32 %v9953_v24, %v1942_v56 }
 0x429   : > { %v6373_v12 = vcombine.low %v3686_v44, %v3690_v49  ;;  %v6380_v51 = vrot.slane %v6370_v57, %v10000_v46  ;;  %v6387_v5 = vrot.slane %v6371_v50, %v10000_v46  ;;  %v2083_v0 = vsub.f32 0.0, %v2019_v59 }
 0x42a   : > { %v10916_v13 = vpop.eup %8988  ;;  %v2272_v29 = vadd.f32 1.0, %v8987_v52  ;;  %v5878_v10 = vrot.slane %v5864_v2, %v10000_v46  ;;  %v6394_v14 = vrot.slane %v6372_v8, %v10000_v46  ;;  %v2084_v17 = vsub.f32 0.0, %v2020_v9 }
 0x42b   : > { %v8991_v21 = vpop.eup %8990  ;;  %v6401_v32 = vrot.slane %v6373_v12, %v10000_v46  ;;  %v6402_v16 = vcombine.low %v6380_v51, %v6387_v5  ;;  %v2203_v22 = vmul.f32 1.442695, %v2083_v0  ;;  %v3502_v63 = vrot.slane %v10370_v34, %v9969_v7 }
 0x42c   : > { %v10923_v30 = vpop.eup %8992  ;;  %v5879_v35 = vcombine.low %v5871_v1, %v5878_v10  ;;  %v2205_v28 = vmul.f32 1.442695, %v2084_v17  ;;  %v3506_v52 = vrot.slane %v10370_v34, %v9974_v11  ;;  %v3510_v18 = vrot.slane %v10370_v34, %v9977_v19 }
 0x42d   : > { %v8995_v3 = vpop.eup %8994  ;;  %v6403_v47 = vcombine.low %v6394_v14, %v6401_v32  ;;  %v6410_v56 = vrot.slane %v6402_v16, %v10000_v46  ;;  %8996 = vpow2.f32 %v2203_v22  ;;  %v3514_v62 = vrot.slane %v10370_v34, %v9980_v23  ;;  %v1957_v14 = vpop.xlane.xlu0 %1956 }
 0x42e   : > { %8998 = vrcp.f32 %v2272_v29  ;;  %v2277_v4 = vadd.f32 1.0, %v8991_v21  ;;  %7680 = vperm.xlu1 %8734, %v5879_v35   ;;  %v3518_v61 = vrot.slane %v10370_v34, %v9983_v25  ;;  %v3522_v44 = vrot.slane %v10370_v34, %v9988_v36  ;;  %v1960_v22 = vpop.xlane.xlu1 %1959 }
 0x42f   : > { %v6417_v49 = vrot.slane %v6403_v47, %v10000_v46  ;;  %9000 = vpow2.f32 %v2205_v28  ;;  %v3526_v57 = vrot.slane %v10370_v34, %v9991_v40  ;;  %v3530_v50 = vrot.slane %v10370_v34, %v9994_v41 }
 0x430   : > { %v2278_v59 = vadd.f32 1.0, %v8995_v3  ;;  %v6125_v2 = vcombine.low %v3502_v63, %v3506_v52  ;;  %v6126_v1 = vcombine.low %v3510_v18, %v3514_v62  ;;  %v6127_v8 = vcombine.low %v3518_v61, %v3522_v44 }
 0x431   : > { %v6418_v9 = vcombine.low %v6410_v56, %v6417_v49  ;;  %v6128_v12 = vcombine.low %v3526_v57, %v3530_v50  ;;  %v3598_v51 = vrot.slane %v10527_v42, %v9969_v7  ;;  %v3602_v5 = vrot.slane %v10527_v42, %v9974_v11 }
 0x432   : > { %v6135_v0 = vrot.slane %v6125_v2, %v10000_v46  ;;  %v6142_v29 = vrot.slane %v6126_v1, %v10000_v46  ;;  %v6149_v10 = vrot.slane %v6127_v8, %v10000_v46  ;;  %v3606_v34 = vrot.slane %v10527_v42, %v9977_v19 }
 0x433   : > { %7713 = vperm.xlu0 %8735, %v6418_v9   ;;  %v6156_v17 = vrot.slane %v6128_v12, %v10000_v46  ;;  %v3610_v21 = vrot.slane %v10527_v42, %v9980_v23  ;;  %v3614_v32 = vrot.slane %v10527_v42, %v9983_v25  ;;  %v3618_v16 = vrot.slane %v10527_v42, %v9988_v36 }
 0x434   : > { %v6157_v63 = vcombine.low %v6135_v0, %v6142_v29  ;;  %v3622_v35 = vrot.slane %v10527_v42, %v9991_v40  ;;  %v3626_v28 = vrot.slane %v10527_v42, %v9994_v41  ;;  %v6272_v52 = vcombine.low %v3598_v51, %v3602_v5 }
 0x435   : > { %v6158_v18 = vcombine.low %v6149_v10, %v6156_v17  ;;  %v6273_v3 = vcombine.low %v3606_v34, %v3610_v21  ;;  %v6274_v47 = vcombine.low %v3614_v32, %v3618_v16  ;;  %v2025_v56 = vadd.f32 %v9953_v24, %v1957_v14  ;;  %v1951_v16 = vpop.xlane.xlu0 %1950 }
 0x436   : > { %v6165_v62 = vrot.slane %v6157_v63, %v10000_v46  ;;  %v6275_v61 = vcombine.low %v3622_v35, %v3626_v28  ;;  %v6282_v44 = vrot.slane %v6272_v52, %v10000_v46  ;;  %v2026_v49 = vadd.f32 %v9953_v24, %v1960_v22  ;;  %v1954_v28 = vpop.xlane.xlu1 %1953 }
 0x437   : > { %v8997_v57 = vpop.eup %8996  ;;  %v6172_v50 = vrot.slane %v6158_v18, %v10000_v46  ;;  %v6289_v2 = vrot.slane %v6273_v3, %v10000_v46  ;;  %v6296_v42 = vrot.slane %v6274_v47, %v10000_v46  ;;  %v2089_v1 = vsub.f32 0.0, %v2025_v56 }
 0x438   : > { %v10968_v8 = vpop.eup %8998  ;;  %9002 = vrcp.f32 %v2277_v4  ;;  %v6303_v9 = vrot.slane %v6275_v61, %v10000_v46  ;;  %v3438_v12 = vrot.slane %v10415_v6, %v9969_v7  ;;  %v3442_v10 = vrot.slane %v10415_v6, %v9974_v11 }
 0x439   : > { %v9001_v51 = vpop.eup %9000  ;;  %v6173_v5 = vcombine.low %v6165_v62, %v6172_v50  ;;  %v6304_v0 = vcombine.low %v6282_v44, %v6289_v2  ;;  %v2215_v29 = vmul.f32 1.442695, %v2089_v1  ;;  %9004 = vrcp.f32 %v2278_v59 }
 0x43a   : > { %v2275_v34 = vadd.f32 1.0, %v8997_v57  ;;  %v6305_v14 = vcombine.low %v6296_v42, %v6303_v9  ;;  %v2090_v21 = vsub.f32 0.0, %v2026_v49  ;;  %v3446_v4 = vrot.slane %v10415_v6, %v9977_v19 }
 0x43b   : > { %7698 = vperm.xlu1 %8734, %v6173_v5   ;;  %v6312_v17 = vrot.slane %v6304_v0, %v10000_v46  ;;  %v3450_v32 = vrot.slane %v10415_v6, %v9980_v23  ;;  %v2276_v22 = vadd.f32 1.0, %v9001_v51  ;;  %v3454_v35 = vrot.slane %v10415_v6, %v9983_v25 }
 0x43c   : > { %v6319_v63 = vrot.slane %v6305_v14, %v10000_v46  ;;  %v3458_v59 = vrot.slane %v10415_v6, %v9988_v36  ;;  %9006 = vpow2.f32 %v2215_v29  ;;  %v3462_v52 = vrot.slane %v10415_v6, %v9991_v40 }
 0x43d   : > { %v3466_v18 = vrot.slane %v10415_v6, %v9994_v41  ;;  %v6027_v3 = vcombine.low %v3438_v12, %v3442_v10  ;;  %v6028_v56 = vcombine.low %v3446_v4, %v3450_v32  ;;  %v2023_v61 = vadd.f32 %v9953_v24, %v1951_v16 }
 0x43e   : > { %v6320_v47 = vcombine.low %v6312_v17, %v6319_v63  ;;  %v6029_v62 = vcombine.low %v3454_v35, %v3458_v59  ;;  %v2024_v57 = vadd.f32 %v9953_v24, %v1954_v28  ;;  %v3630_v50 = vrot.slane %v10467_v15, %v9969_v7 }
 0x43f   : > { %v6030_v44 = vcombine.low %v3462_v52, %v3466_v18  ;;  %v6037_v49 = vrot.slane %v6027_v3, %v10000_v46  ;;  %v6044_v2 = vrot.slane %v6028_v56, %v10000_v46  ;;  %v2087_v6 = vsub.f32 0.0, %v2023_v61 }
 0x440   : > { %7707 = vperm.xlu0 %8735, %v6320_v47   ;;  %v6051_v42 = vrot.slane %v6029_v62, %v10000_v46  ;;  %v3634_v1 = vrot.slane %v10467_v15, %v9974_v11  ;;  %v2217_v9 = vmul.f32 1.442695, %v2090_v21  ;;  %v3638_v51 = vrot.slane %v10467_v15, %v9977_v19 }
 0x441   : > { %v6058_v12 = vrot.slane %v6030_v44, %v10000_v46  ;;  %v3642_v24 = vrot.slane %v10467_v15, %v9980_v23  ;;  %v6059_v0 = vcombine.low %v6037_v49, %v6044_v2  ;;  %v2211_v29 = vmul.f32 1.442695, %v2087_v6 }
 0x442   : > { %v11003_v5 = vpop.eup %9002  ;;  %v3646_v10 = vrot.slane %v10467_v15, %v9983_v25  ;;  %v3650_v14 = vrot.slane %v10467_v15, %v9988_v36  ;;  %v2088_v21 = vsub.f32 0.0, %v2024_v57  ;;  %v3654_v4 = vrot.slane %v10467_v15, %v9991_v40 }
 0x443   : > { %v6060_v17 = vcombine.low %v6051_v42, %v6058_v12  ;;  %v3658_v32 = vrot.slane %v10467_v15, %v9994_v41  ;;  %v11013_v16 = vpop.eup %9004  ;;  %v6067_v63 = vrot.slane %v6059_v0, %v10000_v46  ;;  %9008 = vpow2.f32 %v2211_v29 }
 0x444   : > { %v6321_v35 = vcombine.low %v3630_v50, %v3634_v1  ;;  %v6322_v59 = vcombine.low %v3638_v51, %v3642_v24  ;;  %9010 = vrcp.f32 %v2275_v34  ;;  %v6323_v52 = vcombine.low %v3646_v10, %v3650_v14 }
 0x445   : > { %v6074_v28 = vrot.slane %v6060_v17, %v10000_v46  ;;  %v6324_v18 = vcombine.low %v3654_v4, %v3658_v32  ;;  %9012 = vrcp.f32 %v2276_v22  ;;  %v3726_v15 = vrot.slane %v10625_v54, %v9969_v7 }
 0x446   : > { %v6331_v3 = vrot.slane %v6321_v35, %v10000_v46  ;;  %v6338_v47 = vrot.slane %v6322_v59, %v10000_v46  ;;  %v9007_v56 = vpop.eup %9006  ;;  %v6345_v61 = vrot.slane %v6323_v52, %v10000_v46  ;;  %v3730_v34 = vrot.slane %v10625_v54, %v9974_v11 }
 0x447   : > { %v6075_v62 = vcombine.low %v6067_v63, %v6074_v28  ;;  %v6352_v44 = vrot.slane %v6324_v18, %v10000_v46  ;;  %9014 = vpow2.f32 %v2217_v9  ;;  %v2213_v49 = vmul.f32 1.442695, %v2088_v21 }
 0x448   : > { %v6353_v57 = vcombine.low %v6331_v3, %v6338_v47  ;;  %v3734_v22 = vrot.slane %v10625_v54, %v9977_v19  ;;  %v3738_v2 = vrot.slane %v10625_v54, %v9980_v23  ;;  %v3742_v42 = vrot.slane %v10625_v54, %v9983_v25 }
 0x449   : > { %7692 = vperm.xlu1 %8734, %v6075_v62   ;;  %v6354_v50 = vcombine.low %v6345_v61, %v6352_v44  ;;  %v3746_v6 = vrot.slane %v10625_v54, %v9988_v36  ;;  %v2281_v1 = vadd.f32 1.0, %v9007_v56  ;;  %v3750_v9 = vrot.slane %v10625_v54, %v9991_v40 }
 0x44a   : > { %v6361_v12 = vrot.slane %v6353_v57, %v10000_v46  ;;  %v3754_v51 = vrot.slane %v10625_v54, %v9994_v41  ;;  %v6468_v0 = vcombine.low %v3726_v15, %v3730_v34  ;;  %v6469_v29 = vcombine.low %v3734_v22, %v3738_v2 }
 0x44b   : > { %v6368_v24 = vrot.slane %v6354_v50, %v10000_v46  ;;  %v6470_v10 = vcombine.low %v3742_v42, %v3746_v6  ;;  %v3566_v17 = vrot.slane %v10518_v38, %v9969_v7  ;;  %v3570_v21 = vrot.slane %v10518_v38, %v9974_v11 }
 0x44c   : > { %v6471_v14 = vcombine.low %v3750_v9, %v3754_v51  ;;  %v3574_v4 = vrot.slane %v10518_v38, %v9977_v19  ;;  %v6478_v63 = vrot.slane %v6468_v0, %v10000_v46  ;;  %v6485_v54 = vrot.slane %v6469_v29, %v10000_v46 }
 0x44d   : > { %v6369_v32 = vcombine.low %v6361_v12, %v6368_v24  ;;  %v6492_v35 = vrot.slane %v6470_v10, %v10000_v46  ;;  %v9009_v59 = vpop.eup %9008  ;;  %v3578_v52 = vrot.slane %v10518_v38, %v9980_v23  ;;  %v3582_v18 = vrot.slane %v10518_v38, %v9983_v25 }
 0x44e   : > { %v6499_v28 = vrot.slane %v6471_v14, %v10000_v46  ;;  %v3586_v3 = vrot.slane %v10518_v38, %v9988_v36  ;;  %v11055_v47 = vpop.eup %9010  ;;  %v2279_v15 = vadd.f32 1.0, %v9009_v59  ;;  %v6500_v56 = vcombine.low %v6478_v63, %v6485_v54 }
 0x44f   : > { %7710 = vperm.xlu1 %8734, %v6369_v32   ;;  %v3590_v62 = vrot.slane %v10518_v38, %v9991_v40  ;;  %v3594_v61 = vrot.slane %v10518_v38, %v9994_v41  ;;  %v11061_v44 = vpop.eup %9012  ;;  %9016 = vpow2.f32 %v2213_v49  ;;  %v6223_v57 = vcombine.low %v3566_v17, %v3570_v21 }
 0x450   : > { %v6501_v34 = vcombine.low %v6492_v35, %v6499_v28  ;;  %v6224_v22 = vcombine.low %v3574_v4, %v3578_v52  ;;  %9018 = vrcp.f32 %v2281_v1  ;;  %v6508_v50 = vrot.slane %v6500_v56, %v10000_v46 }
 0x451   : > { %v6225_v2 = vcombine.low %v3582_v18, %v3586_v3  ;;  %v6226_v42 = vcombine.low %v3590_v62, %v3594_v61  ;;  %v11064_v6 = vpop.eup %9014  ;;  %9020 = vrcp.f32 %v2279_v15  ;;  %v6233_v9 = vrot.slane %v6223_v57, %v10000_v46 }
 0x452   : > { %v6515_v12 = vrot.slane %v6501_v34, %v10000_v46  ;;  %v6240_v38 = vrot.slane %v6224_v22, %v10000_v46  ;;  %v3758_v1 = vrot.slane %v10570_v20, %v9969_v7  ;;  %v3762_v24 = vrot.slane %v10570_v20, %v9974_v11 }
 0x453   : > { %v6247_v51 = vrot.slane %v6225_v2, %v10000_v46  ;;  %v6254_v49 = vrot.slane %v6226_v42, %v10000_v46  ;;  %v3766_v10 = vrot.slane %v10570_v20, %v9977_v19  ;;  %v3770_v14 = vrot.slane %v10570_v20, %v9980_v23 }
 0x454   : > { %v6516_v0 = vcombine.low %v6508_v50, %v6515_v12  ;;  %v6255_v29 = vcombine.low %v6233_v9, %v6240_v38  ;;  %v3774_v21 = vrot.slane %v10570_v20, %v9983_v25  ;;  %v3778_v4 = vrot.slane %v10570_v20, %v9988_v36 }
 0x455   : > { %v6256_v17 = vcombine.low %v6247_v51, %v6254_v49  ;;  %v3782_v32 = vrot.slane %v10570_v20, %v9991_v40  ;;  %v3786_v54 = vrot.slane %v10570_v20, %v9994_v41  ;;  %v6517_v35 = vcombine.low %v3758_v1, %v3762_v24 }
 0x456   : > { %7719 = vperm.xlu0 %8735, %v6516_v0   ;;  %v6263_v63 = vrot.slane %v6255_v29, %v10000_v46  ;;  %v6518_v59 = vcombine.low %v3766_v10, %v3770_v14  ;;  %v6519_v52 = vcombine.low %v3774_v21, %v3778_v4  ;;  %v3694_v18 = vrot.slane %v10615_v26, %v9969_v7 }
 0x457   : > { %v6270_v28 = vrot.slane %v6256_v17, %v10000_v46  ;;  %v3698_v3 = vrot.slane %v10615_v26, %v9974_v11  ;;  %v6520_v15 = vcombine.low %v3782_v32, %v3786_v54  ;;  %v6527_v56 = vrot.slane %v6517_v35, %v10000_v46 }
 0x458   : > { %v6534_v62 = vrot.slane %v6518_v59, %v10000_v46  ;;  %v3702_v61 = vrot.slane %v10615_v26, %v9977_v19  ;;  %v6541_v34 = vrot.slane %v6519_v52, %v10000_v46  ;;  %v3706_v57 = vrot.slane %v10615_v26, %v9980_v23 }
 0x459   : > { %v6271_v20 = vcombine.low %v6263_v63, %v6270_v28  ;;  %v3710_v22 = vrot.slane %v10615_v26, %v9983_v25  ;;  %v11102_v50 = vpop.eup %9016  ;;  %v6548_v2 = vrot.slane %v6520_v15, %v10000_v46  ;;  %v3714_v12 = vrot.slane %v10615_v26, %v9988_v36 }
 0x45a   : > { %v6549_v42 = vcombine.low %v6527_v56, %v6534_v62  ;;  %v3718_v9 = vrot.slane %v10615_v26, %v9991_v40  ;;  %v11109_v38 = vpop.eup %9018  ;;  %v3722_v51 = vrot.slane %v10615_v26, %v9994_v41  ;;  %v6419_v49 = vcombine.low %v3694_v18, %v3698_v3 }
 0x45b   : > { %7704 = vperm.xlu1 %8734, %v6271_v20   ;;  %v6420_v1 = vcombine.low %v3702_v61, %v3706_v57  ;;  %v4046_v24 = vrot.slane %v10777_v33, %v9969_v7  ;;  %v11115_v0 = vpop.eup %9020  ;;  %v6550_v29 = vcombine.low %v6541_v34, %v6548_v2  ;;  %v6421_v14 = vcombine.low %v3710_v22, %v3714_v12 }
 0x45c   : > { %v6557_v10 = vrot.slane %v6549_v42, %v10000_v46  ;;  %v4050_v17 = vrot.slane %v10777_v33, %v9974_v11  ;;  %v6422_v21 = vcombine.low %v3718_v9, %v3722_v51  ;;  %v6429_v4 = vrot.slane %v6419_v49, %v10000_v46 }
 0x45d   : > { %v6436_v32 = vrot.slane %v6420_v1, %v10000_v46  ;;  %v4054_v26 = vrot.slane %v10777_v33, %v9977_v19  ;;  %v6564_v63 = vrot.slane %v6550_v29, %v10000_v46  ;;  %v6443_v54 = vrot.slane %v6421_v14, %v10000_v46 }
 0x45e   : > { %v4058_v35 = vrot.slane %v10777_v33, %v9980_v23  ;;  %v4062_v59 = vrot.slane %v10777_v33, %v9983_v25  ;;  %v6450_v28 = vrot.slane %v6422_v21, %v10000_v46  ;;  %v4066_v18 = vrot.slane %v10777_v33, %v9988_v36 }
 0x45f   : > { %v6451_v52 = vcombine.low %v6429_v4, %v6436_v32  ;;  %v4070_v3 = vrot.slane %v10777_v33, %v9991_v40  ;;  %v6565_v15 = vcombine.low %v6557_v10, %v6564_v63  ;;  %v4074_v56 = vrot.slane %v10777_v33, %v9994_v41 }
 0x460   : > { %v6958_v62 = vcombine.low %v4046_v24, %v4050_v17  ;;  %v6959_v61 = vcombine.low %v4054_v26, %v4058_v35  ;;  %v6452_v20 = vcombine.low %v6443_v54, %v6450_v28  ;;  %v6960_v57 = vcombine.low %v4062_v59, %v4066_v18 }
 0x461   : > { %v6459_v34 = vrot.slane %v6451_v52, %v10000_v46  ;;  %v3790_v22 = vrot.slane %v10577_v60, %v9969_v7  ;;  %7722 = vperm.xlu1 %8734, %v6565_v15   ;;  %v6961_v2 = vcombine.low %v4070_v3, %v4074_v56  ;;  %v3794_v9 = vrot.slane %v10577_v60, %v9974_v11 }
 0x462   : > { %v6968_v42 = vrot.slane %v6958_v62, %v10000_v46  ;;  %v6975_v12 = vrot.slane %v6959_v61, %v10000_v46  ;;  %v6466_v33 = vrot.slane %v6452_v20, %v10000_v46  ;;  %v6982_v51 = vrot.slane %v6960_v57, %v10000_v46 }
 0x463   : > { %v3798_v49 = vrot.slane %v10577_v60, %v9977_v19  ;;  %v3802_v1 = vrot.slane %v10577_v60, %v9980_v23  ;;  %v6989_v24 = vrot.slane %v6961_v2, %v10000_v46  ;;  %v3806_v10 = vrot.slane %v10577_v60, %v9983_v25 }
 0x464   : > { %v6990_v29 = vcombine.low %v6968_v42, %v6975_v12  ;;  %v3810_v14 = vrot.slane %v10577_v60, %v9988_v36  ;;  %v6467_v17 = vcombine.low %v6459_v34, %v6466_v33  ;;  %v3814_v21 = vrot.slane %v10577_v60, %v9991_v40 }
 0x465   : > { %v3818_v4 = vrot.slane %v10577_v60, %v9994_v41  ;;  %v6566_v32 = vcombine.low %v3790_v22, %v3794_v9  ;;  %v6991_v26 = vcombine.low %v6982_v51, %v6989_v24  ;;  %v6567_v54 = vcombine.low %v3798_v49, %v3802_v1 }
 0x466   : > { %v6998_v63 = vrot.slane %v6990_v29, %v10000_v46  ;;  %v6568_v35 = vcombine.low %v3806_v10, %v3810_v14  ;;  %7716 = vperm.xlu1 %8734, %v6467_v17   ;;  %v3982_v52 = vrot.slane %v10823_v45, %v9969_v7  ;;  %v3986_v18 = vrot.slane %v10823_v45, %v9974_v11 }
 0x467   : > { %v6569_v59 = vcombine.low %v3814_v21, %v3818_v4  ;;  %v6576_v28 = vrot.slane %v6566_v32, %v10000_v46  ;;  %v7005_v3 = vrot.slane %v6991_v26, %v10000_v46  ;;  %v6583_v60 = vrot.slane %v6567_v54, %v10000_v46 }
 0x468   : > { %v6590_v15 = vrot.slane %v6568_v35, %v10000_v46  ;;  %v3990_v56 = vrot.slane %v10823_v45, %v9977_v19  ;;  %v3994_v61 = vrot.slane %v10823_v45, %v9980_v23  ;;  %v3998_v20 = vrot.slane %v10823_v45, %v9983_v25 }
 0x469   : > { %v6597_v62 = vrot.slane %v6569_v59, %v10000_v46  ;;  %v4002_v34 = vrot.slane %v10823_v45, %v9988_v36  ;;  %v7006_v57 = vcombine.low %v6998_v63, %v7005_v3  ;;  %v6598_v22 = vcombine.low %v6576_v28, %v6583_v60 }
 0x46a   : > { %v4006_v2 = vrot.slane %v10823_v45, %v9991_v40  ;;  %v4010_v42 = vrot.slane %v10823_v45, %v9994_v41  ;;  %v6860_v9 = vcombine.low %v3982_v52, %v3986_v18  ;;  %v6861_v33 = vcombine.low %v3990_v56, %v3994_v61 }
 0x46b   : > { %v6599_v12 = vcombine.low %v6590_v15, %v6597_v62  ;;  %v6862_v51 = vcombine.low %v3998_v20, %v4002_v34  ;;  %7749 = vperm.xlu0 %8735, %v7006_v57   ;;  %v6606_v49 = vrot.slane %v6598_v22, %v10000_v46  ;;  %v3822_v24 = vrot.slane %v10718_v27, %v9969_v7 }
 0x46c   : > { %v6863_v1 = vcombine.low %v4006_v2, %v4010_v42  ;;  %v3826_v29 = vrot.slane %v10718_v27, %v9974_v11  ;;  %v6870_v14 = vrot.slane %v6860_v9, %v10000_v46  ;;  %v6877_v45 = vrot.slane %v6861_v33, %v10000_v46 }
 0x46d   : > { %v6613_v10 = vrot.slane %v6599_v12, %v10000_v46  ;;  %v6884_v17 = vrot.slane %v6862_v51, %v10000_v46  ;;  %v3830_v4 = vrot.slane %v10718_v27, %v9977_v19  ;;  %v3834_v32 = vrot.slane %v10718_v27, %v9980_v23 }
 0x46e   : > { %v6891_v21 = vrot.slane %v6863_v1, %v10000_v46  ;;  %v3838_v26 = vrot.slane %v10718_v27, %v9983_v25  ;;  %v6892_v54 = vcombine.low %v6870_v14, %v6877_v45  ;;  %v3842_v35 = vrot.slane %v10718_v27, %v9988_v36 }
 0x46f   : > { %v6614_v63 = vcombine.low %v6606_v49, %v6613_v10  ;;  %v3846_v59 = vrot.slane %v10718_v27, %v9991_v40  ;;  %v3850_v52 = vrot.slane %v10718_v27, %v9994_v41  ;;  %v6615_v18 = vcombine.low %v3822_v24, %v3826_v29 }
 0x470   : > { %v6893_v28 = vcombine.low %v6884_v17, %v6891_v21  ;;  %v6616_v3 = vcombine.low %v3830_v4, %v3834_v32  ;;  %v6900_v60 = vrot.slane %v6892_v54, %v10000_v46  ;;  %v6617_v15 = vcombine.low %v3838_v26, %v3842_v35 }
 0x471   : > { %7725 = vperm.xlu1 %8734, %v6614_v63   ;;  %v4174_v56 = vrot.slane %v10916_v13, %v9969_v7  ;;  %v4178_v62 = vrot.slane %v10916_v13, %v9974_v11  ;;  %v6618_v20 = vcombine.low %v3846_v59, %v3850_v52  ;;  %v6625_v34 = vrot.slane %v6615_v18, %v10000_v46 }
 0x472   : > { %v6907_v61 = vrot.slane %v6893_v28, %v10000_v46  ;;  %v6632_v57 = vrot.slane %v6616_v3, %v10000_v46  ;;  %v6639_v27 = vrot.slane %v6617_v15, %v10000_v46  ;;  %v4182_v22 = vrot.slane %v10916_v13, %v9977_v19 }
 0x473   : > { %v4186_v2 = vrot.slane %v10916_v13, %v9980_v23  ;;  %v4190_v42 = vrot.slane %v10916_v13, %v9983_v25  ;;  %v6646_v9 = vrot.slane %v6618_v20, %v10000_v46  ;;  %v4194_v51 = vrot.slane %v10916_v13, %v9988_v36 }
 0x474   : > { %v6908_v12 = vcombine.low %v6900_v60, %v6907_v61  ;;  %v6647_v33 = vcombine.low %v6625_v34, %v6632_v57  ;;  %v4198_v49 = vrot.slane %v10916_v13, %v9991_v40  ;;  %v4202_v1 = vrot.slane %v10916_v13, %v9994_v41 }
 0x475   : > { %v7154_v24 = vcombine.low %v4174_v56, %v4178_v62  ;;  %v7155_v29 = vcombine.low %v4182_v22, %v4186_v2  ;;  %v6648_v10 = vcombine.low %v6639_v27, %v6646_v9  ;;  %v7156_v45 = vcombine.low %v4190_v42, %v4194_v51  ;;  %v11247_v62 = vpop.permute.xlu1 %7602 }
 0x476   : > { %7743 = vperm.xlu0 %8735, %v6908_v12   ;;  %v6655_v14 = vrot.slane %v6647_v33, %v10000_v46  ;;  %v3854_v17 = vrot.slane %v10727_v37, %v9969_v7  ;;  %v7157_v21 = vcombine.low %v4198_v49, %v4202_v1  ;;  %v3858_v26 = vrot.slane %v10727_v37, %v9974_v11 }
 0x477   : > { %v7164_v4 = vrot.slane %v7154_v24, %v10000_v46  ;;  %v7171_v32 = vrot.slane %v7155_v29, %v10000_v46  ;;  %v6662_v13 = vrot.slane %v6648_v10, %v10000_v46  ;;  %v7178_v63 = vrot.slane %v7156_v45, %v10000_v46 }
 0x478   : > { %v3862_v54 = vrot.slane %v10727_v37, %v9977_v19  ;;  %v3866_v35 = vrot.slane %v10727_v37, %v9980_v23  ;;  %v7185_v59 = vrot.slane %v7157_v21, %v10000_v46  ;;  %v3870_v52 = vrot.slane %v10727_v37, %v9983_v25 }
 0x479   : > { %v7186_v28 = vcombine.low %v7164_v4, %v7171_v32  ;;  %v3874_v18 = vrot.slane %v10727_v37, %v9988_v36  ;;  %v6663_v3 = vcombine.low %v6655_v14, %v6662_v13  ;;  %v3878_v60 = vrot.slane %v10727_v37, %v9991_v40 }
 0x47a   : > { %v3882_v15 = vrot.slane %v10727_v37, %v9994_v41  ;;  %v6664_v56 = vcombine.low %v3854_v17, %v3858_v26  ;;  %v7187_v61 = vcombine.low %v7178_v63, %v7185_v59  ;;  %v6665_v34 = vcombine.low %v3862_v54, %v3866_v35  ;;  %v11271_v26 = vpop.permute.xlu1 %7605 }
 0x47b   : > { %v7194_v20 = vrot.slane %v7186_v28, %v10000_v46  ;;  %v6666_v57 = vcombine.low %v3870_v52, %v3874_v18  ;;  %7728 = vperm.xlu1 %8734, %v6663_v3   ;;  %v4110_v2 = vrot.slane %v10968_v8, %v9969_v7  ;;  %v4114_v42 = vrot.slane %v10968_v8, %v9974_v11 }
 0x47c   : > { %v6667_v27 = vcombine.low %v3878_v60, %v3882_v15  ;;  %v6674_v22 = vrot.slane %v6664_v56, %v10000_v46  ;;  %v7201_v37 = vrot.slane %v7187_v61, %v10000_v46  ;;  %v6681_v12 = vrot.slane %v6665_v34, %v10000_v46 }
 0x47d   : > { %v6688_v9 = vrot.slane %v6666_v57, %v10000_v46  ;;  %v4118_v33 = vrot.slane %v10968_v8, %v9977_v19  ;;  %v4122_v49 = vrot.slane %v10968_v8, %v9980_v23  ;;  %v4126_v1 = vrot.slane %v10968_v8, %v9983_v25 }
 0x47e   : > { %v6695_v51 = vrot.slane %v6667_v27, %v10000_v46  ;;  %v4130_v24 = vrot.slane %v10968_v8, %v9988_v36  ;;  %v7202_v29 = vcombine.low %v7194_v20, %v7201_v37  ;;  %v6696_v10 = vcombine.low %v6674_v22, %v6681_v12 }
 0x47f   : > { %v4134_v14 = vrot.slane %v10968_v8, %v9991_v40  ;;  %v4138_v45 = vrot.slane %v10968_v8, %v9994_v41  ;;  %v7056_v21 = vcombine.low %v4110_v2, %v4114_v42  ;;  %v7057_v4 = vcombine.low %v4118_v33, %v4122_v49  ;;  %v11300_v33 = vpop.permute.xlu1 %7599 }
 0x480   : > { %v6697_v17 = vcombine.low %v6688_v9, %v6695_v51  ;;  %v7058_v32 = vcombine.low %v4126_v1, %v4130_v24  ;;  %7761 = vperm.xlu0 %8735, %v7202_v29   ;;  %v6704_v13 = vrot.slane %v6696_v10, %v10000_v46  ;;  %v4014_v54 = vrot.slane %v10770_v55, %v9969_v7 }
 0x481   : > { %v7059_v63 = vcombine.low %v4134_v14, %v4138_v45  ;;  %v4018_v35 = vrot.slane %v10770_v55, %v9974_v11  ;;  %v7066_v8 = vrot.slane %v7056_v21, %v10000_v46  ;;  %v7073_v28 = vrot.slane %v7057_v4, %v10000_v46 }
 0x482   : > { %v6711_v59 = vrot.slane %v6697_v17, %v10000_v46  ;;  %v7080_v52 = vrot.slane %v7058_v32, %v10000_v46  ;;  %v4022_v3 = vrot.slane %v10770_v55, %v9977_v19  ;;  %v4026_v60 = vrot.slane %v10770_v55, %v9980_v23 }
 0x483   : > { %v7087_v18 = vrot.slane %v7059_v63, %v10000_v46  ;;  %v4030_v15 = vrot.slane %v10770_v55, %v9983_v25  ;;  %v7088_v61 = vcombine.low %v7066_v8, %v7073_v28  ;;  %v4034_v20 = vrot.slane %v10770_v55, %v9988_v36 }
 0x484   : > { %v6712_v56 = vcombine.low %v6704_v13, %v6711_v59  ;;  %v4038_v34 = vrot.slane %v10770_v55, %v9991_v40  ;;  %v4042_v27 = vrot.slane %v10770_v55, %v9994_v41  ;;  %v6909_v22 = vcombine.low %v4014_v54, %v4018_v35 }
 0x485   : > { %v7089_v57 = vcombine.low %v7080_v52, %v7087_v18  ;;  %v6910_v2 = vcombine.low %v4022_v3, %v4026_v60  ;;  %v7096_v42 = vrot.slane %v7088_v61, %v10000_v46  ;;  %v6911_v37 = vcombine.low %v4030_v15, %v4034_v20  ;;  %v11326_v15 = vpop.permute.xlu1 %7614 }
 0x486   : > { %7731 = vperm.xlu1 %8734, %v6712_v56   ;;  %v4270_v12 = vrot.slane %v11003_v5, %v9969_v7  ;;  %v4274_v9 = vrot.slane %v11003_v5, %v9974_v11  ;;  %v6912_v49 = vcombine.low %v4038_v34, %v4042_v27  ;;  %v6919_v1 = vrot.slane %v6909_v22, %v10000_v46 }
 0x487   : > { %v7103_v51 = vrot.slane %v7089_v57, %v10000_v46  ;;  %v6926_v55 = vrot.slane %v6910_v2, %v10000_v46  ;;  %v6933_v24 = vrot.slane %v6911_v37, %v10000_v46  ;;  %v4278_v29 = vrot.slane %v11003_v5, %v9977_v19 }
 0x488   : > { %v4282_v10 = vrot.slane %v11003_v5, %v9980_v23  ;;  %v4286_v14 = vrot.slane %v11003_v5, %v9983_v25  ;;  %v6940_v17 = vrot.slane %v6912_v49, %v10000_v46  ;;  %v4290_v4 = vrot.slane %v11003_v5, %v9988_v36 }
 0x489   : > { %v7104_v45 = vcombine.low %v7096_v42, %v7103_v51  ;;  %v6941_v21 = vcombine.low %v6919_v1, %v6926_v55  ;;  %v4294_v32 = vrot.slane %v11003_v5, %v9991_v40  ;;  %v4298_v13 = vrot.slane %v11003_v5, %v9994_v41 }
 0x48a   : > { %v7301_v63 = vcombine.low %v4270_v12, %v4274_v9  ;;  %v7302_v54 = vcombine.low %v4278_v29, %v4282_v10  ;;  %v6942_v35 = vcombine.low %v6933_v24, %v6940_v17  ;;  %v7303_v8 = vcombine.low %v4286_v14, %v4290_v4 }
 0x48b   : > { %7755 = vperm.xlu0 %8735, %v7104_v45   ;;  %v6949_v59 = vrot.slane %v6941_v21, %v10000_v46  ;;  %v3950_v28 = vrot.slane %v10815_v43, %v9969_v7  ;;  %v7304_v52 = vcombine.low %v4294_v32, %v4298_v13  ;;  %v3954_v60 = vrot.slane %v10815_v43, %v9974_v11  ;;  %v11354_v21 = vpop.permute.xlu1 %7608 }
 0x48c   : > { %v7311_v18 = vrot.slane %v7301_v63, %v10000_v46  ;;  %v7318_v3 = vrot.slane %v7302_v54, %v10000_v46  ;;  %v6956_v5 = vrot.slane %v6942_v35, %v10000_v46  ;;  %v7325_v56 = vrot.slane %v7303_v8, %v10000_v46 }
 0x48d   : > { %v3958_v61 = vrot.slane %v10815_v43, %v9977_v19  ;;  %v3962_v20 = vrot.slane %v10815_v43, %v9980_v23  ;;  %v7332_v34 = vrot.slane %v7304_v52, %v10000_v46  ;;  %v3966_v27 = vrot.slane %v10815_v43, %v9983_v25 }
 0x48e   : > { %v7333_v57 = vcombine.low %v7311_v18, %v7318_v3  ;;  %v3970_v22 = vrot.slane %v10815_v43, %v9988_v36  ;;  %v6957_v2 = vcombine.low %v6949_v59, %v6956_v5  ;;  %v3974_v42 = vrot.slane %v10815_v43, %v9991_v40 }
 0x48f   : > { %v3978_v37 = vrot.slane %v10815_v43, %v9994_v41  ;;  %v6811_v12 = vcombine.low %v3950_v28, %v3954_v60  ;;  %v7334_v9 = vcombine.low %v7325_v56, %v7332_v34  ;;  %v6812_v49 = vcombine.low %v3958_v61, %v3962_v20 }
 0x490   : > { %v7341_v51 = vrot.slane %v7333_v57, %v10000_v46  ;;  %v6813_v1 = vcombine.low %v3966_v27, %v3970_v22  ;;  %7746 = vperm.xlu1 %8734, %v6957_v2   ;;  %v4302_v29 = vrot.slane %v11013_v16, %v9969_v7  ;;  %v4306_v10 = vrot.slane %v11013_v16, %v9974_v11 }
 0x491   : > { %v6814_v55 = vcombine.low %v3974_v42, %v3978_v37  ;;  %v6821_v24 = vrot.slane %v6811_v12, %v10000_v46  ;;  %v7348_v14 = vrot.slane %v7334_v9, %v10000_v46  ;;  %v6828_v43 = vrot.slane %v6812_v49, %v10000_v46  ;;  %v11383_v37 = vpop.permute.xlu1 %7617 }
 0x492   : > { %v6835_v45 = vrot.slane %v6813_v1, %v10000_v46  ;;  %v4310_v17 = vrot.slane %v11013_v16, %v9977_v19  ;;  %v4314_v32 = vrot.slane %v11013_v16, %v9980_v23  ;;  %v4318_v13 = vrot.slane %v11013_v16, %v9983_v25 }
 0x493   : > { %v6842_v4 = vrot.slane %v6814_v55, %v10000_v46  ;;  %v4322_v63 = vrot.slane %v11013_v16, %v9988_v36  ;;  %v7349_v54 = vcombine.low %v7341_v51, %v7348_v14  ;;  %v6843_v35 = vcombine.low %v6821_v24, %v6828_v43 }
 0x494   : > { %v4326_v59 = vrot.slane %v11013_v16, %v9991_v40  ;;  %v4330_v8 = vrot.slane %v11013_v16, %v9994_v41  ;;  %v7350_v52 = vcombine.low %v4302_v29, %v4306_v10  ;;  %v7351_v18 = vcombine.low %v4310_v17, %v4314_v32 }
 0x495   : > { %v6844_v28 = vcombine.low %v6835_v45, %v6842_v4  ;;  %v7352_v3 = vcombine.low %v4318_v13, %v4322_v63  ;;  %7770 = vperm.xlu0 %8735, %v7349_v54   ;;  %v6851_v60 = vrot.slane %v6843_v35, %v10000_v46  ;;  %v4142_v56 = vrot.slane %v10867_v31, %v9969_v7 }
 0x496   : > { %v7353_v5 = vcombine.low %v4326_v59, %v4330_v8  ;;  %v4146_v61 = vrot.slane %v10867_v31, %v9974_v11  ;;  %v7360_v34 = vrot.slane %v7350_v52, %v10000_v46  ;;  %v7367_v16 = vrot.slane %v7351_v18, %v10000_v46  ;;  %v11409_v18 = vpop.permute.xlu1 %7611 }
 0x497   : > { %v6858_v20 = vrot.slane %v6844_v28, %v10000_v46  ;;  %v7374_v57 = vrot.slane %v7352_v3, %v10000_v46  ;;  %v4150_v22 = vrot.slane %v10867_v31, %v9977_v19  ;;  %v4154_v2 = vrot.slane %v10867_v31, %v9980_v23 }
 0x498   : > { %v7381_v27 = vrot.slane %v7353_v5, %v10000_v46  ;;  %v4158_v42 = vrot.slane %v10867_v31, %v9983_v25  ;;  %v7382_v9 = vcombine.low %v7360_v34, %v7367_v16  ;;  %v4162_v51 = vrot.slane %v10867_v31, %v9988_v36 }
 0x499   : > { %v6859_v12 = vcombine.low %v6851_v60, %v6858_v20  ;;  %v4166_v49 = vrot.slane %v10867_v31, %v9991_v40  ;;  %v4170_v55 = vrot.slane %v10867_v31, %v9994_v41  ;;  %v7105_v24 = vcombine.low %v4142_v56, %v4146_v61 }
 0x49a   : > { %v7383_v1 = vcombine.low %v7374_v57, %v7381_v27  ;;  %v7106_v29 = vcombine.low %v4150_v22, %v4154_v2  ;;  %v7390_v10 = vrot.slane %v7382_v9, %v10000_v46  ;;  %v7107_v14 = vcombine.low %v4158_v42, %v4162_v51 }
 0x49b   : > { %7740 = vperm.xlu1 %8734, %v6859_v12   ;;  %v4238_v43 = vrot.slane %v11061_v44, %v9969_v7  ;;  %v4242_v45 = vrot.slane %v11061_v44, %v9974_v11  ;;  %v7108_v4 = vcombine.low %v4166_v49, %v4170_v55  ;;  %v7115_v32 = vrot.slane %v7105_v24, %v10000_v46  ;;  %v11433_v24 = vpop.permute.xlu0 %7596 }
 0x49c   : > { %v7397_v17 = vrot.slane %v7383_v1, %v10000_v46  ;;  %v7122_v13 = vrot.slane %v7106_v29, %v10000_v46  ;;  %v7129_v31 = vrot.slane %v7107_v14, %v10000_v46  ;;  %v4246_v63 = vrot.slane %v11061_v44, %v9977_v19 }
 0x49d   : > { %v4250_v54 = vrot.slane %v11061_v44, %v9980_v23  ;;  %v4254_v35 = vrot.slane %v11061_v44, %v9983_v25  ;;  %v7136_v8 = vrot.slane %v7108_v4, %v10000_v46  ;;  %v4258_v52 = vrot.slane %v11061_v44, %v9988_v36 }
 0x49e   : > { %v7398_v59 = vcombine.low %v7390_v10, %v7397_v17  ;;  %v7137_v28 = vcombine.low %v7115_v32, %v7122_v13  ;;  %v4262_v3 = vrot.slane %v11061_v44, %v9991_v40  ;;  %v4266_v60 = vrot.slane %v11061_v44, %v9994_v41 }
 0x49f   : > { %v7252_v5 = vcombine.low %v4238_v43, %v4242_v45  ;;  %v7253_v56 = vcombine.low %v4246_v63, %v4250_v54  ;;  %v7138_v61 = vcombine.low %v7129_v31, %v7136_v8  ;;  %v7254_v34 = vcombine.low %v4254_v35, %v4258_v52  ;;  %v11439_v45 = vpop.permute.xlu1 %7626  ;;  %v11452_v52 = vpop.permute.xlu0 %7629 }
 0x4a0   : > { %7773 = vperm.xlu0 %8735, %v7398_v59   ;;  %v7145_v20 = vrot.slane %v7137_v28, %v10000_v46  ;;  %v4078_v16 = vrot.slane %v10923_v30, %v9969_v7  ;;  %v7255_v57 = vcombine.low %v4262_v3, %v4266_v60  ;;  %v4082_v2 = vrot.slane %v10923_v30, %v9974_v11 }
 0x4a1   : > { %v7262_v27 = vrot.slane %v7252_v5, %v10000_v46  ;;  %v7269_v22 = vrot.slane %v7253_v56, %v10000_v46  ;;  %v7152_v44 = vrot.slane %v7138_v61, %v10000_v46  ;;  %v7276_v42 = vrot.slane %v7254_v34, %v10000_v46 }
 0x4a2   : > { %v4086_v12 = vrot.slane %v10923_v30, %v9977_v19  ;;  %v4090_v9 = vrot.slane %v10923_v30, %v9980_v23  ;;  %v7283_v51 = vrot.slane %v7255_v57, %v10000_v46  ;;  %v4094_v1 = vrot.slane %v10923_v30, %v9983_v25 }
 0x4a3   : > { %v7284_v49 = vcombine.low %v7262_v27, %v7269_v22  ;;  %v4098_v55 = vrot.slane %v10923_v30, %v9988_v36  ;;  %v7153_v29 = vcombine.low %v7145_v20, %v7152_v44  ;;  %v4102_v10 = vrot.slane %v10923_v30, %v9991_v40  ;;  %v11465_v44 = vpop.permute.xlu1 %7620 }
 0x4a4   : > { %v4106_v14 = vrot.slane %v10923_v30, %v9994_v41  ;;  %v7007_v43 = vcombine.low %v4078_v16, %v4082_v2  ;;  %v7285_v17 = vcombine.low %v7276_v42, %v7283_v51  ;;  %v7008_v32 = vcombine.low %v4086_v12, %v4090_v9 }
 0x4a5   : > { %v7292_v4 = vrot.slane %v7284_v49, %v10000_v46  ;;  %v7009_v13 = vcombine.low %v4094_v1, %v4098_v55  ;;  %7758 = vperm.xlu1 %8734, %v7153_v29   ;;  %v4398_v54 = vrot.slane %v11109_v38, %v9969_v7  ;;  %v4402_v35 = vrot.slane %v11109_v38, %v9974_v11 }
 0x4a6   : > { %v7010_v31 = vcombine.low %v4102_v10, %v4106_v14  ;;  %v7017_v63 = vrot.slane %v7007_v43, %v10000_v46  ;;  %v7299_v30 = vrot.slane %v7285_v17, %v10000_v46  ;;  %v7024_v59 = vrot.slane %v7008_v32, %v10000_v46  ;;  %v11481_v43 = vpop.permute.xlu0 %7623 }
 0x4a7   : > { %v7031_v8 = vrot.slane %v7009_v13, %v10000_v46  ;;  %v4406_v28 = vrot.slane %v11109_v38, %v9977_v19  ;;  %v4410_v60 = vrot.slane %v11109_v38, %v9980_v23  ;;  %v4414_v5 = vrot.slane %v11109_v38, %v9983_v25 }
 0x4a8   : > { %v7038_v3 = vrot.slane %v7010_v31, %v10000_v46  ;;  %v4418_v56 = vrot.slane %v11109_v38, %v9988_v36  ;;  %v7300_v61 = vcombine.low %v7292_v4, %v7299_v30  ;;  %v7039_v20 = vcombine.low %v7017_v63, %v7024_v59 }
 0x4a9   : > { %v4422_v34 = vrot.slane %v11109_v38, %v9991_v40  ;;  %v4426_v16 = vrot.slane %v11109_v38, %v9994_v41  ;;  %v7497_v27 = vcombine.low %v4398_v54, %v4402_v35  ;;  %v7498_v22 = vcombine.low %v4406_v28, %v4410_v60 }
 0x4aa   : > { %v7040_v57 = vcombine.low %v7031_v8, %v7038_v3  ;;  %v7499_v2 = vcombine.low %v4414_v5, %v4418_v56  ;;  %v2280_v42 = vadd.f32 1.0, %v11102_v50  ;;  %7767 = vperm.xlu0 %8735, %v7300_v61   ;;  %v7047_v12 = vrot.slane %v7039_v20, %v10000_v46  ;;  %v11494_v8 = vpop.permute.xlu1 %7638 }
 0x4ab   : > { %v7500_v9 = vcombine.low %v4422_v34, %v4426_v16  ;;  %v4206_v51 = vrot.slane %v11055_v47, %v9969_v7  ;;  %v7507_v1 = vrot.slane %v7497_v27, %v10000_v46  ;;  %v7514_v38 = vrot.slane %v7498_v22, %v10000_v46  ;;  %v11504_v16 = vpop.permute.xlu0 %7641 }
 0x4ac   : > { %v7054_v49 = vrot.slane %v7040_v57, %v10000_v46  ;;  %v7521_v55 = vrot.slane %v7499_v2, %v10000_v46  ;;  %v2266_v29 = vadd.f32 1.0, %v10667_v39  ;;  %v4210_v50 = vrot.slane %v11055_v47, %v9974_v11  ;;  %11949 = vst [vmem:[#allocation21_spill] sm:$0xff] %v11504_v16 }
 0x4ad   : > { %v7528_v10 = vrot.slane %v7500_v9, %v10000_v46  ;;  %v4214_v14 = vrot.slane %v11055_v47, %v9977_v19  ;;  %v7529_v4 = vcombine.low %v7507_v1, %v7514_v38  ;;  %v4218_v32 = vrot.slane %v11055_v47, %v9980_v23 }
 0x4ae   : > { %v7055_v17 = vcombine.low %v7047_v12, %v7054_v49  ;;  %v4222_v13 = vrot.slane %v11055_v47, %v9983_v25  ;;  %9022 = vrcp.f32 %v2280_v42  ;;  %v4226_v31 = vrot.slane %v11055_v47, %v9988_v36 }
 0x4af   : > { %v7530_v39 = vcombine.low %v7521_v55, %v7528_v10  ;;  %v4230_v63 = vrot.slane %v11055_v47, %v9991_v40  ;;  %v7537_v54 = vrot.slane %v7529_v4, %v10000_v46  ;;  %v4234_v35 = vrot.slane %v11055_v47, %v9994_v41 }
 0x4b0   : > { %7752 = vperm.xlu1 %8734, %v7055_v17   ;;  %v7203_v30 = vcombine.low %v4206_v51, %v4210_v50  ;;  %v7204_v59 = vcombine.low %v4214_v14, %v4218_v32  ;;  %v7205_v3 = vcombine.low %v4222_v13, %v4226_v31  ;;  %v4334_v61 = vrot.slane %v11115_v0, %v9969_v7 }
 0x4b1   : > { %v7544_v28 = vrot.slane %v7530_v39, %v10000_v46  ;;  %v7206_v60 = vcombine.low %v4230_v63, %v4234_v35  ;;  %9024 = vrcp.f32 %v2266_v29  ;;  %v4338_v47 = vrot.slane %v11115_v0, %v9974_v11  ;;  %v11520_v29 = vpop.permute.xlu1 %7632 }
 0x4b2   : > { %v7213_v5 = vrot.slane %v7203_v30, %v10000_v46  ;;  %v7220_v56 = vrot.slane %v7204_v59, %v10000_v46  ;;  %v7227_v34 = vrot.slane %v7205_v3, %v10000_v46  ;;  %v4342_v22 = vrot.slane %v11115_v0, %v9977_v19 }
 0x4b3   : > { %v7545_v20 = vcombine.low %v7537_v54, %v7544_v28  ;;  %v7234_v57 = vrot.slane %v7206_v60, %v10000_v46  ;;  %v4346_v2 = vrot.slane %v11115_v0, %v9980_v23  ;;  %v4350_v42 = vrot.slane %v11115_v0, %v9983_v25  ;;  %v11534_v54 = vpop.permute.xlu0 %7635 }
 0x4b4   : > { %v7235_v27 = vcombine.low %v7213_v5, %v7220_v56  ;;  %v4354_v12 = vrot.slane %v11115_v0, %v9988_v36  ;;  %v4358_v9 = vrot.slane %v11115_v0, %v9991_v40  ;;  %v4362_v51 = vrot.slane %v11115_v0, %v9994_v41 }
 0x4b5   : > { %7782 = vperm.xlu0 %8735, %v7545_v20   ;;  %v7236_v49 = vcombine.low %v7227_v34, %v7234_v57  ;;  %v7399_v38 = vcombine.low %v4334_v61, %v4338_v47  ;;  %v7400_v55 = vcombine.low %v4342_v22, %v4346_v2  ;;  %v2282_v10 = vadd.f32 1.0, %v11064_v6  ;;  %v11547_v47 = vpop.permute.xlu1 %7650 }
 0x4b6   : > { %v7243_v1 = vrot.slane %v7235_v27, %v10000_v46  ;;  %v7401_v50 = vcombine.low %v4350_v42, %v4354_v12  ;;  %v7402_v14 = vcombine.low %v4358_v9, %v4362_v51  ;;  %v3886_v17 = vrot.slane %v10677_v53, %v9969_v7 }
 0x4b7   : > { %v7250_v4 = vrot.slane %v7236_v49, %v10000_v46  ;;  %v7409_v32 = vrot.slane %v7399_v38, %v10000_v46  ;;  %v7416_v0 = vrot.slane %v7400_v55, %v10000_v46  ;;  %v3890_v13 = vrot.slane %v10677_v53, %v9974_v11 }
 0x4b8   : > { %v9023_v39 = vpop.eup %9022  ;;  %v7423_v31 = vrot.slane %v7401_v50, %v10000_v46  ;;  %v7430_v63 = vrot.slane %v7402_v14, %v10000_v46  ;;  %v3894_v6 = vrot.slane %v10677_v53, %v9977_v19  ;;  %v3898_v59 = vrot.slane %v10677_v53, %v9980_v23 }
 0x4b9   : > { %v7251_v35 = vcombine.low %v7243_v1, %v7250_v4  ;;  %v7431_v30 = vcombine.low %v7409_v32, %v7416_v0  ;;  %v3902_v28 = vrot.slane %v10677_v53, %v9983_v25  ;;  %9026 = vrcp.f32 %v2282_v10  ;;  %v11558_v10 = vpop.permute.xlu0 %7653 }
 0x4ba   : > { %v7432_v3 = vcombine.low %v7423_v31, %v7430_v63  ;;  %v3906_v60 = vrot.slane %v10677_v53, %v9988_v36  ;;  %v3910_v5 = vrot.slane %v10677_v53, %v9991_v40  ;;  %v3914_v61 = vrot.slane %v10677_v53, %v9994_v41 }
 0x4bb   : > { %7764 = vperm.xlu1 %8734, %v7251_v35   ;;  %v7439_v56 = vrot.slane %v7431_v30, %v10000_v46  ;;  %v6713_v20 = vcombine.low %v3886_v17, %v3890_v13  ;;  %v6714_v34 = vcombine.low %v3894_v6, %v3898_v59  ;;  %v9025_v57 = vpop.eup %9024  ;;  %v4366_v2 = vrot.slane %v9023_v39, %v9969_v7  ;;  %v11565_v35 = vpop.permute.xlu1 %7644 }
 0x4bc   : > { %v7446_v27 = vrot.slane %v7432_v3, %v10000_v46  ;;  %v6715_v22 = vcombine.low %v3902_v28, %v3906_v60  ;;  %v4370_v42 = vrot.slane %v9023_v39, %v9974_v11  ;;  %v6716_v12 = vcombine.low %v3910_v5, %v3914_v61 }
 0x4bd   : > { %v6723_v9 = vrot.slane %v6713_v20, %v10000_v46  ;;  %v6730_v51 = vrot.slane %v6714_v34, %v10000_v46  ;;  %v4374_v49 = vrot.slane %v9023_v39, %v9977_v19  ;;  %v4378_v38 = vrot.slane %v9023_v39, %v9980_v23  ;;  %v11574_v34 = vpop.permute.xlu0 %7647 }
 0x4be   : > { %v7447_v53 = vcombine.low %v7439_v56, %v7446_v27  ;;  %v6737_v1 = vrot.slane %v6715_v22, %v10000_v46  ;;  %v4382_v55 = vrot.slane %v9023_v39, %v9983_v25  ;;  %v6744_v50 = vrot.slane %v6716_v12, %v10000_v46 }
 0x4bf   : > { %v6745_v14 = vcombine.low %v6723_v9, %v6730_v51  ;;  %v4386_v17 = vrot.slane %v9023_v39, %v9988_v36  ;;  %v4390_v4 = vrot.slane %v9023_v39, %v9991_v40  ;;  %v4394_v32 = vrot.slane %v9023_v39, %v9994_v41 }
 0x4c0   : > { %7776 = vperm.xlu0 %8735, %v7447_v53   ;;  %v7448_v0 = vcombine.low %v4366_v2, %v4370_v42  ;;  %v7449_v13 = vcombine.low %v4374_v49, %v4378_v38  ;;  %v6746_v31 = vcombine.low %v6737_v1, %v6744_v50  ;;  %v3918_v5 = vrot.slane %v9025_v57, %v9969_v7  ;;  %v11583_v38 = vpop.permute.xlu1 %7662 }
 0x4c1   : > { %v6753_v63 = vrot.slane %v6745_v14, %v10000_v46  ;;  %v7450_v6 = vcombine.low %v4382_v55, %v4386_v17  ;;  %v7451_v30 = vcombine.low %v4390_v4, %v4394_v32  ;;  %v3922_v20 = vrot.slane %v9025_v57, %v9974_v11 }
 0x4c2   : > { %v7458_v59 = vrot.slane %v7448_v0, %v10000_v46  ;;  %v7465_v28 = vrot.slane %v7449_v13, %v10000_v46  ;;  %v6760_v3 = vrot.slane %v6746_v31, %v10000_v46  ;;  %v3926_v22 = vrot.slane %v9025_v57, %v9977_v19 }
 0x4c3   : > { %v7472_v60 = vrot.slane %v7450_v6, %v10000_v46  ;;  %v9027_v39 = vpop.eup %9026  ;;  %v7479_v56 = vrot.slane %v7451_v30, %v10000_v46  ;;  %v3930_v2 = vrot.slane %v9025_v57, %v9980_v23  ;;  %v3934_v42 = vrot.slane %v9025_v57, %v9983_v25  ;;  %v11593_v30 = vpop.permute.xlu0 %7665 }
 0x4c4   : > { %v7480_v61 = vcombine.low %v7458_v59, %v7465_v28  ;;  %v6761_v27 = vcombine.low %v6753_v63, %v6760_v3  ;;  %v3938_v51 = vrot.slane %v9025_v57, %v9988_v36  ;;  %v3942_v49 = vrot.slane %v9025_v57, %v9991_v40 }
 0x4c5   : > { %v7481_v12 = vcombine.low %v7472_v60, %v7479_v56  ;;  %v3946_v53 = vrot.slane %v9025_v57, %v9994_v41  ;;  %v6762_v1 = vcombine.low %v3918_v5, %v3922_v20  ;;  %v6763_v50 = vcombine.low %v3926_v22, %v3930_v2  ;;  %v11600_v20 = vpop.permute.xlu1 %7656 }
 0x4c6   : > { %v7488_v9 = vrot.slane %v7480_v61, %v10000_v46  ;;  %7734 = vperm.xlu1 %8734, %v6761_v27   ;;  %v6764_v14 = vcombine.low %v3934_v42, %v3938_v51  ;;  %v4430_v17 = vrot.slane %v9027_v39, %v9969_v7  ;;  %v4434_v0 = vrot.slane %v9027_v39, %v9974_v11 }
 0x4c7   : > { %v7495_v55 = vrot.slane %v7481_v12, %v10000_v46  ;;  %v6765_v4 = vcombine.low %v3942_v49, %v3946_v53  ;;  %v6772_v32 = vrot.slane %v6762_v1, %v10000_v46  ;;  %v4438_v13 = vrot.slane %v9027_v39, %v9977_v19 }
 0x4c8   : > { %v6779_v63 = vrot.slane %v6763_v50, %v10000_v46  ;;  %v6786_v57 = vrot.slane %v6764_v14, %v10000_v46  ;;  %v4442_v6 = vrot.slane %v9027_v39, %v9980_v23  ;;  %v4446_v7 = vrot.slane %v9027_v39, %v9983_v25 }
 0x4c9   : > { %v7496_v31 = vcombine.low %v7488_v9, %v7495_v55  ;;  %v6793_v59 = vrot.slane %v6765_v4, %v10000_v46  ;;  %v4450_v28 = vrot.slane %v9027_v39, %v9988_v36  ;;  %v4454_v3 = vrot.slane %v9027_v39, %v9991_v40  ;;  %v11609_v51 = vpop.permute.xlu1 %7674 }
 0x4ca   : > { %v6794_v11 = vcombine.low %v6772_v32, %v6779_v63  ;;  %v4458_v19 = vrot.slane %v9027_v39, %v9994_v41  ;;  %v7546_v60 = vcombine.low %v4430_v17, %v4434_v0  ;;  %v7547_v5 = vcombine.low %v4438_v13, %v4442_v6  ;;  %v7660_v39 = vpop.permute.xlu0 %7659 }
 0x4cb   : > { %7779 = vperm.xlu0 %8735, %v7496_v31   ;;  %v6795_v56 = vcombine.low %v6786_v57, %v6793_v59  ;;  %v7548_v61 = vcombine.low %v4446_v7, %v4450_v28  ;;  %v11612_v49 = vand.u32 127, %v11930_v48 }
 0x4cc   : > { %v6802_v23 = vrot.slane %v6794_v11, %v10000_v46  ;;  %v7549_v27 = vcombine.low %v4454_v3, %v4458_v19  ;;  %v7556_v22 = vrot.slane %v7546_v60, %v10000_v46  ;;  %v7563_v25 = vrot.slane %v7547_v5, %v10000_v46 }
 0x4cd   : > { %v6809_v36 = vrot.slane %v6795_v56, %v10000_v46  ;;  %v7570_v40 = vrot.slane %v7548_v61, %v10000_v46  ;;  %v7800_v50 = vadd.s32 4294967280, %v11612_v49  ;;  %v7807_v14 = vadd.s32 4294967272, %v11612_v49  ;;  %v7669_v4 = vpop.permute.xlu1 %7668 }
 0x4ce   : > { %v7577_v2 = vrot.slane %v7549_v27, %v10000_v46  ;;  %v7578_v41 = vcombine.low %v7556_v22, %v7563_v25  ;;  %v11615_v55 = vpop.permute.xlu0 %7677  ;;  %v7793_v17 = vadd.s32 4294967288, %v11612_v49  ;;  %v7828_v32 = vadd.s32 4294967248, %v11612_v49 }
 0x4cf   : > { %v6810_v42 = vcombine.low %v6802_v23, %v6809_v36  ;;  %v7814_v0 = vadd.s32 4294967264, %v11612_v49  ;;  %v11623_v13 = vsub.s32 %v7800_v50, %v9964_v58  ;;  %v11627_v31 = vsub.s32 %v11612_v49, %v9964_v58 }
 0x4d0   : > { %v7579_v12 = vcombine.low %v7570_v40, %v7577_v2  ;;  %v7586_v9 = vrot.slane %v7578_v41, %v10000_v46  ;;  %v11630_v63 = vsub.s32 %v7807_v14, %v9964_v58  ;;  %v11633_v6 = vsub.s32 %v7793_v17, %v9964_v58 }
 0x4d1   : > { %7737 = vperm.xlu1 %8734, %v6810_v42   ;;  %v7821_v59 = vadd.s32 4294967256, %v11612_v49  ;;  %v11637_v7 = vsub.s32 %v7828_v32, %v9964_v58  ;;  %v11640_v28 = vsub.s32 %v7814_v0, %v9964_v58  ;;  %v7842_v3 = vadd.s32 4294967232, %v11612_v49  ;;  %v7687_v56 = vpop.permute.xlu1 %7686 }
 0x4d2   : > { %v7593_v53 = vrot.slane %v7579_v12, %v10000_v46  ;;  %v7672_v57 = vpop.permute.xlu0 %7671  ;;  %v7835_v11 = vadd.s32 4294967240, %v11612_v49  ;;  %v7849_v19 = vadd.s32 4294967224, %v11612_v49  ;;  %v7905_v60 = vrot.slane %v11574_v34, %v11633_v6 }
 0x4d3   : > { %v7901_v5 = vrot.slane %v11565_v35, %v11627_v31  ;;  %v7863_v61 = vadd.s32 4294967208, %v11612_v49  ;;  %v7910_v23 = vrot.slane %v11547_v47, %v11623_v13  ;;  %v7920_v27 = vrot.slane %v11600_v20, %v11640_v28 }
 0x4d4   : > { %v7594_v1 = vcombine.low %v7586_v9, %v7593_v53  ;;  %v11655_v22 = vsub.s32 %v7821_v59, %v9964_v58  ;;  %v7915_v34 = vrot.slane %v11558_v10, %v11630_v63  ;;  %v7856_v35 = vadd.s32 4294967216, %v11612_v49 }
 0x4d5   : > { %v7906_v25 = vsel %vm7798_vm1, %v7905_v60, %v7901_v5  ;;  %v11662_v36 = vsub.s32 %v7842_v3, %v9964_v58  ;;  %v7870_v40 = vadd.s32 4294967200, %v11612_v49  ;;  %v11669_v20 = vsub.s32 %v7835_v11, %v9964_v58  ;;  %v7681_v17 = vpop.permute.xlu1 %7680 }
 0x4d6   : > { %7785 = vperm.xlu0 %8735, %v7594_v1   ;;  %v7911_v47 = vsel %vm7805_vm2, %v7910_v23, %v7906_v25  ;;  %v11666_v2 = vpop.permute.xlu0 %7689  ;;  %v11672_v41 = vsub.s32 %v7849_v19, %v9964_v58  ;;  %v7925_v10 = vrot.slane %v7660_v39, %v11655_v22  ;;  %v7930_v12 = vrot.slane %v11583_v38, %v11637_v7 }
 0x4d7   : > { %v7916_v42 = vsel %vm7812_vm3, %v7915_v34, %v7911_v47  ;;  %v7940_v53 = vrot.slane %v7669_v4, %v11662_v36  ;;  %v7877_v1 = vadd.s32 4294967192, %v11612_v49  ;;  %v7935_v50 = vrot.slane %v11593_v30, %v11669_v20 }
 0x4d8   : > { %v7921_v9 = vsel %vm7819_vm4, %v7920_v27, %v7916_v42  ;;  %v11685_v39 = vsub.s32 %v7856_v35, %v9964_v58  ;;  %v7884_v32 = vadd.s32 4294967184, %v11612_v49  ;;  %v11689_v38 = vsub.s32 %v7870_v40, %v9964_v58 }
 0x4d9   : > { %v7926_v14 = vsel %vm7826_vm5, %v7925_v10, %v7921_v9  ;;  %v11693_v4 = vsub.s32 %v7863_v61, %v9964_v58  ;;  %v7945_v59 = vrot.slane %v7672_v57, %v11672_v41  ;;  %v11702_v5 = vsub.s32 %v7877_v1, %v9964_v58  ;;  %v7699_v40 = vpop.permute.xlu1 %7698 }
 0x4da   : > { %v7931_v0 = vsel %vm7833_vm6, %v7930_v12, %v7926_v14  ;;  %v7950_v3 = vrot.slane %v11609_v51, %v11685_v39  ;;  %v7684_v11 = vpop.permute.xlu0 %7683  ;;  %v7960_v60 = vrot.slane %v7681_v17, %v11689_v38  ;;  %v11708_v23 = vsub.s32 %v7884_v32, %v9964_v58 }
 0x4db   : > { %v7936_v30 = vsel %vm7840_vm7, %v7935_v50, %v7931_v0  ;;  %v7955_v61 = vrot.slane %v11615_v55, %v11693_v4  ;;  %v7965_v27 = vrot.slane %v7684_v11, %v11702_v5 }
 0x4dc   : > { %v7941_v19 = vsel %vm7847_vm8, %v7940_v53, %v7936_v30  ;;  %v7970_v25 = vrot.slane %v7687_v56, %v11708_v23 }
 0x4dd   : > { %v7946_v57 = vsel %vm7854_vm9, %v7945_v59, %v7941_v19  ;;  %v7693_v10 = vpop.permute.xlu1 %7692 }
 0x4de   : > { %v7951_v51 = vsel %vm7861_vm10, %v7950_v3, %v7946_v57  ;;  %v7702_v9 = vpop.permute.xlu0 %7701 }
 0x4df   : > { %v7956_v34 = vsel %vm7868_vm11, %v7955_v61, %v7951_v51 }
 0x4e0   : > { %v7961_v35 = vsel %vm7875_vm12, %v7960_v60, %v7956_v34  ;;  %v7797_v34 = vrot.slane %v11300_v33, %v11633_v6 }
 0x4e1   : > { %v7966_v55 = vsel %vm7882_vm13, %v7965_v27, %v7961_v35  ;;  %v11719_v42 = vpop.permute.xlu1 %7710  ;;  %v7792_v35 = vrot.slane %v11433_v24, %v11627_v31 }
 0x4e2   : > { %v11717_v47 = vsel %vm7889_vm14, %v7970_v25, %v7966_v55  ;;  %v7696_v1 = vpop.permute.xlu0 %7695 }
 0x4e3   : > { %11950 = vst [vmem:[#allocation22_spill] sm:$0xff] %v11717_v47  ;;  %v7799_v47 = vsel %vm7798_vm1, %v7797_v34, %v7792_v35  ;;  %v7811_v34 = vrot.slane %v11271_v26, %v11630_v63 }
 0x4e5   : > { %v7705_v12 = vpop.permute.xlu1 %7704 }
 0x4e6   : > { %v11725_v56 = vpop.permute.xlu0 %7713 }
 0x4e9   : > { %v11721_v53 = vpop.permute.xlu1 %7722 }
 0x4ea   : > { %v11729_v17 = vpop.permute.xlu0 %7707 }
 0x4ed   : > { %v11723_v50 = vpop.permute.xlu1 %7716 }
 0x4ee   : > { %v11731_v32 = vpop.permute.xlu0 %7719 }
 0x4f1   : > { %v11727_v14 = vpop.permute.xlu1 %7725 }
 0x4f2   : > { %v7750_v59 = vpop.permute.xlu0 %7749 }
 0x4f3   : > { %v8073_v24 = vrot.slane %v7750_v59, %v11630_v63  ;;  %v7989_v59 = vrot.slane %v7699_v40, %v11623_v13 }
 0x4f6   : > { %v7744_v3 = vpop.permute.xlu0 %7743 }
 0x4f7   : > { %v8063_v25 = vrot.slane %v7744_v3, %v11633_v6  ;;  %v7980_v3 = vrot.slane %v7693_v10, %v11627_v31 }
 0x4fa   : > { %v11733_v0 = vpop.permute.xlu1 %7728 }
 0x4ff   : > { %v7762_v19 = vpop.permute.xlu0 %7761 }
 0x505   : > { %v11735_v30 = vpop.permute.xlu1 %7731 }
 0x506   : > { %11951 = vst [vmem:[#allocation23_spill] sm:$0xff] %v11735_v30 }
 0x50a   : > { %v7756_v61 = vpop.permute.xlu0 %7755 }
 0x50f   : > { %v7747_v11 = vpop.permute.xlu1 %7746 }
 0x510   : > { %v8068_v46 = vrot.slane %v7747_v11, %v11623_v13  ;;  %v7818_v11 = vrot.slane %v11354_v21, %v11640_v28 }
 0x514   : > { %v11738_v27 = vpop.permute.xlu0 %7770 }
 0x51a   : > { %v7741_v60 = vpop.permute.xlu1 %7740 }
 0x51b   : > { %v8059_v51 = vrot.slane %v7741_v60, %v11627_v31  ;;  %v7804_v60 = vrot.slane %v11247_v62, %v11623_v13  ;;  %v7825_v62 = vrot.slane %v11409_v18, %v11655_v22  ;;  %v7846_v13 = vrot.slane %v11465_v44, %v11662_v36 }
 0x51c   : > { %v8004_v44 = vrot.slane %v11729_v17, %v11655_v22 }
 0x51d   : > { %v8064_v55 = vsel %vm7798_vm1, %v8063_v25, %v8059_v51  ;;  %v7806_v51 = vsel %vm7805_vm2, %v7804_v60, %v7799_v47  ;;  %v8083_v47 = vrot.slane %v7756_v61, %v11655_v22  ;;  %v7994_v61 = vrot.slane %v7702_v9, %v11630_v63 }
 0x51e   : > { %v8069_v16 = vsel %vm7805_vm2, %v8068_v46, %v8064_v55  ;;  %v7984_v46 = vrot.slane %v7696_v1, %v11633_v6  ;;  %v7813_v31 = vsel %vm7812_vm3, %v7811_v34, %v7806_v51  ;;  %v7999_v1 = vrot.slane %v7705_v12, %v11640_v28 }
 0x51f   : > { %v11751_v30 = vpop.permute.xlu0 %7773  ;;  %v8074_v25 = vsel %vm7812_vm3, %v8073_v24, %v8069_v16  ;;  %v7820_v21 = vsel %vm7819_vm4, %v7818_v11, %v7813_v31  ;;  %v7832_v16 = vrot.slane %v11326_v15, %v11637_v7  ;;  %v8093_v24 = vrot.slane %v7762_v19, %v11669_v20 }
 0x520   : > { %v7985_v10 = vsel %vm7798_vm1, %v7984_v46, %v7980_v3  ;;  %v7827_v35 = vsel %vm7826_vm5, %v7825_v62, %v7820_v21  ;;  %v7839_v3 = vrot.slane %v11383_v37, %v11669_v20  ;;  %v7853_v37 = vrot.slane %v11481_v43, %v11672_v41 }
 0x521   : > { %v7990_v6 = vsel %vm7805_vm2, %v7989_v59, %v7985_v10  ;;  %v8009_v11 = vrot.slane %v11719_v42, %v11637_v7  ;;  %v7860_v22 = vrot.slane %v11439_v45, %v11685_v39  ;;  %v7874_v31 = vrot.slane %v11520_v29, %v11689_v38 }
 0x522   : > { %v7995_v15 = vsel %vm7812_vm3, %v7994_v61, %v7990_v6  ;;  %v8108_v10 = vrot.slane %v11738_v27, %v11685_v39  ;;  %v7867_v45 = vrot.slane %v11452_v52, %v11693_v4  ;;  %v8024_v29 = vrot.slane %v11731_v32, %v11672_v41  ;;  %v11952_v61 = vld [vmem:[#allocation23_spill] sm:$0xff] }
 0x523   : > { %v8113_v27 = vrot.slane %v11751_v30, %v11693_v4  ;;  %v8034_v30 = vrot.slane %v11727_v14, %v11693_v4  ;;  %v11953_v4 = vld [vmem:[#allocation21_spill] sm:$0xff] }
 0x524   : > { %v7759_v57 = vpop.permute.xlu1 %7758 }
 0x525   : > { %v8088_v55 = vrot.slane %v7759_v57, %v11637_v7 }
 0x529   : > { %v7768_v26 = vpop.permute.xlu0 %7767 }
 0x52a   : > { %v8103_v46 = vrot.slane %v7768_v26, %v11672_v41  ;;  %v7881_v26 = vrot.slane %v11534_v54, %v11702_v5  ;;  %v7888_v54 = vrot.slane %v11494_v8, %v11708_v23 }
 0x52f   : > { %v7753_v48 = vpop.permute.xlu1 %7752 }
 0x530   : > { %v8078_v33 = vrot.slane %v7753_v48, %v11640_v28  ;;  %v8000_v28 = vsel %vm7819_vm4, %v7999_v1, %v7995_v15 }
 0x531   : > { %v8005_v19 = vsel %vm7826_vm5, %v8004_v44, %v8000_v28 }
 0x532   : > { %v8079_v48 = vsel %vm7819_vm4, %v8078_v33, %v8074_v25  ;;  %v7834_v33 = vsel %vm7833_vm6, %v7832_v16, %v7827_v35  ;;  %v8010_v17 = vsel %vm7833_vm6, %v8009_v11, %v8005_v19  ;;  %v8019_v25 = vrot.slane %v11723_v50, %v11662_v36 }
 0x533   : > { %v8084_v18 = vsel %vm7826_vm5, %v8083_v47, %v8079_v48  ;;  %v7841_v9 = vsel %vm7840_vm7, %v7839_v3, %v7834_v33  ;;  %v8014_v48 = vrot.slane %v11725_v56, %v11669_v20  ;;  %v8029_v16 = vrot.slane %v11721_v53, %v11685_v39 }
 0x534   : > { %v8089_v40 = vsel %vm7833_vm6, %v8088_v55, %v8084_v18  ;;  %v11788_v12 = vpop.permute.xlu0 %7782  ;;  %v7848_v51 = vsel %vm7847_vm8, %v7846_v13, %v7841_v9 }
 0x535   : > { %v8094_v57 = vsel %vm7840_vm7, %v8093_v24, %v8089_v40  ;;  %v7855_v62 = vsel %vm7854_vm9, %v7853_v37, %v7848_v51  ;;  %v8015_v47 = vsel %vm7840_vm7, %v8014_v48, %v8010_v17 }
 0x536   : > { %v7862_v42 = vsel %vm7861_vm10, %v7860_v22, %v7855_v62  ;;  %v8020_v50 = vsel %vm7847_vm8, %v8019_v25, %v8015_v47  ;;  %v11956_v62 = vlaneseq }
 0x537   : > { %v7869_v21 = vsel %vm7868_vm11, %v7867_v45, %v7862_v42 }
 0x538   : > { %v7876_v59 = vsel %vm7875_vm12, %v7874_v31, %v7869_v21  ;;  %vm8162_vm0 = vcmp.lt.s32.totalorder %v11956_v62, 512 }
 0x539   : > { %v7883_v32 = vsel %vm7882_vm13, %v7881_v26, %v7876_v59 }
 0x53a   : > { %v7765_v60 = vpop.permute.xlu1 %7764  ;;  %v7890_v33 = vsel %vm7889_vm14, %v7888_v54, %v7883_v32 }
 0x53b   : > { %v8098_v63 = vrot.slane %v7765_v60, %v11662_v36  ;;  %v7891_v36 = vadd.s32 4294967176, %v11612_v49  ;;  %v8025_v49 = vsel %vm7854_vm9, %v8024_v29, %v8020_v50  ;;  %v8044_v60 = vrot.slane %v11952_v61, %v11702_v5 }
 0x53c   : > { %v8030_v1 = vsel %vm7861_vm10, %v8029_v16, %v8025_v49 }
 0x53d   : > { %v8099_v34 = vsel %vm7847_vm8, %v8098_v63, %v8094_v57  ;;  %v7894_v18 = vsub.s32 %v7891_v36, %v9964_v58  ;;  %v8039_v58 = vrot.slane %v11733_v0, %v11689_v38  ;;  %v8035_v13 = vsel %vm7868_vm11, %v8034_v30, %v8030_v1  ;;  %v11954_v0 = vld [vmem:[#allocation22_spill] sm:$0xff] }
 0x53e   : > { %v8104_v7 = vsel %vm7854_vm9, %v8103_v46, %v8099_v34 }
 0x53f   : > { %v7777_v43 = vpop.permute.xlu0 %7776  ;;  %v8109_v20 = vsel %vm7861_vm10, %v8108_v10, %v8104_v7  ;;  %v7975_v53 = vrot.slane %v11666_v2, %v7894_v18  ;;  %v7895_v14 = vrot.slane %v11953_v4, %v7894_v18  ;;  %v8040_v2 = vsel %vm7875_vm12, %v8039_v58, %v8035_v13 }
 0x540   : > { %v8114_v35 = vsel %vm7868_vm11, %v8113_v27, %v8109_v20  ;;  %v8118_v41 = vrot.slane %v7777_v43, %v11689_v38  ;;  %v8045_v24 = vsel %vm7882_vm13, %v8044_v60, %v8040_v2 }
 0x541   : > { %v7976_v40 = vsel %vm7896_vm15, %v7975_v53, %v11954_v0  ;;  %v7897_v28 = vsel %vm7896_vm15, %v7895_v14, %v7890_v33 }
 0x542   : > { %v8119_v55 = vsel %vm7875_vm12, %v8118_v41, %v8114_v35  ;;  %v8135_v57 = vcombine.low %v7897_v28, %v7976_v40 }
 0x545   : > { %v7735_v56 = vpop.permute.xlu1 %7734 }
 0x546   : > { %v8049_v8 = vrot.slane %v7735_v56, %v11708_v23 }
 0x548   : > { %v8050_v9 = vsel %vm7889_vm14, %v8049_v8, %v8045_v24 }
 0x54a   : > { %v7780_v52 = vpop.permute.xlu0 %7779 }
 0x54b   : > { %v8123_v6 = vrot.slane %v7780_v52, %v11702_v5  ;;  %v8128_v5 = vrot.slane %v11788_v12, %v11708_v23  ;;  %v11955_v23 = vld [vmem:[#allocation20_spill] sm:$0xff] }
 0x54c   : > { %v8143_v12 = vrot.slane %v8135_v57, %v11955_v23 }
 0x54d   : > { %v8124_v38 = vsel %vm7882_vm13, %v8123_v6, %v8119_v55 }
 0x54e   : > { %v8129_v44 = vsel %vm7889_vm14, %v8128_v5, %v8124_v38 }
 0x550   : > { %v7738_v39 = vpop.permute.xlu1 %7737 }
 0x551   : > { %v8054_v3 = vrot.slane %v7738_v39, %v7894_v18 }
 0x553   : > { %v8055_v51 = vsel %vm7896_vm15, %v8054_v3, %v8050_v9 }
 0x555   : > { %v7786_v15 = vpop.permute.xlu0 %7785 }
 0x556   : > { %v8133_v63 = vrot.slane %v7786_v15, %v7894_v18 }
 0x558   : > { %v8134_v37 = vsel %vm7896_vm15, %v8133_v63, %v8129_v44 }
 0x559   : > { %v8136_v19 = vcombine.low %v8055_v51, %v8134_v37 }
 0x55b   : > { %v8150_v11 = vrot.slane %v8136_v19, %v11955_v23 }
 0x55d   : > { %v8151_v34 = vcombine.low %v8143_v12, %v8150_v11 }
 0x55f   : > { %v8158_v46 = vrot.slane %v8151_v34, %v11955_v23 }
 0x561   : > { %8164 = vst.msk [vmem:[%s365_s13] sm:$0xf] %vm8162_vm0, %v8158_v46 }
 0x562   : > { %9211 = shalt.err (!%p9208_p8)
}
 0x563   : > { %s9212_s22 = scalar_lea.hbm %s11875_s30, 64  ;;  %s9216_s9 = scalar_lea.hbm %s11926_s7, 128 }
 0x564   : > { %p9213_p6 = scmp.ne.s32.totalorder %s11875_s30, %s9212_s22  ;;  %p9217_p0 = scmp.lt.u32.totalorder %s11875_s30, %s11926_s7 }
 0x565   : > { %p9218_p5 = scmp.lt.u32.totalorder %s9216_s9, %s9212_s22  ;;  %p9220_p7 = scmp.lt.u32.totalorder %s9212_s22, %s11875_s30 }
 0x566   : > { %p9214_p10 = pnand %p9213_p6, %p11957_p4 }
 0x567   : > { %p9219_p9 = por %p9218_p5, %p9217_p0 }
 0x568   : > { %p9215_p11 = pneg %p9214_p10 }
 0x569   : > { %p9221_p12 = por %p9220_p7, %p9219_p9 }
 0x56b   : > { %p9222_p13 = pnand %p9221_p12, %p9215_p11 }
 0x56d   : > { %9225 = shalt.err (!%p9222_p13)
}
 0x56e   : > { %8655 = dma.vmem_to_hbm [thread:$0]  (%p11957_p4), %s11877_s23, 64, %s11875_s30, %s8166_s17  }
 0x56f PF: > { %s8192_s13 = sand.u32 1, %s9264_s26   ;;  %p11958_p1 = scmp.ne.s32.totalorder %s11939_s16, 0 }
 0x570   : > { %p11959_p3 = scmp.ge.s32.totalorder %s9276_s29, 2  ;;  %s8193_s21 = scalar_lea.sflag [#allocation5], %s8192_s13 }
 0x572   : > { %p8678_p2 = pnand %p11959_p3, %p11958_p1 }
 0x574   : > { %9259 = dma.done.wait (!%p8678_p2), %s8193_s21, 64  }
 0x575   : > { %9261 = vsyncadd (!%p8678_p2), %s8193_s21, 4294967232  ;;  %p25_p8 = scmp.ge.s32.totalorder %s9497_s12, 4   ;;  %s11960_s26 = smov %s9268_s27 }
 0x576   : > { %s11961_s27 = smov %s9272_s28  ;;  %s11962_s28 = smov %s9509_s6 }
 0x577   : > { %s11963_s29 = smov %s9497_s12  ;;  %27 = sbr.rel (!%p25_p8) target bundleno = 11 (0xb), region = 113 }
 0x57e   :  { %8198 = vsyncpa [#allocation4], 1 }
 0x57f   :  { %8200 = vsyncpa [#allocation4 + $0x1], 1 }
 0x580   :  { %8201 = vsyncpa [#allocation7], 1 }
 0x581   :  { %8202 = vsyncpa [#allocation10], 1 }
 0x582   :  { %8203 = vsyncpa [#allocation13], 1 }
 0x583   :  { %8204 = vsyncpa [#allocation5], 1 }
 0x584   :  { %8206 = vsyncpa [#allocation5 + $0x1], 1 }

</bundles_post_ra>
